<compile_context>
chip_gen: v7x
topology: tpu7x:2x2x1
jax: 0.10.0
libtpu: 0.0.40
codegen_flags: <defaults>
</compile_context>

<pallas_src>
import numpy as np
import jax
import jax.numpy as jnp
from jax.experimental import pallas as pl
from jax.experimental.pallas import tpu as pltpu


# ------------------------------ Pallas kernel ------------------------------- #

def _conv4x4_s2_relu(xf, g_ref, b_ref):
    """One Conv2d(k=4, s=2, p=1) + bias + ReLU on a single image.

    xf     : (Hin, Win*Cin)        activation, NHWC flattened over (W, C)
    g_ref  : (4, Win*Cin, Wo*Cout) folded weights (W taps + channels + W pad)
    b_ref  : (1, Wo*Cout)          bias tiled over output columns
    returns: (Ho, Wo*Cout)
    """
    hin = xf.shape[0]
    ho = hin // 2
    wocout = g_ref.shape[2]

    # Row-selection matrices S_kh (stride 2, zero-pad 1 along H):
    #   S_kh[o, i] = 1  iff  i == 2*o + kh - 1
    row = jax.lax.broadcasted_iota(jnp.int32, (ho, hin), 0)
    col = jax.lax.broadcasted_iota(jnp.int32, (ho, hin), 1)

    acc = jnp.zeros((ho, wocout), jnp.float32)
    for kh in range(4):
        sel = jnp.where(col == 2 * row + (kh - 1), 1.0, 0.0)          # (Ho, Hin)
        f = jnp.dot(sel, xf, preferred_element_type=jnp.float32)      # (Ho, Win*Cin)
        acc = acc + jnp.dot(f, g_ref[kh], preferred_element_type=jnp.float32)
    return jnp.maximum(acc + b_ref[...], 0.0)


def _simple_cnn_kernel(x_ref, rs_ref,
                       g0, b0, g1, b1, g2, b2, g3, b3, g4, b4, g5, b5,
                       w1i_ref, w1r_ref, fb1_ref, w2_ref, fb2_ref,
                       w3_ref, fb3_ref, o_ref):
    # ---- conv stack: 6x [Conv2d(k=4,s=2,p=1) + ReLU], fully VMEM-resident ----
    y = x_ref[0].astype(jnp.float32)                      # (H, W*3)
    for g_ref, b_ref in ((g0, b0), (g1, b1), (g2, b2),
                         (g3, b3), (g4, b4), (g5, b5)):
        y = _conv4x4_s2_relu(y, g_ref, b_ref)

    # ---- AdaptiveAvgPool2d(1) + flatten --------------------------------------
    feat = w1i_ref.shape[0]                               # 128
    spatial = (y.shape[0] * y.shape[1]) // feat
    pooled = jnp.mean(y.reshape(spatial, feat), axis=0, keepdims=True)  # (1, 128)

    # ---- cat([pooled, robot_state]) @ W1  ==  pooled @ W1a + rs @ W1b --------
    rs = rs_ref[0].astype(jnp.float32)                    # (1, RS)
    h = (jnp.dot(pooled, w1i_ref[...], preferred_element_type=jnp.float32)
         + jnp.dot(rs, w1r_ref[...], preferred_element_type=jnp.float32)
         + fb1_ref[...])
    h = jnp.maximum(h, 0.0)
    h = jnp.maximum(
        jnp.dot(h, w2_ref[...], preferred_element_type=jnp.float32) + fb2_ref[...],
        0.0)
    out = jnp.dot(h, w3_ref[...], preferred_element_type=jnp.float32) + fb3_ref[...]
    o_ref[0] = out.astype(o_ref.dtype)                    # (1, num_classes)


# --------------------------- pallas_call wrapper ---------------------------- #

def _bcast_spec(shape):
    zeros = (0,) * len(shape)

    def index_map(n):
        return zeros

    return pl.BlockSpec(shape, index_map)


def simple_cnn_forward(x_nchw, robot_state, folded):
    """SimpleCNN.forward(x, robot_state). x: NCHW f32; robot_state: (N, RS)."""
    N, C, H, W = x_nchw.shape
    RS = robot_state.shape[1]
    NC = folded["fc3_b"].shape[-1]

    # Single tiny boundary transpose/reshape; everything else runs in one kernel.
    xf = jnp.transpose(x_nchw, (0, 2, 3, 1)).reshape(N, H, W * C)   # (N, H, W*C)
    rs3 = robot_state.reshape(N, 1, RS)

    operands = [xf, rs3]
    in_specs = [
        pl.BlockSpec((1, H, W * C), lambda n: (n, 0, 0)),
        pl.BlockSpec((1, 1, RS), lambda n: (n, 0, 0)),
    ]
    for i in range(6):
        g = folded[f"g{i}"]
        bt = folded[f"bt{i}"]
        operands += [g, bt]
        in_specs += [_bcast_spec(g.shape), _bcast_spec(bt.shape)]
    for name in ("fc1_wi", "fc1_wr", "fc1_b", "fc2_w", "fc2_b", "fc3_w", "fc3_b"):
        a = folded[name]
        operands.append(a)
        in_specs.append(_bcast_spec(a.shape))

    out = pl.pallas_call(
        _simple_cnn_kernel,
        out_shape=jax.ShapeDtypeStruct((N, 1, NC), jnp.float32),
        grid_spec=pltpu.PrefetchScalarGridSpec(
            num_scalar_prefetch=0,
            grid=(N,),
            in_specs=in_specs,
            out_specs=pl.BlockSpec((1, 1, NC), lambda n: (n, 0, 0)),
        ),
        compiler_params=pltpu.CompilerParams(
            dimension_semantics=("parallel",)),
    )(*operands)
    return out.reshape(N, NC)


# --------------------- host-side (one-time) weight folding ------------------ #

def fold_params(params, H, W):
    """Fold each 4x4/stride-2/pad-1 conv into per-kh matmul matrices.

    G[kh, wi*Cin+ci, wo*Cout+co] = sum_kw [wi == 2*wo + kw - 1] * w[co, ci, kh, kw]
    so the W-axis stride/padding and the input channels become one dense,
    lane-aligned contraction; the H-axis stride/padding is handled in-kernel by
    the iota-built selection matmul.
    """
    fp = {}
    win = W
    for i in range(6):
        w = np.asarray(params[f"conv{i}_w"], np.float32)   # torch OIHW: (Cout, Cin, 4, 4)
        b = np.asarray(params[f"conv{i}_b"], np.float32)   # (Cout,)
        cout, cin, K, _ = w.shape
        wo = win // 2
        ind = np.zeros((K, win, wo), np.float32)           # [kw, wi, wo]
        wi_idx = np.arange(win)[:, None]
        wo_idx = np.arange(wo)[None, :]
        for kw in range(K):
            ind[kw] = (wi_idx == 2 * wo_idx + kw - 1).astype(np.float32)
        G = np.einsum("qwv,oihq->hwivo", ind, w).reshape(K, win * cin, wo * cout)
        fp[f"g{i}"] = jnp.asarray(G)
        fp[f"bt{i}"] = jnp.asarray(np.tile(b, wo).reshape(1, wo * cout))
        win = wo

    feat = params["conv5_w"].shape[0]                      # 128
    fw1 = params["fc1_w"]                                  # (feat + RS, 256)
    fp["fc1_wi"] = fw1[:feat]
    fp["fc1_wr"] = fw1[feat:]
    fp["fc1_b"] = params["fc1_b"].reshape(1, -1)
    fp["fc2_w"] = params["fc2_w"]
    fp["fc2_b"] = params["fc2_b"].reshape(1, -1)
    fp["fc3_w"] = params["fc3_w"]
    fp["fc3_b"] = params["fc3_b"].reshape(1, -1)
    return fp


# --------------------------- pure-JAX reference ----------------------------- #

def _reference_forward(x, robot_state, params):
    hp = jax.lax.Precision.HIGHEST
    y = x
    for i in range(6):
        y = jax.lax.conv_general_dilated(
            y, params[f"conv{i}_w"], window_strides=(2, 2),
            padding=((1, 1), (1, 1)),
            dimension_numbers=("NCHW", "OIHW", "NCHW"),
            precision=hp)
        y = y + params[f"conv{i}_b"][None, :, None, None]
        y = jnp.maximum(y, 0.0)
    y = jnp.mean(y, axis=(2, 3))                           # AdaptiveAvgPool2d(1) + flatten
    y = jnp.concatenate([y, robot_state], axis=1)
    y = jnp.maximum(jnp.dot(y, params["fc1_w"], precision=hp) + params["fc1_b"], 0.0)
    y = jnp.maximum(jnp.dot(y, params["fc2_w"], precision=hp) + params["fc2_b"], 0.0)
    return jnp.dot(y, params["fc3_w"], precision=hp) + params["fc3_b"]


# ------------------------------ parameter init ------------------------------ #

def init_params(key, robot_state_dim=8, num_classes=256):
    chans = [3, 4, 8, 16, 32, 64, 128]
    keys = jax.random.split(key, 32)
    p = {}
    k = 0
    for i in range(6):
        cin, cout = chans[i], chans[i + 1]
        std = (2.0 / (cout * 4 * 4)) ** 0.5                 # kaiming_normal_, mode='fan_out'
        p[f"conv{i}_w"] = std * jax.random.normal(keys[k], (cout, cin, 4, 4), jnp.float32)
        k += 1
        p[f"conv{i}_b"] = 0.05 * jax.random.normal(keys[k], (cout,), jnp.float32)
        k += 1
    dims = [chans[-1] + robot_state_dim, 256, 256, num_classes]
    for j in range(3):
        fin, fout = dims[j], dims[j + 1]
        p[f"fc{j+1}_w"] = (fin ** -0.5) * jax.random.normal(keys[k], (fin, fout), jnp.float32)
        k += 1
        p[f"fc{j+1}_b"] = 0.05 * jax.random.normal(keys[k], (fout,), jnp.float32)
        k += 1
    return p


# ------------------------------------ main ----------------------------------- #

if __name__ == "__main__":
    key = jax.random.PRNGKey(0)
    kx, kr, kp = jax.random.split(key, 3)

    # Smallest spatial size that survives six stride-2 convs: 64 -> 32 -> ... -> 1.
    N, C, H, W = 2, 3, 64, 64
    RS, NC = 8, 256

    x = jax.random.normal(kx, (N, C, H, W), jnp.float32)
    robot_state = jax.random.normal(kr, (N, RS), jnp.float32)
    params = init_params(kp, robot_state_dim=RS, num_classes=NC)
    folded = fold_params(params, H, W)

    out = jax.block_until_ready(simple_cnn_forward(x, robot_state, folded))
    assert out.shape == (N, NC)

    ref = jax.block_until_ready(_reference_forward(x, robot_state, params))
    np.testing.assert_allclose(np.asarray(out), np.asarray(ref), rtol=1e-2, atol=1e-3)

    print("KERNEL_OK")
</pallas_src>

<mosaic_0001>
module attributes {stable_mosaic.version = 11 : i64} {
  func.func @_simple_cnn_kernel(%arg0: i32, %arg1: memref<1x64x192xf32, #tpu.memory_space<vmem>>, %arg2: memref<1x1x8xf32, #tpu.memory_space<vmem>>, %arg3: memref<4x192x128xf32, #tpu.memory_space<vmem>>, %arg4: memref<1x128xf32, #tpu.memory_space<vmem>>, %arg5: memref<4x128x128xf32, #tpu.memory_space<vmem>>, %arg6: memref<1x128xf32, #tpu.memory_space<vmem>>, %arg7: memref<4x128x128xf32, #tpu.memory_space<vmem>>, %arg8: memref<1x128xf32, #tpu.memory_space<vmem>>, %arg9: memref<4x128x128xf32, #tpu.memory_space<vmem>>, %arg10: memref<1x128xf32, #tpu.memory_space<vmem>>, %arg11: memref<4x128x128xf32, #tpu.memory_space<vmem>>, %arg12: memref<1x128xf32, #tpu.memory_space<vmem>>, %arg13: memref<4x128x128xf32, #tpu.memory_space<vmem>>, %arg14: memref<1x128xf32, #tpu.memory_space<vmem>>, %arg15: memref<128x256xf32, #tpu.memory_space<vmem>>, %arg16: memref<8x256xf32, #tpu.memory_space<vmem>>, %arg17: memref<1x256xf32, #tpu.memory_space<vmem>>, %arg18: memref<256x256xf32, #tpu.memory_space<vmem>>, %arg19: memref<1x256xf32, #tpu.memory_space<vmem>>, %arg20: memref<256x256xf32, #tpu.memory_space<vmem>>, %arg21: memref<1x256xf32, #tpu.memory_space<vmem>>, %arg22: memref<1x1x256xf32, #tpu.memory_space<vmem>>) attributes {dimension_semantics = [#tpu.dimension_semantics<parallel>], iteration_bounds = array<i64: 2>, scalar_prefetch = 0 : i64, scratch_operands = 0 : i64, tpu.core_type = #tpu.core_type<tc>, window_params = [{transform_indices = @transform_0, window_bounds = array<i64: 1, 64, 192>}, {transform_indices = @transform_1, window_bounds = array<i64: 1, 1, 8>}, {pipeline_mode = #tpu.pipeline_mode<synchronous>, transform_indices = @transform_2, window_bounds = array<i64: 4, 192, 128>}, {pipeline_mode = #tpu.pipeline_mode<synchronous>, transform_indices = @transform_3, window_bounds = array<i64: 1, 128>}, {pipeline_mode = #tpu.pipeline_mode<synchronous>, transform_indices = @transform_4, window_bounds = array<i64: 4, 128, 128>}, {pipeline_mode = #tpu.pipeline_mode<synchronous>, transform_indices = @transform_5, window_bounds = array<i64: 1, 128>}, {pipeline_mode = #tpu.pipeline_mode<synchronous>, transform_indices = @transform_6, window_bounds = array<i64: 4, 128, 128>}, {pipeline_mode = #tpu.pipeline_mode<synchronous>, transform_indices = @transform_7, window_bounds = array<i64: 1, 128>}, {pipeline_mode = #tpu.pipeline_mode<synchronous>, transform_indices = @transform_8, window_bounds = array<i64: 4, 128, 128>}, {pipeline_mode = #tpu.pipeline_mode<synchronous>, transform_indices = @transform_9, window_bounds = array<i64: 1, 128>}, {pipeline_mode = #tpu.pipeline_mode<synchronous>, transform_indices = @transform_10, window_bounds = array<i64: 4, 128, 128>}, {pipeline_mode = #tpu.pipeline_mode<synchronous>, transform_indices = @transform_11, window_bounds = array<i64: 1, 128>}, {pipeline_mode = #tpu.pipeline_mode<synchronous>, transform_indices = @transform_12, window_bounds = array<i64: 4, 128, 128>}, {pipeline_mode = #tpu.pipeline_mode<synchronous>, transform_indices = @transform_13, window_bounds = array<i64: 1, 128>}, {pipeline_mode = #tpu.pipeline_mode<synchronous>, transform_indices = @transform_14, window_bounds = array<i64: 128, 256>}, {pipeline_mode = #tpu.pipeline_mode<synchronous>, transform_indices = @transform_15, window_bounds = array<i64: 8, 256>}, {pipeline_mode = #tpu.pipeline_mode<synchronous>, transform_indices = @transform_16, window_bounds = array<i64: 1, 256>}, {pipeline_mode = #tpu.pipeline_mode<synchronous>, transform_indices = @transform_17, window_bounds = array<i64: 256, 256>}, {pipeline_mode = #tpu.pipeline_mode<synchronous>, transform_indices = @transform_18, window_bounds = array<i64: 1, 256>}, {pipeline_mode = #tpu.pipeline_mode<synchronous>, transform_indices = @transform_19, window_bounds = array<i64: 256, 256>}, {pipeline_mode = #tpu.pipeline_mode<synchronous>, transform_indices = @transform_20, window_bounds = array<i64: 1, 256>}, {transform_indices = @transform_21, window_bounds = array<i64: 1, 1, 256>}]} {
    %c0 = arith.constant 0 : index
    %c0_0 = arith.constant 0 : index
    %c0_1 = arith.constant 0 : index
    %0 = vector.load %arg1[%c0, %c0_0, %c0_1] : memref<1x64x192xf32, #tpu.memory_space<vmem>>, vector<1x64x192xf32>
    %1 = vector.shape_cast %0 : vector<1x64x192xf32> to vector<64x192xf32>
    %2 = tpu.iota {dimensions = array<i32: 0>} : vector<32x64xi32>
    %3 = tpu.iota {dimensions = array<i32: 1>} : vector<32x64xi32>
    %cst = arith.constant 0.000000e+00 : f32
    %4 = vector.broadcast %cst : f32 to vector<32x128xf32>
    %c2_i32 = arith.constant 2 : i32
    %5 = vector.broadcast %c2_i32 : i32 to vector<32x64xi32>
    %6 = arith.muli %5, %2 : vector<32x64xi32>
    %c-1_i32 = arith.constant -1 : i32
    %7 = vector.broadcast %c-1_i32 : i32 to vector<32x64xi32>
    %8 = arith.addi %6, %7 : vector<32x64xi32>
    %9 = arith.cmpi eq, %3, %8 : vector<32x64xi32>
    %cst_2 = arith.constant 1.000000e+00 : f32
    %cst_3 = arith.constant 0.000000e+00 : f32
    %10 = vector.broadcast %cst_2 : f32 to vector<32x64xf32>
    %11 = vector.broadcast %cst_3 : f32 to vector<32x64xf32>
    %12 = arith.select %9, %10, %11 : vector<32x64xi1>, vector<32x64xf32>
    %cst_4 = arith.constant dense<0.000000e+00> : vector<32x192xf32>
    %13 = tpu.matmul %12, %1, %cst_4 {dimension_numbers = #tpu.dot_dimension_numbers<[1], [0], [0], [1], [0, 0, 1, 1], [], []>} : vector<32x64xf32>, vector<64x192xf32>, vector<32x192xf32> -> vector<32x192xf32>
    %c0_5 = arith.constant 0 : index
    %c0_6 = arith.constant 0 : index
    %c0_7 = arith.constant 0 : index
    %14 = vector.load %arg3[%c0_5, %c0_6, %c0_7] : memref<4x192x128xf32, #tpu.memory_space<vmem>>, vector<1x192x128xf32>
    %15 = vector.shape_cast %14 : vector<1x192x128xf32> to vector<192x128xf32>
    %cst_8 = arith.constant dense<0.000000e+00> : vector<32x128xf32>
    %16 = tpu.matmul %13, %15, %cst_8 {dimension_numbers = #tpu.dot_dimension_numbers<[1], [0], [0], [1], [0, 0, 1, 1], [], []>} : vector<32x192xf32>, vector<192x128xf32>, vector<32x128xf32> -> vector<32x128xf32>
    %17 = arith.addf %4, %16 : vector<32x128xf32>
    %c2_i32_9 = arith.constant 2 : i32
    %18 = vector.broadcast %c2_i32_9 : i32 to vector<32x64xi32>
    %19 = arith.muli %18, %2 : vector<32x64xi32>
    %c0_i32 = arith.constant 0 : i32
    %20 = vector.broadcast %c0_i32 : i32 to vector<32x64xi32>
    %21 = arith.addi %19, %20 : vector<32x64xi32>
    %22 = arith.cmpi eq, %3, %21 : vector<32x64xi32>
    %cst_10 = arith.constant 1.000000e+00 : f32
    %cst_11 = arith.constant 0.000000e+00 : f32
    %23 = vector.broadcast %cst_10 : f32 to vector<32x64xf32>
    %24 = vector.broadcast %cst_11 : f32 to vector<32x64xf32>
    %25 = arith.select %22, %23, %24 : vector<32x64xi1>, vector<32x64xf32>
    %cst_12 = arith.constant dense<0.000000e+00> : vector<32x192xf32>
    %26 = tpu.matmul %25, %1, %cst_12 {dimension_numbers = #tpu.dot_dimension_numbers<[1], [0], [0], [1], [0, 0, 1, 1], [], []>} : vector<32x64xf32>, vector<64x192xf32>, vector<32x192xf32> -> vector<32x192xf32>
    %c1 = arith.constant 1 : index
    %c0_13 = arith.constant 0 : index
    %c0_14 = arith.constant 0 : index
    %27 = vector.load %arg3[%c1, %c0_13, %c0_14] : memref<4x192x128xf32, #tpu.memory_space<vmem>>, vector<1x192x128xf32>
    %28 = vector.shape_cast %27 : vector<1x192x128xf32> to vector<192x128xf32>
    %cst_15 = arith.constant dense<0.000000e+00> : vector<32x128xf32>
    %29 = tpu.matmul %26, %28, %cst_15 {dimension_numbers = #tpu.dot_dimension_numbers<[1], [0], [0], [1], [0, 0, 1, 1], [], []>} : vector<32x192xf32>, vector<192x128xf32>, vector<32x128xf32> -> vector<32x128xf32>
    %30 = arith.addf %17, %29 : vector<32x128xf32>
    %c2_i32_16 = arith.constant 2 : i32
    %31 = vector.broadcast %c2_i32_16 : i32 to vector<32x64xi32>
    %32 = arith.muli %31, %2 : vector<32x64xi32>
    %c1_i32 = arith.constant 1 : i32
    %33 = vector.broadcast %c1_i32 : i32 to vector<32x64xi32>
    %34 = arith.addi %32, %33 : vector<32x64xi32>
    %35 = arith.cmpi eq, %3, %34 : vector<32x64xi32>
    %cst_17 = arith.constant 1.000000e+00 : f32
    %cst_18 = arith.constant 0.000000e+00 : f32
    %36 = vector.broadcast %cst_17 : f32 to vector<32x64xf32>
    %37 = vector.broadcast %cst_18 : f32 to vector<32x64xf32>
    %38 = arith.select %35, %36, %37 : vector<32x64xi1>, vector<32x64xf32>
    %cst_19 = arith.constant dense<0.000000e+00> : vector<32x192xf32>
    %39 = tpu.matmul %38, %1, %cst_19 {dimension_numbers = #tpu.dot_dimension_numbers<[1], [0], [0], [1], [0, 0, 1, 1], [], []>} : vector<32x64xf32>, vector<64x192xf32>, vector<32x192xf32> -> vector<32x192xf32>
    %c2 = arith.constant 2 : index
    %c0_20 = arith.constant 0 : index
    %c0_21 = arith.constant 0 : index
    %40 = vector.load %arg3[%c2, %c0_20, %c0_21] : memref<4x192x128xf32, #tpu.memory_space<vmem>>, vector<1x192x128xf32>
    %41 = vector.shape_cast %40 : vector<1x192x128xf32> to vector<192x128xf32>
    %cst_22 = arith.constant dense<0.000000e+00> : vector<32x128xf32>
    %42 = tpu.matmul %39, %41, %cst_22 {dimension_numbers = #tpu.dot_dimension_numbers<[1], [0], [0], [1], [0, 0, 1, 1], [], []>} : vector<32x192xf32>, vector<192x128xf32>, vector<32x128xf32> -> vector<32x128xf32>
    %43 = arith.addf %30, %42 : vector<32x128xf32>
    %c2_i32_23 = arith.constant 2 : i32
    %44 = vector.broadcast %c2_i32_23 : i32 to vector<32x64xi32>
    %45 = arith.muli %44, %2 : vector<32x64xi32>
    %c2_i32_24 = arith.constant 2 : i32
    %46 = vector.broadcast %c2_i32_24 : i32 to vector<32x64xi32>
    %47 = arith.addi %45, %46 : vector<32x64xi32>
    %48 = arith.cmpi eq, %3, %47 : vector<32x64xi32>
    %cst_25 = arith.constant 1.000000e+00 : f32
    %cst_26 = arith.constant 0.000000e+00 : f32
    %49 = vector.broadcast %cst_25 : f32 to vector<32x64xf32>
    %50 = vector.broadcast %cst_26 : f32 to vector<32x64xf32>
    %51 = arith.select %48, %49, %50 : vector<32x64xi1>, vector<32x64xf32>
    %cst_27 = arith.constant dense<0.000000e+00> : vector<32x192xf32>
    %52 = tpu.matmul %51, %1, %cst_27 {dimension_numbers = #tpu.dot_dimension_numbers<[1], [0], [0], [1], [0, 0, 1, 1], [], []>} : vector<32x64xf32>, vector<64x192xf32>, vector<32x192xf32> -> vector<32x192xf32>
    %c3 = arith.constant 3 : index
    %c0_28 = arith.constant 0 : index
    %c0_29 = arith.constant 0 : index
    %53 = vector.load %arg3[%c3, %c0_28, %c0_29] : memref<4x192x128xf32, #tpu.memory_space<vmem>>, vector<1x192x128xf32>
    %54 = vector.shape_cast %53 : vector<1x192x128xf32> to vector<192x128xf32>
    %cst_30 = arith.constant dense<0.000000e+00> : vector<32x128xf32>
    %55 = tpu.matmul %52, %54, %cst_30 {dimension_numbers = #tpu.dot_dimension_numbers<[1], [0], [0], [1], [0, 0, 1, 1], [], []>} : vector<32x192xf32>, vector<192x128xf32>, vector<32x128xf32> -> vector<32x128xf32>
    %56 = arith.addf %43, %55 : vector<32x128xf32>
    %c0_31 = arith.constant 0 : index
    %c0_32 = arith.constant 0 : index
    %57 = vector.load %arg4[%c0_31, %c0_32] : memref<1x128xf32, #tpu.memory_space<vmem>>, vector<1x128xf32>
    %58 = vector.broadcast %57 : vector<1x128xf32> to vector<32x128xf32>
    %59 = arith.addf %56, %58 : vector<32x128xf32>
    %cst_33 = arith.constant 0.000000e+00 : f32
    %60 = vector.broadcast %cst_33 : f32 to vector<32x128xf32>
    %61 = arith.maximumf %59, %60 : vector<32x128xf32>
    %62 = tpu.iota {dimensions = array<i32: 0>} : vector<16x32xi32>
    %63 = tpu.iota {dimensions = array<i32: 1>} : vector<16x32xi32>
    %cst_34 = arith.constant 0.000000e+00 : f32
    %64 = vector.broadcast %cst_34 : f32 to vector<16x128xf32>
    %c2_i32_35 = arith.constant 2 : i32
    %65 = vector.broadcast %c2_i32_35 : i32 to vector<16x32xi32>
    %66 = arith.muli %65, %62 : vector<16x32xi32>
    %c-1_i32_36 = arith.constant -1 : i32
    %67 = vector.broadcast %c-1_i32_36 : i32 to vector<16x32xi32>
    %68 = arith.addi %66, %67 : vector<16x32xi32>
    %69 = arith.cmpi eq, %63, %68 : vector<16x32xi32>
    %cst_37 = arith.constant 1.000000e+00 : f32
    %cst_38 = arith.constant 0.000000e+00 : f32
    %70 = vector.broadcast %cst_37 : f32 to vector<16x32xf32>
    %71 = vector.broadcast %cst_38 : f32 to vector<16x32xf32>
    %72 = arith.select %69, %70, %71 : vector<16x32xi1>, vector<16x32xf32>
    %cst_39 = arith.constant dense<0.000000e+00> : vector<16x128xf32>
    %73 = tpu.matmul %72, %61, %cst_39 {dimension_numbers = #tpu.dot_dimension_numbers<[1], [0], [0], [1], [0, 0, 1, 1], [], []>} : vector<16x32xf32>, vector<32x128xf32>, vector<16x128xf32> -> vector<16x128xf32>
    %c0_40 = arith.constant 0 : index
    %c0_41 = arith.constant 0 : index
    %c0_42 = arith.constant 0 : index
    %74 = vector.load %arg5[%c0_40, %c0_41, %c0_42] : memref<4x128x128xf32, #tpu.memory_space<vmem>>, vector<1x128x128xf32>
    %75 = vector.shape_cast %74 : vector<1x128x128xf32> to vector<128x128xf32>
    %cst_43 = arith.constant dense<0.000000e+00> : vector<16x128xf32>
    %76 = tpu.matmul %73, %75, %cst_43 {dimension_numbers = #tpu.dot_dimension_numbers<[1], [0], [0], [1], [0, 0, 1, 1], [], []>} : vector<16x128xf32>, vector<128x128xf32>, vector<16x128xf32> -> vector<16x128xf32>
    %77 = arith.addf %64, %76 : vector<16x128xf32>
    %c2_i32_44 = arith.constant 2 : i32
    %78 = vector.broadcast %c2_i32_44 : i32 to vector<16x32xi32>
    %79 = arith.muli %78, %62 : vector<16x32xi32>
    %c0_i32_45 = arith.constant 0 : i32
    %80 = vector.broadcast %c0_i32_45 : i32 to vector<16x32xi32>
    %81 = arith.addi %79, %80 : vector<16x32xi32>
    %82 = arith.cmpi eq, %63, %81 : vector<16x32xi32>
    %cst_46 = arith.constant 1.000000e+00 : f32
    %cst_47 = arith.constant 0.000000e+00 : f32
    %83 = vector.broadcast %cst_46 : f32 to vector<16x32xf32>
    %84 = vector.broadcast %cst_47 : f32 to vector<16x32xf32>
    %85 = arith.select %82, %83, %84 : vector<16x32xi1>, vector<16x32xf32>
    %cst_48 = arith.constant dense<0.000000e+00> : vector<16x128xf32>
    %86 = tpu.matmul %85, %61, %cst_48 {dimension_numbers = #tpu.dot_dimension_numbers<[1], [0], [0], [1], [0, 0, 1, 1], [], []>} : vector<16x32xf32>, vector<32x128xf32>, vector<16x128xf32> -> vector<16x128xf32>
    %c1_49 = arith.constant 1 : index
    %c0_50 = arith.constant 0 : index
    %c0_51 = arith.constant 0 : index
    %87 = vector.load %arg5[%c1_49, %c0_50, %c0_51] : memref<4x128x128xf32, #tpu.memory_space<vmem>>, vector<1x128x128xf32>
    %88 = vector.shape_cast %87 : vector<1x128x128xf32> to vector<128x128xf32>
    %cst_52 = arith.constant dense<0.000000e+00> : vector<16x128xf32>
    %89 = tpu.matmul %86, %88, %cst_52 {dimension_numbers = #tpu.dot_dimension_numbers<[1], [0], [0], [1], [0, 0, 1, 1], [], []>} : vector<16x128xf32>, vector<128x128xf32>, vector<16x128xf32> -> vector<16x128xf32>
    %90 = arith.addf %77, %89 : vector<16x128xf32>
    %c2_i32_53 = arith.constant 2 : i32
    %91 = vector.broadcast %c2_i32_53 : i32 to vector<16x32xi32>
    %92 = arith.muli %91, %62 : vector<16x32xi32>
    %c1_i32_54 = arith.constant 1 : i32
    %93 = vector.broadcast %c1_i32_54 : i32 to vector<16x32xi32>
    %94 = arith.addi %92, %93 : vector<16x32xi32>
    %95 = arith.cmpi eq, %63, %94 : vector<16x32xi32>
    %cst_55 = arith.constant 1.000000e+00 : f32
    %cst_56 = arith.constant 0.000000e+00 : f32
    %96 = vector.broadcast %cst_55 : f32 to vector<16x32xf32>
    %97 = vector.broadcast %cst_56 : f32 to vector<16x32xf32>
    %98 = arith.select %95, %96, %97 : vector<16x32xi1>, vector<16x32xf32>
    %cst_57 = arith.constant dense<0.000000e+00> : vector<16x128xf32>
    %99 = tpu.matmul %98, %61, %cst_57 {dimension_numbers = #tpu.dot_dimension_numbers<[1], [0], [0], [1], [0, 0, 1, 1], [], []>} : vector<16x32xf32>, vector<32x128xf32>, vector<16x128xf32> -> vector<16x128xf32>
    %c2_58 = arith.constant 2 : index
    %c0_59 = arith.constant 0 : index
    %c0_60 = arith.constant 0 : index
    %100 = vector.load %arg5[%c2_58, %c0_59, %c0_60] : memref<4x128x128xf32, #tpu.memory_space<vmem>>, vector<1x128x128xf32>
    %101 = vector.shape_cast %100 : vector<1x128x128xf32> to vector<128x128xf32>
    %cst_61 = arith.constant dense<0.000000e+00> : vector<16x128xf32>
    %102 = tpu.matmul %99, %101, %cst_61 {dimension_numbers = #tpu.dot_dimension_numbers<[1], [0], [0], [1], [0, 0, 1, 1], [], []>} : vector<16x128xf32>, vector<128x128xf32>, vector<16x128xf32> -> vector<16x128xf32>
    %103 = arith.addf %90, %102 : vector<16x128xf32>
    %c2_i32_62 = arith.constant 2 : i32
    %104 = vector.broadcast %c2_i32_62 : i32 to vector<16x32xi32>
    %105 = arith.muli %104, %62 : vector<16x32xi32>
    %c2_i32_63 = arith.constant 2 : i32
    %106 = vector.broadcast %c2_i32_63 : i32 to vector<16x32xi32>
    %107 = arith.addi %105, %106 : vector<16x32xi32>
    %108 = arith.cmpi eq, %63, %107 : vector<16x32xi32>
    %cst_64 = arith.constant 1.000000e+00 : f32
    %cst_65 = arith.constant 0.000000e+00 : f32
    %109 = vector.broadcast %cst_64 : f32 to vector<16x32xf32>
    %110 = vector.broadcast %cst_65 : f32 to vector<16x32xf32>
    %111 = arith.select %108, %109, %110 : vector<16x32xi1>, vector<16x32xf32>
    %cst_66 = arith.constant dense<0.000000e+00> : vector<16x128xf32>
    %112 = tpu.matmul %111, %61, %cst_66 {dimension_numbers = #tpu.dot_dimension_numbers<[1], [0], [0], [1], [0, 0, 1, 1], [], []>} : vector<16x32xf32>, vector<32x128xf32>, vector<16x128xf32> -> vector<16x128xf32>
    %c3_67 = arith.constant 3 : index
    %c0_68 = arith.constant 0 : index
    %c0_69 = arith.constant 0 : index
    %113 = vector.load %arg5[%c3_67, %c0_68, %c0_69] : memref<4x128x128xf32, #tpu.memory_space<vmem>>, vector<1x128x128xf32>
    %114 = vector.shape_cast %113 : vector<1x128x128xf32> to vector<128x128xf32>
    %cst_70 = arith.constant dense<0.000000e+00> : vector<16x128xf32>
    %115 = tpu.matmul %112, %114, %cst_70 {dimension_numbers = #tpu.dot_dimension_numbers<[1], [0], [0], [1], [0, 0, 1, 1], [], []>} : vector<16x128xf32>, vector<128x128xf32>, vector<16x128xf32> -> vector<16x128xf32>
    %116 = arith.addf %103, %115 : vector<16x128xf32>
    %c0_71 = arith.constant 0 : index
    %c0_72 = arith.constant 0 : index
    %117 = vector.load %arg6[%c0_71, %c0_72] : memref<1x128xf32, #tpu.memory_space<vmem>>, vector<1x128xf32>
    %118 = vector.broadcast %117 : vector<1x128xf32> to vector<16x128xf32>
    %119 = arith.addf %116, %118 : vector<16x128xf32>
    %cst_73 = arith.constant 0.000000e+00 : f32
    %120 = vector.broadcast %cst_73 : f32 to vector<16x128xf32>
    %121 = arith.maximumf %119, %120 : vector<16x128xf32>
    %122 = tpu.iota {dimensions = array<i32: 0>} : vector<8x16xi32>
    %123 = tpu.iota {dimensions = array<i32: 1>} : vector<8x16xi32>
    %cst_74 = arith.constant 0.000000e+00 : f32
    %124 = vector.broadcast %cst_74 : f32 to vector<8x128xf32>
    %c2_i32_75 = arith.constant 2 : i32
    %125 = vector.broadcast %c2_i32_75 : i32 to vector<8x16xi32>
    %126 = arith.muli %125, %122 : vector<8x16xi32>
    %c-1_i32_76 = arith.constant -1 : i32
    %127 = vector.broadcast %c-1_i32_76 : i32 to vector<8x16xi32>
    %128 = arith.addi %126, %127 : vector<8x16xi32>
    %129 = arith.cmpi eq, %123, %128 : vector<8x16xi32>
    %cst_77 = arith.constant 1.000000e+00 : f32
    %cst_78 = arith.constant 0.000000e+00 : f32
    %130 = vector.broadcast %cst_77 : f32 to vector<8x16xf32>
    %131 = vector.broadcast %cst_78 : f32 to vector<8x16xf32>
    %132 = arith.select %129, %130, %131 : vector<8x16xi1>, vector<8x16xf32>
    %cst_79 = arith.constant dense<0.000000e+00> : vector<8x128xf32>
    %133 = tpu.matmul %132, %121, %cst_79 {dimension_numbers = #tpu.dot_dimension_numbers<[1], [0], [0], [1], [0, 0, 1, 1], [], []>} : vector<8x16xf32>, vector<16x128xf32>, vector<8x128xf32> -> vector<8x128xf32>
    %c0_80 = arith.constant 0 : index
    %c0_81 = arith.constant 0 : index
    %c0_82 = arith.constant 0 : index
    %134 = vector.load %arg7[%c0_80, %c0_81, %c0_82] : memref<4x128x128xf32, #tpu.memory_space<vmem>>, vector<1x128x128xf32>
    %135 = vector.shape_cast %134 : vector<1x128x128xf32> to vector<128x128xf32>
    %cst_83 = arith.constant dense<0.000000e+00> : vector<8x128xf32>
    %136 = tpu.matmul %133, %135, %cst_83 {dimension_numbers = #tpu.dot_dimension_numbers<[1], [0], [0], [1], [0, 0, 1, 1], [], []>} : vector<8x128xf32>, vector<128x128xf32>, vector<8x128xf32> -> vector<8x128xf32>
    %137 = arith.addf %124, %136 : vector<8x128xf32>
    %c2_i32_84 = arith.constant 2 : i32
    %138 = vector.broadcast %c2_i32_84 : i32 to vector<8x16xi32>
    %139 = arith.muli %138, %122 : vector<8x16xi32>
    %c0_i32_85 = arith.constant 0 : i32
    %140 = vector.broadcast %c0_i32_85 : i32 to vector<8x16xi32>
    %141 = arith.addi %139, %140 : vector<8x16xi32>
    %142 = arith.cmpi eq, %123, %141 : vector<8x16xi32>
    %cst_86 = arith.constant 1.000000e+00 : f32
    %cst_87 = arith.constant 0.000000e+00 : f32
    %143 = vector.broadcast %cst_86 : f32 to vector<8x16xf32>
    %144 = vector.broadcast %cst_87 : f32 to vector<8x16xf32>
    %145 = arith.select %142, %143, %144 : vector<8x16xi1>, vector<8x16xf32>
    %cst_88 = arith.constant dense<0.000000e+00> : vector<8x128xf32>
    %146 = tpu.matmul %145, %121, %cst_88 {dimension_numbers = #tpu.dot_dimension_numbers<[1], [0], [0], [1], [0, 0, 1, 1], [], []>} : vector<8x16xf32>, vector<16x128xf32>, vector<8x128xf32> -> vector<8x128xf32>
    %c1_89 = arith.constant 1 : index
    %c0_90 = arith.constant 0 : index
    %c0_91 = arith.constant 0 : index
    %147 = vector.load %arg7[%c1_89, %c0_90, %c0_91] : memref<4x128x128xf32, #tpu.memory_space<vmem>>, vector<1x128x128xf32>
    %148 = vector.shape_cast %147 : vector<1x128x128xf32> to vector<128x128xf32>
    %cst_92 = arith.constant dense<0.000000e+00> : vector<8x128xf32>
    %149 = tpu.matmul %146, %148, %cst_92 {dimension_numbers = #tpu.dot_dimension_numbers<[1], [0], [0], [1], [0, 0, 1, 1], [], []>} : vector<8x128xf32>, vector<128x128xf32>, vector<8x128xf32> -> vector<8x128xf32>
    %150 = arith.addf %137, %149 : vector<8x128xf32>
    %c2_i32_93 = arith.constant 2 : i32
    %151 = vector.broadcast %c2_i32_93 : i32 to vector<8x16xi32>
    %152 = arith.muli %151, %122 : vector<8x16xi32>
    %c1_i32_94 = arith.constant 1 : i32
    %153 = vector.broadcast %c1_i32_94 : i32 to vector<8x16xi32>
    %154 = arith.addi %152, %153 : vector<8x16xi32>
    %155 = arith.cmpi eq, %123, %154 : vector<8x16xi32>
    %cst_95 = arith.constant 1.000000e+00 : f32
    %cst_96 = arith.constant 0.000000e+00 : f32
    %156 = vector.broadcast %cst_95 : f32 to vector<8x16xf32>
    %157 = vector.broadcast %cst_96 : f32 to vector<8x16xf32>
    %158 = arith.select %155, %156, %157 : vector<8x16xi1>, vector<8x16xf32>
    %cst_97 = arith.constant dense<0.000000e+00> : vector<8x128xf32>
    %159 = tpu.matmul %158, %121, %cst_97 {dimension_numbers = #tpu.dot_dimension_numbers<[1], [0], [0], [1], [0, 0, 1, 1], [], []>} : vector<8x16xf32>, vector<16x128xf32>, vector<8x128xf32> -> vector<8x128xf32>
    %c2_98 = arith.constant 2 : index
    %c0_99 = arith.constant 0 : index
    %c0_100 = arith.constant 0 : index
    %160 = vector.load %arg7[%c2_98, %c0_99, %c0_100] : memref<4x128x128xf32, #tpu.memory_space<vmem>>, vector<1x128x128xf32>
    %161 = vector.shape_cast %160 : vector<1x128x128xf32> to vector<128x128xf32>
    %cst_101 = arith.constant dense<0.000000e+00> : vector<8x128xf32>
    %162 = tpu.matmul %159, %161, %cst_101 {dimension_numbers = #tpu.dot_dimension_numbers<[1], [0], [0], [1], [0, 0, 1, 1], [], []>} : vector<8x128xf32>, vector<128x128xf32>, vector<8x128xf32> -> vector<8x128xf32>
    %163 = arith.addf %150, %162 : vector<8x128xf32>
    %c2_i32_102 = arith.constant 2 : i32
    %164 = vector.broadcast %c2_i32_102 : i32 to vector<8x16xi32>
    %165 = arith.muli %164, %122 : vector<8x16xi32>
    %c2_i32_103 = arith.constant 2 : i32
    %166 = vector.broadcast %c2_i32_103 : i32 to vector<8x16xi32>
    %167 = arith.addi %165, %166 : vector<8x16xi32>
    %168 = arith.cmpi eq, %123, %167 : vector<8x16xi32>
    %cst_104 = arith.constant 1.000000e+00 : f32
    %cst_105 = arith.constant 0.000000e+00 : f32
    %169 = vector.broadcast %cst_104 : f32 to vector<8x16xf32>
    %170 = vector.broadcast %cst_105 : f32 to vector<8x16xf32>
    %171 = arith.select %168, %169, %170 : vector<8x16xi1>, vector<8x16xf32>
    %cst_106 = arith.constant dense<0.000000e+00> : vector<8x128xf32>
    %172 = tpu.matmul %171, %121, %cst_106 {dimension_numbers = #tpu.dot_dimension_numbers<[1], [0], [0], [1], [0, 0, 1, 1], [], []>} : vector<8x16xf32>, vector<16x128xf32>, vector<8x128xf32> -> vector<8x128xf32>
    %c3_107 = arith.constant 3 : index
    %c0_108 = arith.constant 0 : index
    %c0_109 = arith.constant 0 : index
    %173 = vector.load %arg7[%c3_107, %c0_108, %c0_109] : memref<4x128x128xf32, #tpu.memory_space<vmem>>, vector<1x128x128xf32>
    %174 = vector.shape_cast %173 : vector<1x128x128xf32> to vector<128x128xf32>
    %cst_110 = arith.constant dense<0.000000e+00> : vector<8x128xf32>
    %175 = tpu.matmul %172, %174, %cst_110 {dimension_numbers = #tpu.dot_dimension_numbers<[1], [0], [0], [1], [0, 0, 1, 1], [], []>} : vector<8x128xf32>, vector<128x128xf32>, vector<8x128xf32> -> vector<8x128xf32>
    %176 = arith.addf %163, %175 : vector<8x128xf32>
    %c0_111 = arith.constant 0 : index
    %c0_112 = arith.constant 0 : index
    %177 = vector.load %arg8[%c0_111, %c0_112] : memref<1x128xf32, #tpu.memory_space<vmem>>, vector<1x128xf32>
    %178 = vector.broadcast %177 : vector<1x128xf32> to vector<8x128xf32>
    %179 = arith.addf %176, %178 : vector<8x128xf32>
    %cst_113 = arith.constant 0.000000e+00 : f32
    %180 = vector.broadcast %cst_113 : f32 to vector<8x128xf32>
    %181 = arith.maximumf %179, %180 : vector<8x128xf32>
    %182 = tpu.iota {dimensions = array<i32: 0>} : vector<4x8xi32>
    %183 = tpu.iota {dimensions = array<i32: 1>} : vector<4x8xi32>
    %cst_114 = arith.constant 0.000000e+00 : f32
    %184 = vector.broadcast %cst_114 : f32 to vector<4x128xf32>
    %c2_i32_115 = arith.constant 2 : i32
    %185 = vector.broadcast %c2_i32_115 : i32 to vector<4x8xi32>
    %186 = arith.muli %185, %182 : vector<4x8xi32>
    %c-1_i32_116 = arith.constant -1 : i32
    %187 = vector.broadcast %c-1_i32_116 : i32 to vector<4x8xi32>
    %188 = arith.addi %186, %187 : vector<4x8xi32>
    %189 = arith.cmpi eq, %183, %188 : vector<4x8xi32>
    %cst_117 = arith.constant 1.000000e+00 : f32
    %cst_118 = arith.constant 0.000000e+00 : f32
    %190 = vector.broadcast %cst_117 : f32 to vector<4x8xf32>
    %191 = vector.broadcast %cst_118 : f32 to vector<4x8xf32>
    %192 = arith.select %189, %190, %191 : vector<4x8xi1>, vector<4x8xf32>
    %cst_119 = arith.constant dense<0.000000e+00> : vector<4x128xf32>
    %193 = tpu.matmul %192, %181, %cst_119 {dimension_numbers = #tpu.dot_dimension_numbers<[1], [0], [0], [1], [0, 0, 1, 1], [], []>} : vector<4x8xf32>, vector<8x128xf32>, vector<4x128xf32> -> vector<4x128xf32>
    %c0_120 = arith.constant 0 : index
    %c0_121 = arith.constant 0 : index
    %c0_122 = arith.constant 0 : index
    %194 = vector.load %arg9[%c0_120, %c0_121, %c0_122] : memref<4x128x128xf32, #tpu.memory_space<vmem>>, vector<1x128x128xf32>
    %195 = vector.shape_cast %194 : vector<1x128x128xf32> to vector<128x128xf32>
    %cst_123 = arith.constant dense<0.000000e+00> : vector<4x128xf32>
    %196 = tpu.matmul %193, %195, %cst_123 {dimension_numbers = #tpu.dot_dimension_numbers<[1], [0], [0], [1], [0, 0, 1, 1], [], []>} : vector<4x128xf32>, vector<128x128xf32>, vector<4x128xf32> -> vector<4x128xf32>
    %197 = arith.addf %184, %196 : vector<4x128xf32>
    %c2_i32_124 = arith.constant 2 : i32
    %198 = vector.broadcast %c2_i32_124 : i32 to vector<4x8xi32>
    %199 = arith.muli %198, %182 : vector<4x8xi32>
    %c0_i32_125 = arith.constant 0 : i32
    %200 = vector.broadcast %c0_i32_125 : i32 to vector<4x8xi32>
    %201 = arith.addi %199, %200 : vector<4x8xi32>
    %202 = arith.cmpi eq, %183, %201 : vector<4x8xi32>
    %cst_126 = arith.constant 1.000000e+00 : f32
    %cst_127 = arith.constant 0.000000e+00 : f32
    %203 = vector.broadcast %cst_126 : f32 to vector<4x8xf32>
    %204 = vector.broadcast %cst_127 : f32 to vector<4x8xf32>
    %205 = arith.select %202, %203, %204 : vector<4x8xi1>, vector<4x8xf32>
    %cst_128 = arith.constant dense<0.000000e+00> : vector<4x128xf32>
    %206 = tpu.matmul %205, %181, %cst_128 {dimension_numbers = #tpu.dot_dimension_numbers<[1], [0], [0], [1], [0, 0, 1, 1], [], []>} : vector<4x8xf32>, vector<8x128xf32>, vector<4x128xf32> -> vector<4x128xf32>
    %c1_129 = arith.constant 1 : index
    %c0_130 = arith.constant 0 : index
    %c0_131 = arith.constant 0 : index
    %207 = vector.load %arg9[%c1_129, %c0_130, %c0_131] : memref<4x128x128xf32, #tpu.memory_space<vmem>>, vector<1x128x128xf32>
    %208 = vector.shape_cast %207 : vector<1x128x128xf32> to vector<128x128xf32>
    %cst_132 = arith.constant dense<0.000000e+00> : vector<4x128xf32>
    %209 = tpu.matmul %206, %208, %cst_132 {dimension_numbers = #tpu.dot_dimension_numbers<[1], [0], [0], [1], [0, 0, 1, 1], [], []>} : vector<4x128xf32>, vector<128x128xf32>, vector<4x128xf32> -> vector<4x128xf32>
    %210 = arith.addf %197, %209 : vector<4x128xf32>
    %c2_i32_133 = arith.constant 2 : i32
    %211 = vector.broadcast %c2_i32_133 : i32 to vector<4x8xi32>
    %212 = arith.muli %211, %182 : vector<4x8xi32>
    %c1_i32_134 = arith.constant 1 : i32
    %213 = vector.broadcast %c1_i32_134 : i32 to vector<4x8xi32>
    %214 = arith.addi %212, %213 : vector<4x8xi32>
    %215 = arith.cmpi eq, %183, %214 : vector<4x8xi32>
    %cst_135 = arith.constant 1.000000e+00 : f32
    %cst_136 = arith.constant 0.000000e+00 : f32
    %216 = vector.broadcast %cst_135 : f32 to vector<4x8xf32>
    %217 = vector.broadcast %cst_136 : f32 to vector<4x8xf32>
    %218 = arith.select %215, %216, %217 : vector<4x8xi1>, vector<4x8xf32>
    %cst_137 = arith.constant dense<0.000000e+00> : vector<4x128xf32>
    %219 = tpu.matmul %218, %181, %cst_137 {dimension_numbers = #tpu.dot_dimension_numbers<[1], [0], [0], [1], [0, 0, 1, 1], [], []>} : vector<4x8xf32>, vector<8x128xf32>, vector<4x128xf32> -> vector<4x128xf32>
    %c2_138 = arith.constant 2 : index
    %c0_139 = arith.constant 0 : index
    %c0_140 = arith.constant 0 : index
    %220 = vector.load %arg9[%c2_138, %c0_139, %c0_140] : memref<4x128x128xf32, #tpu.memory_space<vmem>>, vector<1x128x128xf32>
    %221 = vector.shape_cast %220 : vector<1x128x128xf32> to vector<128x128xf32>
    %cst_141 = arith.constant dense<0.000000e+00> : vector<4x128xf32>
    %222 = tpu.matmul %219, %221, %cst_141 {dimension_numbers = #tpu.dot_dimension_numbers<[1], [0], [0], [1], [0, 0, 1, 1], [], []>} : vector<4x128xf32>, vector<128x128xf32>, vector<4x128xf32> -> vector<4x128xf32>
    %223 = arith.addf %210, %222 : vector<4x128xf32>
    %c2_i32_142 = arith.constant 2 : i32
    %224 = vector.broadcast %c2_i32_142 : i32 to vector<4x8xi32>
    %225 = arith.muli %224, %182 : vector<4x8xi32>
    %c2_i32_143 = arith.constant 2 : i32
    %226 = vector.broadcast %c2_i32_143 : i32 to vector<4x8xi32>
    %227 = arith.addi %225, %226 : vector<4x8xi32>
    %228 = arith.cmpi eq, %183, %227 : vector<4x8xi32>
    %cst_144 = arith.constant 1.000000e+00 : f32
    %cst_145 = arith.constant 0.000000e+00 : f32
    %229 = vector.broadcast %cst_144 : f32 to vector<4x8xf32>
    %230 = vector.broadcast %cst_145 : f32 to vector<4x8xf32>
    %231 = arith.select %228, %229, %230 : vector<4x8xi1>, vector<4x8xf32>
    %cst_146 = arith.constant dense<0.000000e+00> : vector<4x128xf32>
    %232 = tpu.matmul %231, %181, %cst_146 {dimension_numbers = #tpu.dot_dimension_numbers<[1], [0], [0], [1], [0, 0, 1, 1], [], []>} : vector<4x8xf32>, vector<8x128xf32>, vector<4x128xf32> -> vector<4x128xf32>
    %c3_147 = arith.constant 3 : index
    %c0_148 = arith.constant 0 : index
    %c0_149 = arith.constant 0 : index
    %233 = vector.load %arg9[%c3_147, %c0_148, %c0_149] : memref<4x128x128xf32, #tpu.memory_space<vmem>>, vector<1x128x128xf32>
    %234 = vector.shape_cast %233 : vector<1x128x128xf32> to vector<128x128xf32>
    %cst_150 = arith.constant dense<0.000000e+00> : vector<4x128xf32>
    %235 = tpu.matmul %232, %234, %cst_150 {dimension_numbers = #tpu.dot_dimension_numbers<[1], [0], [0], [1], [0, 0, 1, 1], [], []>} : vector<4x128xf32>, vector<128x128xf32>, vector<4x128xf32> -> vector<4x128xf32>
    %236 = arith.addf %223, %235 : vector<4x128xf32>
    %c0_151 = arith.constant 0 : index
    %c0_152 = arith.constant 0 : index
    %237 = vector.load %arg10[%c0_151, %c0_152] : memref<1x128xf32, #tpu.memory_space<vmem>>, vector<1x128xf32>
    %238 = vector.broadcast %237 : vector<1x128xf32> to vector<4x128xf32>
    %239 = arith.addf %236, %238 : vector<4x128xf32>
    %cst_153 = arith.constant 0.000000e+00 : f32
    %240 = vector.broadcast %cst_153 : f32 to vector<4x128xf32>
    %241 = arith.maximumf %239, %240 : vector<4x128xf32>
    %242 = tpu.iota {dimensions = array<i32: 0>} : vector<2x4xi32>
    %243 = tpu.iota {dimensions = array<i32: 1>} : vector<2x4xi32>
    %cst_154 = arith.constant 0.000000e+00 : f32
    %244 = vector.broadcast %cst_154 : f32 to vector<2x128xf32>
    %c2_i32_155 = arith.constant 2 : i32
    %245 = vector.broadcast %c2_i32_155 : i32 to vector<2x4xi32>
    %246 = arith.muli %245, %242 : vector<2x4xi32>
    %c-1_i32_156 = arith.constant -1 : i32
    %247 = vector.broadcast %c-1_i32_156 : i32 to vector<2x4xi32>
    %248 = arith.addi %246, %247 : vector<2x4xi32>
    %249 = arith.cmpi eq, %243, %248 : vector<2x4xi32>
    %cst_157 = arith.constant 1.000000e+00 : f32
    %cst_158 = arith.constant 0.000000e+00 : f32
    %250 = vector.broadcast %cst_157 : f32 to vector<2x4xf32>
    %251 = vector.broadcast %cst_158 : f32 to vector<2x4xf32>
    %252 = arith.select %249, %250, %251 : vector<2x4xi1>, vector<2x4xf32>
    %cst_159 = arith.constant dense<0.000000e+00> : vector<2x128xf32>
    %253 = tpu.matmul %252, %241, %cst_159 {dimension_numbers = #tpu.dot_dimension_numbers<[1], [0], [0], [1], [0, 0, 1, 1], [], []>} : vector<2x4xf32>, vector<4x128xf32>, vector<2x128xf32> -> vector<2x128xf32>
    %c0_160 = arith.constant 0 : index
    %c0_161 = arith.constant 0 : index
    %c0_162 = arith.constant 0 : index
    %254 = vector.load %arg11[%c0_160, %c0_161, %c0_162] : memref<4x128x128xf32, #tpu.memory_space<vmem>>, vector<1x128x128xf32>
    %255 = vector.shape_cast %254 : vector<1x128x128xf32> to vector<128x128xf32>
    %cst_163 = arith.constant dense<0.000000e+00> : vector<2x128xf32>
    %256 = tpu.matmul %253, %255, %cst_163 {dimension_numbers = #tpu.dot_dimension_numbers<[1], [0], [0], [1], [0, 0, 1, 1], [], []>} : vector<2x128xf32>, vector<128x128xf32>, vector<2x128xf32> -> vector<2x128xf32>
    %257 = arith.addf %244, %256 : vector<2x128xf32>
    %c2_i32_164 = arith.constant 2 : i32
    %258 = vector.broadcast %c2_i32_164 : i32 to vector<2x4xi32>
    %259 = arith.muli %258, %242 : vector<2x4xi32>
    %c0_i32_165 = arith.constant 0 : i32
    %260 = vector.broadcast %c0_i32_165 : i32 to vector<2x4xi32>
    %261 = arith.addi %259, %260 : vector<2x4xi32>
    %262 = arith.cmpi eq, %243, %261 : vector<2x4xi32>
    %cst_166 = arith.constant 1.000000e+00 : f32
    %cst_167 = arith.constant 0.000000e+00 : f32
    %263 = vector.broadcast %cst_166 : f32 to vector<2x4xf32>
    %264 = vector.broadcast %cst_167 : f32 to vector<2x4xf32>
    %265 = arith.select %262, %263, %264 : vector<2x4xi1>, vector<2x4xf32>
    %cst_168 = arith.constant dense<0.000000e+00> : vector<2x128xf32>
    %266 = tpu.matmul %265, %241, %cst_168 {dimension_numbers = #tpu.dot_dimension_numbers<[1], [0], [0], [1], [0, 0, 1, 1], [], []>} : vector<2x4xf32>, vector<4x128xf32>, vector<2x128xf32> -> vector<2x128xf32>
    %c1_169 = arith.constant 1 : index
    %c0_170 = arith.constant 0 : index
    %c0_171 = arith.constant 0 : index
    %267 = vector.load %arg11[%c1_169, %c0_170, %c0_171] : memref<4x128x128xf32, #tpu.memory_space<vmem>>, vector<1x128x128xf32>
    %268 = vector.shape_cast %267 : vector<1x128x128xf32> to vector<128x128xf32>
    %cst_172 = arith.constant dense<0.000000e+00> : vector<2x128xf32>
    %269 = tpu.matmul %266, %268, %cst_172 {dimension_numbers = #tpu.dot_dimension_numbers<[1], [0], [0], [1], [0, 0, 1, 1], [], []>} : vector<2x128xf32>, vector<128x128xf32>, vector<2x128xf32> -> vector<2x128xf32>
    %270 = arith.addf %257, %269 : vector<2x128xf32>
    %c2_i32_173 = arith.constant 2 : i32
    %271 = vector.broadcast %c2_i32_173 : i32 to vector<2x4xi32>
    %272 = arith.muli %271, %242 : vector<2x4xi32>
    %c1_i32_174 = arith.constant 1 : i32
    %273 = vector.broadcast %c1_i32_174 : i32 to vector<2x4xi32>
    %274 = arith.addi %272, %273 : vector<2x4xi32>
    %275 = arith.cmpi eq, %243, %274 : vector<2x4xi32>
    %cst_175 = arith.constant 1.000000e+00 : f32
    %cst_176 = arith.constant 0.000000e+00 : f32
    %276 = vector.broadcast %cst_175 : f32 to vector<2x4xf32>
    %277 = vector.broadcast %cst_176 : f32 to vector<2x4xf32>
    %278 = arith.select %275, %276, %277 : vector<2x4xi1>, vector<2x4xf32>
    %cst_177 = arith.constant dense<0.000000e+00> : vector<2x128xf32>
    %279 = tpu.matmul %278, %241, %cst_177 {dimension_numbers = #tpu.dot_dimension_numbers<[1], [0], [0], [1], [0, 0, 1, 1], [], []>} : vector<2x4xf32>, vector<4x128xf32>, vector<2x128xf32> -> vector<2x128xf32>
    %c2_178 = arith.constant 2 : index
    %c0_179 = arith.constant 0 : index
    %c0_180 = arith.constant 0 : index
    %280 = vector.load %arg11[%c2_178, %c0_179, %c0_180] : memref<4x128x128xf32, #tpu.memory_space<vmem>>, vector<1x128x128xf32>
    %281 = vector.shape_cast %280 : vector<1x128x128xf32> to vector<128x128xf32>
    %cst_181 = arith.constant dense<0.000000e+00> : vector<2x128xf32>
    %282 = tpu.matmul %279, %281, %cst_181 {dimension_numbers = #tpu.dot_dimension_numbers<[1], [0], [0], [1], [0, 0, 1, 1], [], []>} : vector<2x128xf32>, vector<128x128xf32>, vector<2x128xf32> -> vector<2x128xf32>
    %283 = arith.addf %270, %282 : vector<2x128xf32>
    %c2_i32_182 = arith.constant 2 : i32
    %284 = vector.broadcast %c2_i32_182 : i32 to vector<2x4xi32>
    %285 = arith.muli %284, %242 : vector<2x4xi32>
    %c2_i32_183 = arith.constant 2 : i32
    %286 = vector.broadcast %c2_i32_183 : i32 to vector<2x4xi32>
    %287 = arith.addi %285, %286 : vector<2x4xi32>
    %288 = arith.cmpi eq, %243, %287 : vector<2x4xi32>
    %cst_184 = arith.constant 1.000000e+00 : f32
    %cst_185 = arith.constant 0.000000e+00 : f32
    %289 = vector.broadcast %cst_184 : f32 to vector<2x4xf32>
    %290 = vector.broadcast %cst_185 : f32 to vector<2x4xf32>
    %291 = arith.select %288, %289, %290 : vector<2x4xi1>, vector<2x4xf32>
    %cst_186 = arith.constant dense<0.000000e+00> : vector<2x128xf32>
    %292 = tpu.matmul %291, %241, %cst_186 {dimension_numbers = #tpu.dot_dimension_numbers<[1], [0], [0], [1], [0, 0, 1, 1], [], []>} : vector<2x4xf32>, vector<4x128xf32>, vector<2x128xf32> -> vector<2x128xf32>
    %c3_187 = arith.constant 3 : index
    %c0_188 = arith.constant 0 : index
    %c0_189 = arith.constant 0 : index
    %293 = vector.load %arg11[%c3_187, %c0_188, %c0_189] : memref<4x128x128xf32, #tpu.memory_space<vmem>>, vector<1x128x128xf32>
    %294 = vector.shape_cast %293 : vector<1x128x128xf32> to vector<128x128xf32>
    %cst_190 = arith.constant dense<0.000000e+00> : vector<2x128xf32>
    %295 = tpu.matmul %292, %294, %cst_190 {dimension_numbers = #tpu.dot_dimension_numbers<[1], [0], [0], [1], [0, 0, 1, 1], [], []>} : vector<2x128xf32>, vector<128x128xf32>, vector<2x128xf32> -> vector<2x128xf32>
    %296 = arith.addf %283, %295 : vector<2x128xf32>
    %c0_191 = arith.constant 0 : index
    %c0_192 = arith.constant 0 : index
    %297 = vector.load %arg12[%c0_191, %c0_192] : memref<1x128xf32, #tpu.memory_space<vmem>>, vector<1x128xf32>
    %298 = vector.broadcast %297 : vector<1x128xf32> to vector<2x128xf32>
    %299 = arith.addf %296, %298 : vector<2x128xf32>
    %cst_193 = arith.constant 0.000000e+00 : f32
    %300 = vector.broadcast %cst_193 : f32 to vector<2x128xf32>
    %301 = arith.maximumf %299, %300 : vector<2x128xf32>
    %302 = tpu.iota {dimensions = array<i32: 0>} : vector<1x2xi32>
    %303 = tpu.iota {dimensions = array<i32: 1>} : vector<1x2xi32>
    %cst_194 = arith.constant 0.000000e+00 : f32
    %304 = vector.broadcast %cst_194 : f32 to vector<1x128xf32>
    %c2_i32_195 = arith.constant 2 : i32
    %305 = vector.broadcast %c2_i32_195 : i32 to vector<1x2xi32>
    %306 = arith.muli %305, %302 : vector<1x2xi32>
    %c-1_i32_196 = arith.constant -1 : i32
    %307 = vector.broadcast %c-1_i32_196 : i32 to vector<1x2xi32>
    %308 = arith.addi %306, %307 : vector<1x2xi32>
    %309 = arith.cmpi eq, %303, %308 : vector<1x2xi32>
    %cst_197 = arith.constant 1.000000e+00 : f32
    %cst_198 = arith.constant 0.000000e+00 : f32
    %310 = vector.broadcast %cst_197 : f32 to vector<1x2xf32>
    %311 = vector.broadcast %cst_198 : f32 to vector<1x2xf32>
    %312 = arith.select %309, %310, %311 : vector<1x2xi1>, vector<1x2xf32>
    %cst_199 = arith.constant dense<0.000000e+00> : vector<1x128xf32>
    %313 = tpu.matmul %312, %301, %cst_199 {dimension_numbers = #tpu.dot_dimension_numbers<[1], [0], [0], [1], [0, 0, 1, 1], [], []>} : vector<1x2xf32>, vector<2x128xf32>, vector<1x128xf32> -> vector<1x128xf32>
    %c0_200 = arith.constant 0 : index
    %c0_201 = arith.constant 0 : index
    %c0_202 = arith.constant 0 : index
    %314 = vector.load %arg13[%c0_200, %c0_201, %c0_202] : memref<4x128x128xf32, #tpu.memory_space<vmem>>, vector<1x128x128xf32>
    %315 = vector.shape_cast %314 : vector<1x128x128xf32> to vector<128x128xf32>
    %cst_203 = arith.constant dense<0.000000e+00> : vector<1x128xf32>
    %316 = tpu.matmul %313, %315, %cst_203 {dimension_numbers = #tpu.dot_dimension_numbers<[1], [0], [0], [1], [0, 0, 1, 1], [], []>} : vector<1x128xf32>, vector<128x128xf32>, vector<1x128xf32> -> vector<1x128xf32>
    %317 = arith.addf %304, %316 : vector<1x128xf32>
    %c2_i32_204 = arith.constant 2 : i32
    %318 = vector.broadcast %c2_i32_204 : i32 to vector<1x2xi32>
    %319 = arith.muli %318, %302 : vector<1x2xi32>
    %c0_i32_205 = arith.constant 0 : i32
    %320 = vector.broadcast %c0_i32_205 : i32 to vector<1x2xi32>
    %321 = arith.addi %319, %320 : vector<1x2xi32>
    %322 = arith.cmpi eq, %303, %321 : vector<1x2xi32>
    %cst_206 = arith.constant 1.000000e+00 : f32
    %cst_207 = arith.constant 0.000000e+00 : f32
    %323 = vector.broadcast %cst_206 : f32 to vector<1x2xf32>
    %324 = vector.broadcast %cst_207 : f32 to vector<1x2xf32>
    %325 = arith.select %322, %323, %324 : vector<1x2xi1>, vector<1x2xf32>
    %cst_208 = arith.constant dense<0.000000e+00> : vector<1x128xf32>
    %326 = tpu.matmul %325, %301, %cst_208 {dimension_numbers = #tpu.dot_dimension_numbers<[1], [0], [0], [1], [0, 0, 1, 1], [], []>} : vector<1x2xf32>, vector<2x128xf32>, vector<1x128xf32> -> vector<1x128xf32>
    %c1_209 = arith.constant 1 : index
    %c0_210 = arith.constant 0 : index
    %c0_211 = arith.constant 0 : index
    %327 = vector.load %arg13[%c1_209, %c0_210, %c0_211] : memref<4x128x128xf32, #tpu.memory_space<vmem>>, vector<1x128x128xf32>
    %328 = vector.shape_cast %327 : vector<1x128x128xf32> to vector<128x128xf32>
    %cst_212 = arith.constant dense<0.000000e+00> : vector<1x128xf32>
    %329 = tpu.matmul %326, %328, %cst_212 {dimension_numbers = #tpu.dot_dimension_numbers<[1], [0], [0], [1], [0, 0, 1, 1], [], []>} : vector<1x128xf32>, vector<128x128xf32>, vector<1x128xf32> -> vector<1x128xf32>
    %330 = arith.addf %317, %329 : vector<1x128xf32>
    %c2_i32_213 = arith.constant 2 : i32
    %331 = vector.broadcast %c2_i32_213 : i32 to vector<1x2xi32>
    %332 = arith.muli %331, %302 : vector<1x2xi32>
    %c1_i32_214 = arith.constant 1 : i32
    %333 = vector.broadcast %c1_i32_214 : i32 to vector<1x2xi32>
    %334 = arith.addi %332, %333 : vector<1x2xi32>
    %335 = arith.cmpi eq, %303, %334 : vector<1x2xi32>
    %cst_215 = arith.constant 1.000000e+00 : f32
    %cst_216 = arith.constant 0.000000e+00 : f32
    %336 = vector.broadcast %cst_215 : f32 to vector<1x2xf32>
    %337 = vector.broadcast %cst_216 : f32 to vector<1x2xf32>
    %338 = arith.select %335, %336, %337 : vector<1x2xi1>, vector<1x2xf32>
    %cst_217 = arith.constant dense<0.000000e+00> : vector<1x128xf32>
    %339 = tpu.matmul %338, %301, %cst_217 {dimension_numbers = #tpu.dot_dimension_numbers<[1], [0], [0], [1], [0, 0, 1, 1], [], []>} : vector<1x2xf32>, vector<2x128xf32>, vector<1x128xf32> -> vector<1x128xf32>
    %c2_218 = arith.constant 2 : index
    %c0_219 = arith.constant 0 : index
    %c0_220 = arith.constant 0 : index
    %340 = vector.load %arg13[%c2_218, %c0_219, %c0_220] : memref<4x128x128xf32, #tpu.memory_space<vmem>>, vector<1x128x128xf32>
    %341 = vector.shape_cast %340 : vector<1x128x128xf32> to vector<128x128xf32>
    %cst_221 = arith.constant dense<0.000000e+00> : vector<1x128xf32>
    %342 = tpu.matmul %339, %341, %cst_221 {dimension_numbers = #tpu.dot_dimension_numbers<[1], [0], [0], [1], [0, 0, 1, 1], [], []>} : vector<1x128xf32>, vector<128x128xf32>, vector<1x128xf32> -> vector<1x128xf32>
    %343 = arith.addf %330, %342 : vector<1x128xf32>
    %c2_i32_222 = arith.constant 2 : i32
    %344 = vector.broadcast %c2_i32_222 : i32 to vector<1x2xi32>
    %345 = arith.muli %344, %302 : vector<1x2xi32>
    %c2_i32_223 = arith.constant 2 : i32
    %346 = vector.broadcast %c2_i32_223 : i32 to vector<1x2xi32>
    %347 = arith.addi %345, %346 : vector<1x2xi32>
    %348 = arith.cmpi eq, %303, %347 : vector<1x2xi32>
    %cst_224 = arith.constant 1.000000e+00 : f32
    %cst_225 = arith.constant 0.000000e+00 : f32
    %349 = vector.broadcast %cst_224 : f32 to vector<1x2xf32>
    %350 = vector.broadcast %cst_225 : f32 to vector<1x2xf32>
    %351 = arith.select %348, %349, %350 : vector<1x2xi1>, vector<1x2xf32>
    %cst_226 = arith.constant dense<0.000000e+00> : vector<1x128xf32>
    %352 = tpu.matmul %351, %301, %cst_226 {dimension_numbers = #tpu.dot_dimension_numbers<[1], [0], [0], [1], [0, 0, 1, 1], [], []>} : vector<1x2xf32>, vector<2x128xf32>, vector<1x128xf32> -> vector<1x128xf32>
    %c3_227 = arith.constant 3 : index
    %c0_228 = arith.constant 0 : index
    %c0_229 = arith.constant 0 : index
    %353 = vector.load %arg13[%c3_227, %c0_228, %c0_229] : memref<4x128x128xf32, #tpu.memory_space<vmem>>, vector<1x128x128xf32>
    %354 = vector.shape_cast %353 : vector<1x128x128xf32> to vector<128x128xf32>
    %cst_230 = arith.constant dense<0.000000e+00> : vector<1x128xf32>
    %355 = tpu.matmul %352, %354, %cst_230 {dimension_numbers = #tpu.dot_dimension_numbers<[1], [0], [0], [1], [0, 0, 1, 1], [], []>} : vector<1x128xf32>, vector<128x128xf32>, vector<1x128xf32> -> vector<1x128xf32>
    %356 = arith.addf %343, %355 : vector<1x128xf32>
    %c0_231 = arith.constant 0 : index
    %c0_232 = arith.constant 0 : index
    %357 = vector.load %arg14[%c0_231, %c0_232] : memref<1x128xf32, #tpu.memory_space<vmem>>, vector<1x128xf32>
    %358 = arith.addf %356, %357 : vector<1x128xf32>
    %cst_233 = arith.constant 0.000000e+00 : f32
    %359 = vector.broadcast %cst_233 : f32 to vector<1x128xf32>
    %360 = arith.maximumf %358, %359 : vector<1x128xf32>
    %cst_234 = arith.constant dense<0.000000e+00> : vector<128xf32>
    %361 = vector.multi_reduction <add>, %360, %cst_234 [0] : vector<1x128xf32> to vector<128xf32>
    %362 = vector.shape_cast %361 : vector<128xf32> to vector<1x128xf32>
    %cst_235 = arith.constant 1.000000e+00 : f32
    %363 = vector.broadcast %cst_235 : f32 to vector<1x128xf32>
    %364 = arith.divf %362, %363 : vector<1x128xf32>
    %c0_236 = arith.constant 0 : index
    %c0_237 = arith.constant 0 : index
    %c0_238 = arith.constant 0 : index
    %365 = vector.load %arg2[%c0_236, %c0_237, %c0_238] : memref<1x1x8xf32, #tpu.memory_space<vmem>>, vector<1x1x8xf32>
    %366 = vector.shape_cast %365 : vector<1x1x8xf32> to vector<1x8xf32>
    %c0_239 = arith.constant 0 : index
    %c0_240 = arith.constant 0 : index
    %367 = vector.load %arg15[%c0_239, %c0_240] : memref<128x256xf32, #tpu.memory_space<vmem>>, vector<128x256xf32>
    %cst_241 = arith.constant dense<0.000000e+00> : vector<1x256xf32>
    %368 = tpu.matmul %364, %367, %cst_241 {dimension_numbers = #tpu.dot_dimension_numbers<[1], [0], [0], [1], [0, 0, 1, 1], [], []>} : vector<1x128xf32>, vector<128x256xf32>, vector<1x256xf32> -> vector<1x256xf32>
    %c0_242 = arith.constant 0 : index
    %c0_243 = arith.constant 0 : index
    %369 = vector.load %arg16[%c0_242, %c0_243] : memref<8x256xf32, #tpu.memory_space<vmem>>, vector<8x256xf32>
    %cst_244 = arith.constant dense<0.000000e+00> : vector<1x256xf32>
    %370 = tpu.matmul %366, %369, %cst_244 {dimension_numbers = #tpu.dot_dimension_numbers<[1], [0], [0], [1], [0, 0, 1, 1], [], []>} : vector<1x8xf32>, vector<8x256xf32>, vector<1x256xf32> -> vector<1x256xf32>
    %371 = arith.addf %368, %370 : vector<1x256xf32>
    %c0_245 = arith.constant 0 : index
    %c0_246 = arith.constant 0 : index
    %372 = vector.load %arg17[%c0_245, %c0_246] : memref<1x256xf32, #tpu.memory_space<vmem>>, vector<1x256xf32>
    %373 = arith.addf %371, %372 : vector<1x256xf32>
    %cst_247 = arith.constant 0.000000e+00 : f32
    %374 = vector.broadcast %cst_247 : f32 to vector<1x256xf32>
    %375 = arith.maximumf %373, %374 : vector<1x256xf32>
    %c0_248 = arith.constant 0 : index
    %c0_249 = arith.constant 0 : index
    %376 = vector.load %arg18[%c0_248, %c0_249] : memref<256x256xf32, #tpu.memory_space<vmem>>, vector<256x256xf32>
    %cst_250 = arith.constant dense<0.000000e+00> : vector<1x256xf32>
    %377 = tpu.matmul %375, %376, %cst_250 {dimension_numbers = #tpu.dot_dimension_numbers<[1], [0], [0], [1], [0, 0, 1, 1], [], []>} : vector<1x256xf32>, vector<256x256xf32>, vector<1x256xf32> -> vector<1x256xf32>
    %c0_251 = arith.constant 0 : index
    %c0_252 = arith.constant 0 : index
    %378 = vector.load %arg19[%c0_251, %c0_252] : memref<1x256xf32, #tpu.memory_space<vmem>>, vector<1x256xf32>
    %379 = arith.addf %377, %378 : vector<1x256xf32>
    %cst_253 = arith.constant 0.000000e+00 : f32
    %380 = vector.broadcast %cst_253 : f32 to vector<1x256xf32>
    %381 = arith.maximumf %379, %380 : vector<1x256xf32>
    %c0_254 = arith.constant 0 : index
    %c0_255 = arith.constant 0 : index
    %382 = vector.load %arg20[%c0_254, %c0_255] : memref<256x256xf32, #tpu.memory_space<vmem>>, vector<256x256xf32>
    %cst_256 = arith.constant dense<0.000000e+00> : vector<1x256xf32>
    %383 = tpu.matmul %381, %382, %cst_256 {dimension_numbers = #tpu.dot_dimension_numbers<[1], [0], [0], [1], [0, 0, 1, 1], [], []>} : vector<1x256xf32>, vector<256x256xf32>, vector<1x256xf32> -> vector<1x256xf32>
    %c0_257 = arith.constant 0 : index
    %c0_258 = arith.constant 0 : index
    %384 = vector.load %arg21[%c0_257, %c0_258] : memref<1x256xf32, #tpu.memory_space<vmem>>, vector<1x256xf32>
    %385 = arith.addf %383, %384 : vector<1x256xf32>
    %c0_259 = arith.constant 0 : index
    %c0_260 = arith.constant 0 : index
    %c0_261 = arith.constant 0 : index
    %386 = vector.load %arg22[%c0_259, %c0_260, %c0_261] : memref<1x1x256xf32, #tpu.memory_space<vmem>>, vector<1x1x256xf32>
    %387 = vector.shape_cast %386 : vector<1x1x256xf32> to vector<1x256xf32>
    %388 = vector.shape_cast %385 : vector<1x256xf32> to vector<1x1x256xf32>
    tpu.vector_store %arg22[%c0_259, %c0_260, %c0_261], %388 {strides = array<i32>} : memref<1x1x256xf32, #tpu.memory_space<vmem>>, vector<1x1x256xf32>,
    return
  }
  func.func @transform_0(%arg0: i32) -> (i32, i32, i32) {
    %c0_i32 = arith.constant 0 : i32
    %c0_i32_0 = arith.constant 0 : i32
    %c0_i32_1 = arith.constant 0 : i32
    return %arg0, %c0_i32, %c0_i32_0 : i32, i32, i32
  }
  func.func @transform_1(%arg0: i32) -> (i32, i32, i32) {
    %c0_i32 = arith.constant 0 : i32
    %c0_i32_0 = arith.constant 0 : i32
    %c0_i32_1 = arith.constant 0 : i32
    return %arg0, %c0_i32, %c0_i32_0 : i32, i32, i32
  }
  func.func @transform_2(%arg0: i32) -> (i32, i32, i32) {
    %c0_i32 = arith.constant 0 : i32
    %c0_i32_0 = arith.constant 0 : i32
    %c0_i32_1 = arith.constant 0 : i32
    %c0_i32_2 = arith.constant 0 : i32
    return %c0_i32, %c0_i32_0, %c0_i32_1 : i32, i32, i32
  }
  func.func @transform_3(%arg0: i32) -> (i32, i32) {
    %c0_i32 = arith.constant 0 : i32
    %c0_i32_0 = arith.constant 0 : i32
    %c0_i32_1 = arith.constant 0 : i32
    return %c0_i32, %c0_i32_0 : i32, i32
  }
  func.func @transform_4(%arg0: i32) -> (i32, i32, i32) {
    %c0_i32 = arith.constant 0 : i32
    %c0_i32_0 = arith.constant 0 : i32
    %c0_i32_1 = arith.constant 0 : i32
    %c0_i32_2 = arith.constant 0 : i32
    return %c0_i32, %c0_i32_0, %c0_i32_1 : i32, i32, i32
  }
  func.func @transform_5(%arg0: i32) -> (i32, i32) {
    %c0_i32 = arith.constant 0 : i32
    %c0_i32_0 = arith.constant 0 : i32
    %c0_i32_1 = arith.constant 0 : i32
    return %c0_i32, %c0_i32_0 : i32, i32
  }
  func.func @transform_6(%arg0: i32) -> (i32, i32, i32) {
    %c0_i32 = arith.constant 0 : i32
    %c0_i32_0 = arith.constant 0 : i32
    %c0_i32_1 = arith.constant 0 : i32
    %c0_i32_2 = arith.constant 0 : i32
    return %c0_i32, %c0_i32_0, %c0_i32_1 : i32, i32, i32
  }
  func.func @transform_7(%arg0: i32) -> (i32, i32) {
    %c0_i32 = arith.constant 0 : i32
    %c0_i32_0 = arith.constant 0 : i32
    %c0_i32_1 = arith.constant 0 : i32
    return %c0_i32, %c0_i32_0 : i32, i32
  }
  func.func @transform_8(%arg0: i32) -> (i32, i32, i32) {
    %c0_i32 = arith.constant 0 : i32
    %c0_i32_0 = arith.constant 0 : i32
    %c0_i32_1 = arith.constant 0 : i32
    %c0_i32_2 = arith.constant 0 : i32
    return %c0_i32, %c0_i32_0, %c0_i32_1 : i32, i32, i32
  }
  func.func @transform_9(%arg0: i32) -> (i32, i32) {
    %c0_i32 = arith.constant 0 : i32
    %c0_i32_0 = arith.constant 0 : i32
    %c0_i32_1 = arith.constant 0 : i32
    return %c0_i32, %c0_i32_0 : i32, i32
  }
  func.func @transform_10(%arg0: i32) -> (i32, i32, i32) {
    %c0_i32 = arith.constant 0 : i32
    %c0_i32_0 = arith.constant 0 : i32
    %c0_i32_1 = arith.constant 0 : i32
    %c0_i32_2 = arith.constant 0 : i32
    return %c0_i32, %c0_i32_0, %c0_i32_1 : i32, i32, i32
  }
  func.func @transform_11(%arg0: i32) -> (i32, i32) {
    %c0_i32 = arith.constant 0 : i32
    %c0_i32_0 = arith.constant 0 : i32
    %c0_i32_1 = arith.constant 0 : i32
    return %c0_i32, %c0_i32_0 : i32, i32
  }
  func.func @transform_12(%arg0: i32) -> (i32, i32, i32) {
    %c0_i32 = arith.constant 0 : i32
    %c0_i32_0 = arith.constant 0 : i32
    %c0_i32_1 = arith.constant 0 : i32
    %c0_i32_2 = arith.constant 0 : i32
    return %c0_i32, %c0_i32_0, %c0_i32_1 : i32, i32, i32
  }
  func.func @transform_13(%arg0: i32) -> (i32, i32) {
    %c0_i32 = arith.constant 0 : i32
    %c0_i32_0 = arith.constant 0 : i32
    %c0_i32_1 = arith.constant 0 : i32
    return %c0_i32, %c0_i32_0 : i32, i32
  }
  func.func @transform_14(%arg0: i32) -> (i32, i32) {
    %c0_i32 = arith.constant 0 : i32
    %c0_i32_0 = arith.constant 0 : i32
    %c0_i32_1 = arith.constant 0 : i32
    return %c0_i32, %c0_i32_0 : i32, i32
  }
  func.func @transform_15(%arg0: i32) -> (i32, i32) {
    %c0_i32 = arith.constant 0 : i32
    %c0_i32_0 = arith.constant 0 : i32
    %c0_i32_1 = arith.constant 0 : i32
    return %c0_i32, %c0_i32_0 : i32, i32
  }
  func.func @transform_16(%arg0: i32) -> (i32, i32) {
    %c0_i32 = arith.constant 0 : i32
    %c0_i32_0 = arith.constant 0 : i32
    %c0_i32_1 = arith.constant 0 : i32
    return %c0_i32, %c0_i32_0 : i32, i32
  }
  func.func @transform_17(%arg0: i32) -> (i32, i32) {
    %c0_i32 = arith.constant 0 : i32
    %c0_i32_0 = arith.constant 0 : i32
    %c0_i32_1 = arith.constant 0 : i32
    return %c0_i32, %c0_i32_0 : i32, i32
  }
  func.func @transform_18(%arg0: i32) -> (i32, i32) {
    %c0_i32 = arith.constant 0 : i32
    %c0_i32_0 = arith.constant 0 : i32
    %c0_i32_1 = arith.constant 0 : i32
    return %c0_i32, %c0_i32_0 : i32, i32
  }
  func.func @transform_19(%arg0: i32) -> (i32, i32) {
    %c0_i32 = arith.constant 0 : i32
    %c0_i32_0 = arith.constant 0 : i32
    %c0_i32_1 = arith.constant 0 : i32
    return %c0_i32, %c0_i32_0 : i32, i32
  }
  func.func @transform_20(%arg0: i32) -> (i32, i32) {
    %c0_i32 = arith.constant 0 : i32
    %c0_i32_0 = arith.constant 0 : i32
    %c0_i32_1 = arith.constant 0 : i32
    return %c0_i32, %c0_i32_0 : i32, i32
  }
  func.func @transform_21(%arg0: i32) -> (i32, i32, i32) {
    %c0_i32 = arith.constant 0 : i32
    %c0_i32_0 = arith.constant 0 : i32
    %c0_i32_1 = arith.constant 0 : i32
    return %arg0, %c0_i32, %c0_i32_0 : i32, i32, i32
  }
}

</mosaic_0001>

<bundles_post_ra>
// kernel: tpu_custom_call.1
= control target key start
LH: loop header
LB: loop body
LE: loop exit
PB: predicated region body
PF: predicated region fallthrough
CT: control target
= control target key end

     0   :  { %s9728_s0 = inlined_call_operand.hbm [shape: f32[2,64,192], index: 0, kind: input, shape index: {}]   ;;  %s9729_s1 = inlined_call_operand.vmem [shape: f32[2,1,8], index: 1, kind: input, shape index: {}]   ;;  %s9730_s2 = inlined_call_operand.hbm [shape: f32[4,192,128], index: 2, kind: input, shape index: {}]   ;;  %s9731_s3 = inlined_call_operand.vmem [shape: f32[1,128], index: 3, kind: input, shape index: {}]   ;;  %s9732_s4 = inlined_call_operand.hbm [shape: f32[4,128,128], index: 4, kind: input, shape index: {}]   ;;  %s9733_s5 = inlined_call_operand.vmem [shape: f32[1,128], index: 5, kind: input, shape index: {}]   ;;  %s9734_s6 = inlined_call_operand.hbm [shape: f32[4,128,128], index: 6, kind: input, shape index: {}]   ;;  %s9735_s7 = inlined_call_operand.vmem [shape: f32[1,128], index: 7, kind: input, shape index: {}]   ;;  %s9736_s8 = inlined_call_operand.hbm [shape: f32[4,128,128], index: 8, kind: input, shape index: {}]   ;;  %s9737_s9 = inlined_call_operand.vmem [shape: f32[1,128], index: 9, kind: input, shape index: {}]   ;;  %s9738_s10 = inlined_call_operand.hbm [shape: f32[4,128,128], index: 10, kind: input, shape index: {}]   ;;  %s9739_s11 = inlined_call_operand.vmem [shape: f32[1,128], index: 11, kind: input, shape index: {}]   ;;  %s9740_s12 = inlined_call_operand.hbm [shape: f32[4,128,128], index: 12, kind: input, shape index: {}]   ;;  %s9741_s13 = inlined_call_operand.vmem [shape: f32[1,128], index: 13, kind: input, shape index: {}]   ;;  %s9742_s14 = inlined_call_operand.hbm [shape: f32[128,256], index: 14, kind: input, shape index: {}]   ;;  %s9743_s15 = inlined_call_operand.vmem [shape: f32[8,256], index: 15, kind: input, shape index: {}]   ;;  %s9744_s16 = inlined_call_operand.vmem [shape: f32[1,256], index: 16, kind: input, shape index: {}]   ;;  %s9745_s17 = inlined_call_operand.hbm [shape: f32[256,256], index: 17, kind: input, shape index: {}]   ;;  %s9746_s18 = inlined_call_operand.vmem [shape: f32[1,256], index: 18, kind: input, shape index: {}]   ;;  %s9747_s19 = inlined_call_operand.hbm [shape: f32[256,256], index: 19, kind: input, shape index: {}]   ;;  %s9748_s20 = inlined_call_operand.vmem [shape: f32[1,256], index: 20, kind: input, shape index: {}]   ;;  %s9749_s21 = inlined_call_operand.hbm [shape: f32[2,1,256], index: 21, kind: output, shape index: {}]  }
   0x1   :  { %9767 = sst [smem:[#allocation27_spill]] %s9728_s0 }
   0x2   :  { %9768 = sst [smem:[#allocation28_spill]] %s9729_s1 }
   0x3   :  { %9769 = sst [smem:[#allocation29_spill]] %s9730_s2 }
   0x4   :  { %9770 = sst [smem:[#allocation30_spill]] %s9731_s3 }
   0x5   :  { %9771 = sst [smem:[#allocation31_spill]] %s9732_s4 }
   0x6   :  { %9772 = sst [smem:[#allocation32_spill]] %s9733_s5 }
   0x7   :  { %9773 = sst [smem:[#allocation33_spill]] %s9734_s6 }
   0x8   :  { %9774 = sst [smem:[#allocation34_spill]] %s9736_s8 }
   0x9   :  { %9775 = sst [smem:[#allocation35_spill]] %s9737_s9 }
   0xa   :  { %9776 = sst [smem:[#allocation36_spill]] %s9738_s10 }
   0xb   :  { %9777 = sst [smem:[#allocation37_spill]] %s9739_s11 }
   0xc   :  { %9778 = sst [smem:[#allocation38_spill]] %s9741_s13 }
   0xd   :  { %9779 = sst [smem:[#allocation39_spill]] %s9743_s15 }
   0xe   :  { %9780 = sst [smem:[#allocation40_spill]] %s9744_s16 }
   0xf   :  { %9781 = sst [smem:[#allocation41_spill]] %s9746_s18 }
  0x10   :  { %9782 = sst [smem:[#allocation42_spill]] %s9748_s20 }
  0x11   :  { %9783 = sst [smem:[#allocation43_spill]] %s9749_s21 }
  0x12   :  { %26 = vsyncpa [#allocation3], 0 }
  0x13   :  { %28 = vsyncpa [#allocation3 + $0x1], 0 }
  0x14   :  { %29 = vsyncpa [#allocation6], 0 }
  0x15   :  { %30 = vsyncpa [#allocation9], 0 }
  0x16   :  { %31 = vsyncpa [#allocation12], 0 }
  0x17   :  { %32 = vsyncpa [#allocation15], 0 }
  0x18   :  { %33 = vsyncpa [#allocation18], 0 }
  0x19   :  { %34 = vsyncpa [#allocation4], 0 }
  0x1a   :  { %36 = vsyncpa [#allocation4 + $0x1], 0  ;;  %s8707_s2 = smov 0   ;;  %s8709_s25 = smov 0  }
  0x1b   :  { %s8711_s26 = smov 0   ;;  %s8713_s27 = smov 0  }
  0x1c LB: > { %s8578_s3 = smov [#allocation5]   ;;  %s8728_s29 = sadd.s32 4294967295, %s8576_s27   ;;  %s8576_s27 = sphi %s8713_s27, %s9830_s27   ;;  %s8572_s26 = sphi %s8711_s26, %s9829_s26   ;;  %s8568_s25 = sphi %s8709_s25, %s9828_s25   ;;  %s8564_s2 = sphi %s8707_s2, %s9827_s2  }
  0x1d   : > { %s536_s28 = sshll.u32 %s8578_s3, 4  ;;  %p5792_p0 = scmp.ge.s32.totalorder %s8576_s27, 1  ;;  %s8733_s28 = int_to_ptr.vmem [resolvable:$true] %s536_s28 }
  0x1e   : > { %p9755_p1 = scmp.eq.s32.totalorder %s8728_s29, 0  ;;  %p524_p2 = scmp.lt.s32.totalorder %s8576_s27, 3 }
  0x1f   : > { %s8579_s4 = smov [#allocation8]   ;;  %s8580_s22 = smov [#allocation11]  }
  0x20   : > { %p8735_p3 = pnand %p5792_p0, %p524_p2  ;;  %s568_s30 = sshll.u32 %s8579_s4, 4  ;;  %s8748_s30 = int_to_ptr.vmem [resolvable:$true] %s568_s30 }
  0x21   : > { %s600_s23 = sshll.u32 %s8580_s22, 4  ;;  %s9786_s3 = sld [smem:[#allocation29_spill]]  ;;  %s8750_s23 = int_to_ptr.vmem [resolvable:$true] %s600_s23 }
  0x22   : > { %s9784_s0 = scalar_select %p8735_p3, 1, 0 }
  0x23   : > { %p8103_p5 = pneg %p8735_p3 }
  0x25   : > { %p8744_p6 = pnand %p8103_p5, %p9755_p1 }
  0x27   : > { %s8208_s21 = scalar_lea.hbm %s9786_s3, 12288  ;;  %p8760_p8 = pneg %p8744_p6 }
  0x28   : > { %p8209_p7 = scmp.ne.s32.totalorder %s9786_s3, %s8208_s21  ;;  %p8215_p11 = scmp.lt.u32.totalorder %s8208_s21, %s9786_s3 }
  0x2a   : > { %p8211_p9 = pnand %p8760_p8, %p8209_p7 }
  0x2c   : > { %p8212_p10 = pneg %p8211_p9 }
  0x2e   : > { %p8217_p12 = pnand %p8215_p11, %p8212_p10 }
  0x30   : > { %8220 = shalt.err (!%p8217_p12)
}
  0x31   : > { %s8221_s18 = scalar_lea.vmem %s8733_s28, 12288  ;;  %p8229_p5 = scmp.lt.s32.totalorder %s8733_s28, %s8733_s28 }
  0x32   : > { %p8222_p13 = scmp.ne.s32.totalorder %s8733_s28, %s8221_s18  ;;  %p8230_p4 = scmp.lt.s32.totalorder %s8221_s18, %s8221_s18 }
  0x34   : > { %p8224_p0 = pnand %p8222_p13, %p8760_p8  ;;  %p8231_p7 = por %p8230_p4, %p8229_p5 }
  0x36   : > { %p8225_p2 = pneg %p8224_p0 }
  0x38   : > { %p8232_p9 = pnand %p8231_p7, %p8225_p2 }
  0x3a   : > { %8235 = shalt.err (!%p8232_p9)
}
  0x3b   : > { %s9757_s20 = smov 128   ;;  %s9759_s16 = smov 8  }
  0x3c   : > { %8106 = dma.hbm_to_vmem [thread:$0]  (!%p8744_p6), %s9786_s3, 12288, %s8733_s28, [#allocation6], %s9757_s20, %s9757_s20, %s9759_s16  }
  0x3d   : > { %s9788_s6 = sld [smem:[#allocation33_spill]] }
  0x43   : > { %s8236_s18 = scalar_lea.hbm %s9788_s6, 8192 }
  0x44   : > { %p8237_p4 = scmp.ne.s32.totalorder %s9788_s6, %s8236_s18  ;;  %p8243_p12 = scmp.lt.u32.totalorder %s8236_s18, %s9788_s6 }
  0x46   : > { %p8239_p10 = pnand %p8237_p4, %p8760_p8 }
  0x48   : > { %p8240_p11 = pneg %p8239_p10 }
  0x4a   : > { %p8245_p13 = pnand %p8243_p12, %p8240_p11 }
  0x4c   : > { %8248 = shalt.err (!%p8245_p13)
}
  0x4d   : > { %s8249_s28 = scalar_lea.vmem %s8748_s30, 8192  ;;  %p8257_p7 = scmp.lt.s32.totalorder %s8748_s30, %s8748_s30 }
  0x4e   : > { %p8250_p0 = scmp.ne.s32.totalorder %s8748_s30, %s8249_s28  ;;  %p8258_p9 = scmp.lt.s32.totalorder %s8249_s28, %s8249_s28 }
  0x50   : > { %p8252_p2 = pnand %p8250_p0, %p8760_p8  ;;  %p8259_p4 = por %p8258_p9, %p8257_p7 }
  0x52   : > { %p8253_p5 = pneg %p8252_p2 }
  0x54   : > { %p8260_p10 = pnand %p8259_p4, %p8253_p5 }
  0x56   : > { %8263 = shalt.err (!%p8260_p10)
}
  0x57   : > { %8112 = dma.hbm_to_vmem [thread:$0]  (!%p8744_p6), %s9788_s6, 8192, %s8748_s30, [#allocation9], %s9757_s20, %s9757_s20, %s9759_s16  }
  0x58   : > { %s9789_s10 = sld [smem:[#allocation36_spill]] }
  0x5e   : > { %s8264_s21 = scalar_lea.hbm %s9789_s10, 8192 }
  0x5f   : > { %p8265_p11 = scmp.ne.s32.totalorder %s9789_s10, %s8264_s21  ;;  %p8271_p0 = scmp.lt.u32.totalorder %s8264_s21, %s9789_s10 }
  0x61   : > { %p8267_p12 = pnand %p8265_p11, %p8760_p8 }
  0x63   : > { %p8268_p13 = pneg %p8267_p12 }
  0x65   : > { %p8273_p2 = pnand %p8271_p0, %p8268_p13 }
  0x67   : > { %8276 = shalt.err (!%p8273_p2)
}
  0x68   : > { %s8277_s30 = scalar_lea.vmem %s8750_s23, 8192  ;;  %p8285_p4 = scmp.lt.s32.totalorder %s8750_s23, %s8750_s23 }
  0x69   : > { %p8278_p5 = scmp.ne.s32.totalorder %s8750_s23, %s8277_s30  ;;  %p8286_p10 = scmp.lt.s32.totalorder %s8277_s30, %s8277_s30 }
  0x6b   : > { %p8280_p7 = pnand %p8278_p5, %p8760_p8  ;;  %p8287_p11 = por %p8286_p10, %p8285_p4 }
  0x6d   : > { %p8281_p9 = pneg %p8280_p7 }
  0x6f   : > { %p8288_p12 = pnand %p8287_p11, %p8281_p9 }
  0x71   : > { %8291 = shalt.err (!%p8288_p12)
}
  0x72   : > { %8118 = dma.hbm_to_vmem [thread:$0]  (!%p8744_p6), %s9789_s10, 8192, %s8750_s23, [#allocation12], %s9757_s20, %s9757_s20, %s9759_s16  }
  0x73   : > { %s8583_s11 = smov [#allocation14]   ;;  %s8292_s1 = scalar_lea.hbm %s9742_s14, 4096 }
  0x74   : > { %s632_s13 = sshll.u32 %s8583_s11, 4  ;;  %p8293_p13 = scmp.ne.s32.totalorder %s9742_s14, %s8292_s1  ;;  %s633_s13 = int_to_ptr.vmem [resolvable:$true] %s632_s13 }
  0x75   : > { %p8299_p5 = scmp.lt.u32.totalorder %s8292_s1, %s9742_s14 }
  0x76   : > { %p8295_p0 = pnand %p8293_p13, %p8760_p8 }
  0x78   : > { %p8296_p2 = pneg %p8295_p0 }
  0x7a   : > { %p8301_p7 = pnand %p8299_p5, %p8296_p2 }
  0x7c   : > { %8304 = shalt.err (!%p8301_p7)
}
  0x7d   : > { %s8305_s23 = scalar_lea.vmem %s633_s13, 4096  ;;  %p8313_p11 = scmp.lt.s32.totalorder %s633_s13, %s633_s13 }
  0x7e   : > { %p8306_p9 = scmp.ne.s32.totalorder %s633_s13, %s8305_s23  ;;  %p8314_p12 = scmp.lt.s32.totalorder %s8305_s23, %s8305_s23 }
  0x80   : > { %p8308_p4 = pnand %p8306_p9, %p8760_p8  ;;  %p8315_p1 = por %p8314_p12, %p8313_p11 }
  0x82   : > { %p8309_p10 = pneg %p8308_p4 }
  0x84   : > { %p8316_p3 = pnand %p8315_p1, %p8309_p10 }
  0x86   : > { %8319 = shalt.err (!%p8316_p3)
}
  0x87   : > { %s9762_s28 = smov 256   ;;  %s9764_s9 = smov 16  }
  0x88   : > { %8124 = dma.hbm_to_vmem [thread:$0]  (!%p8744_p6), %s9742_s14, 4096, %s633_s13, [#allocation15], %s9762_s28, %s9762_s28, %s9764_s9  }
  0x89   : > { %s8586_s21 = smov [#allocation7]   ;;  %s8587_s24 = smov [#allocation10]  }
  0x8a   : > { %s552_s1 = sshll.u32 %s8586_s21, 4  ;;  %s584_s22 = sshll.u32 %s8587_s24, 4  ;;  %s553_s1 = int_to_ptr.vmem [resolvable:$true] %s552_s1  ;;  %s8857_s22 = int_to_ptr.vmem [resolvable:$true] %s584_s22 }
  0x8b   : > { %s9790_s23 = sld [smem:[#allocation31_spill]] }
  0x91   : > { %s8320_s20 = scalar_lea.hbm %s9790_s23, 8192 }
  0x92   : > { %p8321_p1 = scmp.ne.s32.totalorder %s9790_s23, %s8320_s20  ;;  %p8327_p0 = scmp.lt.u32.totalorder %s8320_s20, %s9790_s23 }
  0x94   : > { %p8323_p3 = pnand %p8321_p1, %p8760_p8 }
  0x96   : > { %p8324_p13 = pneg %p8323_p3 }
  0x98   : > { %p8329_p2 = pnand %p8327_p0, %p8324_p13 }
  0x9a   : > { %8332 = shalt.err (!%p8329_p2)
}
  0x9b   : > { %s8333_s15 = scalar_lea.vmem %s553_s1, 8192  ;;  %p8341_p4 = scmp.lt.s32.totalorder %s553_s1, %s553_s1 }
  0x9c   : > { %p8334_p5 = scmp.ne.s32.totalorder %s553_s1, %s8333_s15  ;;  %p8342_p10 = scmp.lt.s32.totalorder %s8333_s15, %s8333_s15 }
  0x9e   : > { %p8336_p7 = pnand %p8334_p5, %p8760_p8  ;;  %p8343_p11 = por %p8342_p10, %p8341_p4 }
  0xa0   : > { %p8337_p9 = pneg %p8336_p7 }
  0xa2   : > { %p8344_p12 = pnand %p8343_p11, %p8337_p9 }
  0xa4   : > { %8347 = shalt.err (!%p8344_p12)
}
  0xa5   : > { %s9791_s3 = smov 8   ;;  %s9792_s16 = smov 128  }
  0xa6   : > { %8109 = dma.hbm_to_vmem [thread:$0]  (!%p8744_p6), %s9790_s23, 8192, %s553_s1, [#allocation6], %s9792_s16, %s9792_s16, %s9791_s3  }
  0xa7   : > { %s9793_s8 = sld [smem:[#allocation34_spill]] }
  0xad   : > { %s8348_s30 = scalar_lea.hbm %s9793_s8, 8192 }
  0xae   : > { %p8349_p1 = scmp.ne.s32.totalorder %s9793_s8, %s8348_s30  ;;  %p8355_p0 = scmp.lt.u32.totalorder %s8348_s30, %s9793_s8 }
  0xb0   : > { %p8351_p3 = pnand %p8349_p1, %p8760_p8 }
  0xb2   : > { %p8352_p13 = pneg %p8351_p3 }
  0xb4   : > { %p8357_p2 = pnand %p8355_p0, %p8352_p13 }
  0xb6   : > { %8360 = shalt.err (!%p8357_p2)
}
  0xb7   : > { %s8361_s1 = scalar_lea.vmem %s8857_s22, 8192  ;;  %p8369_p4 = scmp.lt.s32.totalorder %s8857_s22, %s8857_s22 }
  0xb8   : > { %p8362_p5 = scmp.ne.s32.totalorder %s8857_s22, %s8361_s1  ;;  %p8370_p10 = scmp.lt.s32.totalorder %s8361_s1, %s8361_s1 }
  0xba   : > { %p8364_p7 = pnand %p8362_p5, %p8760_p8  ;;  %p8371_p11 = por %p8370_p10, %p8369_p4 }
  0xbc   : > { %p8365_p9 = pneg %p8364_p7 }
  0xbe   : > { %p8372_p12 = pnand %p8371_p11, %p8365_p9 }
  0xc0   : > { %8375 = shalt.err (!%p8372_p12)
}
  0xc1   : > { %8115 = dma.hbm_to_vmem [thread:$0]  (!%p8744_p6), %s9793_s8, 8192, %s8857_s22, [#allocation9], %s9792_s16, %s9792_s16, %s9791_s3  }
  0xc2   : > { %s8588_s20 = smov [#allocation13]   ;;  %s8589_s18 = smov [#allocation16]  }
  0xc3   : > { %s616_s24 = sshll.u32 %s8588_s20, 4  ;;  %s651_s30 = sshll.u32 %s8589_s18, 4  ;;  %s617_s24 = int_to_ptr.vmem [resolvable:$true] %s616_s24  ;;  %s8906_s30 = int_to_ptr.vmem [resolvable:$true] %s651_s30 }
  0xc4   : > { %s8376_s15 = scalar_lea.hbm %s9740_s12, 8192 }
  0xc5   : > { %p8377_p1 = scmp.ne.s32.totalorder %s9740_s12, %s8376_s15  ;;  %p8383_p0 = scmp.lt.u32.totalorder %s8376_s15, %s9740_s12 }
  0xc7   : > { %p8379_p3 = pnand %p8377_p1, %p8760_p8 }
  0xc9   : > { %p8380_p13 = pneg %p8379_p3 }
  0xcb   : > { %p8385_p2 = pnand %p8383_p0, %p8380_p13 }
  0xcd   : > { %8388 = shalt.err (!%p8385_p2)
}
  0xce   : > { %s8389_s21 = scalar_lea.vmem %s617_s24, 8192  ;;  %p8397_p4 = scmp.lt.s32.totalorder %s617_s24, %s617_s24 }
  0xcf   : > { %p8390_p5 = scmp.ne.s32.totalorder %s617_s24, %s8389_s21  ;;  %p8398_p10 = scmp.lt.s32.totalorder %s8389_s21, %s8389_s21 }
  0xd1   : > { %p8392_p7 = pnand %p8390_p5, %p8760_p8  ;;  %p8399_p11 = por %p8398_p10, %p8397_p4 }
  0xd3   : > { %p8393_p9 = pneg %p8392_p7 }
  0xd5   : > { %p8400_p12 = pnand %p8399_p11, %p8393_p9 }
  0xd7   : > { %8403 = shalt.err (!%p8400_p12)
}
  0xd8   : > { %8121 = dma.hbm_to_vmem [thread:$0]  (!%p8744_p6), %s9740_s12, 8192, %s617_s24, [#allocation12], %s9792_s16, %s9792_s16, %s9791_s3  }
  0xd9   : > { %s8404_s13 = scalar_lea.hbm %s9745_s17, 8192 }
  0xda   : > { %p8405_p1 = scmp.ne.s32.totalorder %s9745_s17, %s8404_s13  ;;  %p8411_p0 = scmp.lt.u32.totalorder %s8404_s13, %s9745_s17 }
  0xdc   : > { %p8407_p3 = pnand %p8405_p1, %p8760_p8 }
  0xde   : > { %p8408_p13 = pneg %p8407_p3 }
  0xe0   : > { %p8413_p2 = pnand %p8411_p0, %p8408_p13 }
  0xe2   : > { %8416 = shalt.err (!%p8413_p2)
}
  0xe3   : > { %s8417_s3 = scalar_lea.vmem %s8906_s30, 8192  ;;  %p8425_p4 = scmp.lt.s32.totalorder %s8906_s30, %s8906_s30 }
  0xe4   : > { %p8418_p5 = scmp.ne.s32.totalorder %s8906_s30, %s8417_s3  ;;  %p8426_p10 = scmp.lt.s32.totalorder %s8417_s3, %s8417_s3 }
  0xe6   : > { %p8420_p7 = pnand %p8418_p5, %p8760_p8  ;;  %p8427_p11 = por %p8426_p10, %p8425_p4 }
  0xe8   : > { %p8421_p9 = pneg %p8420_p7 }
  0xea   : > { %p8428_p12 = pnand %p8427_p11, %p8421_p9 }
  0xec   : > { %8431 = shalt.err (!%p8428_p12)
}
  0xed   : > { %s9794_s16 = smov 16   ;;  %s9795_s24 = smov 256  }
  0xee   : > { %8127 = dma.hbm_to_vmem [thread:$0]  (!%p8744_p6), %s9745_s17, 8192, %s8906_s30, [#allocation15], %s9795_s24, %s9795_s24, %s9794_s16  }
  0xef   : > { %s8590_s20 = smov [#allocation17]   ;;  %s8432_s15 = scalar_lea.hbm %s9747_s19, 8192 }
  0xf0   : > { %s667_s18 = sshll.u32 %s8590_s20, 4  ;;  %p8433_p1 = scmp.ne.s32.totalorder %s9747_s19, %s8432_s15  ;;  %s668_s18 = int_to_ptr.vmem [resolvable:$true] %s667_s18 }
  0xf1   : > { %p8439_p0 = scmp.lt.u32.totalorder %s8432_s15, %s9747_s19 }
  0xf2   : > { %p8435_p3 = pnand %p8433_p1, %p8760_p8 }
  0xf4   : > { %p8436_p13 = pneg %p8435_p3 }
  0xf6   : > { %p8441_p2 = pnand %p8439_p0, %p8436_p13 }
  0xf8   : > { %8444 = shalt.err (!%p8441_p2)
}
  0xf9   : > { %s8445_s30 = scalar_lea.vmem %s668_s18, 8192  ;;  %p8453_p4 = scmp.lt.s32.totalorder %s668_s18, %s668_s18 }
  0xfa   : > { %p8446_p5 = scmp.ne.s32.totalorder %s668_s18, %s8445_s30  ;;  %p8454_p10 = scmp.lt.s32.totalorder %s8445_s30, %s8445_s30 }
  0xfc   : > { %p8448_p7 = pnand %p8446_p5, %p8760_p8  ;;  %p8455_p11 = por %p8454_p10, %p8453_p4 }
  0xfe   : > { %p8449_p9 = pneg %p8448_p7 }
 0x100   : > { %p8456_p12 = pnand %p8455_p11, %p8449_p9 }
 0x102   : > { %8459 = shalt.err (!%p8456_p12)
}
 0x103   : > { %8130 = dma.hbm_to_vmem [thread:$0]  (!%p8744_p6), %s9747_s19, 8192, %s668_s18, [#allocation18], %s9795_s24, %s9795_s24, %s9794_s16  }
 0x104   : > { %s5791_s5 = sadd.s32 4294967294, %s8576_s27   ;;  %s8978_s4 = sadd.s32 1, %s8576_s27  }
 0x105   : > { %s49_s20 = sadd.s32 1, %s8572_s26  ;;  %s46_s11 = ssub.s32 %s8576_s27, %s8978_s4 }
 0x106   : > { %p56_p8 = scmp.ne.s32.totalorder %s8572_s26, %s8568_s25  ;;  %p47_p1 = scmp.eq.s32.totalorder %s46_s11, 0 }
 0x107   : > { %p57_p3 = scmp.eq.s32.totalorder %s8576_s27, 0  ;;  %p62_p13 = scmp.ne.s32.totalorder %s8568_s25, %s8564_s2 }
 0x108   : > { %p511_p0 = scmp.eq.s32.totalorder %s8728_s29, 1  ;;  %p9796_p5 = scmp.eq.s32.totalorder %s8728_s29, 0 }
 0x109   : > { %s8990_s13 = scalar_select %p47_p1, %s8572_s26, %s49_s20  }
 0x10a   : > { %p58_p2 = por %p57_p3, %p56_p8  ;;  %p8994_p7 = por %p9796_p5, %p62_p13 }
 0x10b   : > { %p8998_p6 = por %p511_p0, %p56_p8  ;;  %p517_p9 = scmp.eq.s32.totalorder %s5791_s5, 1 }
 0x10c   : > { %p8148_p4 = scmp.lt.s32.totalorder %s8576_s27, 2  ;;  %s684_s1 = sand.u32 1, %s8572_s26  }
 0x10d   : > { %s9798_s18 = scalar_select %p8998_p6, 1, 0 }
 0x10e   : > { %p9004_p10 = por %p517_p9, %p62_p13  ;;  %s5803_s22 = sshll.u32 %s684_s1, 7 }
 0x10f   : > { %s5893_s3 = sshll.u32 %s8576_s27, 11  ;;  %s9800_s9 = sld [smem:[#allocation27_spill]] }
 0x110   : > { %s9799_s28 = scalar_select %p9004_p10, 1, 0 }
 0x111   : > { %s688_s11 = scalar_lea.vmem [#allocation2], %s5803_s22  ;;  %p9014_p11 = pnand %p8148_p4, %p58_p2 }
 0x112   : > { %s695_s6 = sshll.u32 %s688_s11, 4  ;;  %s9020_s8 = scalar_lea.sflag [#allocation3], %s684_s1  ;;  %s9018_s6 = int_to_ptr.vmem [resolvable:$true] %s695_s6 }
 0x113   : > { %p8462_p8 = pneg %p9014_p11 }
 0x115   : > { %s9012_s20 = scalar_lea.hbm %s9800_s9, %s5893_s3  ;;  %s8465_s30 = scalar_lea.hbm %s9800_s9, 4096 }
 0x116   : > { %s8460_s10 = scalar_lea.hbm %s9012_s20, 2048  ;;  %p8466_p13 = scmp.lt.u32.totalorder %s9012_s20, %s9800_s9 }
 0x117   : > { %p8461_p12 = scmp.ne.s32.totalorder %s9012_s20, %s8460_s10  ;;  %p8467_p0 = scmp.lt.u32.totalorder %s8465_s30, %s8460_s10 }
 0x118   : > { %p8469_p5 = scmp.lt.u32.totalorder %s8460_s10, %s9012_s20 }
 0x119   : > { %p8463_p1 = pnand %p8462_p8, %p8461_p12  ;;  %p8468_p2 = por %p8467_p0, %p8466_p13 }
 0x11b   : > { %p8464_p3 = pneg %p8463_p1  ;;  %p8470_p9 = por %p8469_p5, %p8468_p2 }
 0x11d   : > { %p8471_p4 = pnand %p8470_p9, %p8464_p3 }
 0x11f   : > { %8474 = shalt.err (!%p8471_p4)
}
 0x120   : > { %s8475_s1 = scalar_lea.vmem %s9018_s6, 2048  ;;  %s8591_s22 = smov [#allocation2]  }
 0x121   : > { %p8476_p12 = scmp.ne.s32.totalorder %s9018_s6, %s8475_s1  ;;  %s8480_s3 = sshll.u32 %s8591_s22, 4  ;;  %s8481_s3 = int_to_ptr.vmem [resolvable:$false] %s8480_s3 }
 0x122   : > { %s8482_s21 = scalar_lea.vmem %s8481_s3, 4096  ;;  %p8483_p6 = scmp.lt.s32.totalorder %s9018_s6, %s8481_s3 }
 0x123   : > { %p8478_p1 = pnand %p8476_p12, %p8462_p8  ;;  %p8484_p13 = scmp.lt.s32.totalorder %s8482_s21, %s8475_s1 }
 0x125   : > { %p8479_p10 = pneg %p8478_p1  ;;  %p8485_p0 = por %p8484_p13, %p8483_p6 }
 0x127   : > { %p8486_p2 = pnand %p8485_p0, %p8479_p10 }
 0x129   : > { %8489 = shalt.err (!%p8486_p2)
}
 0x12a   : > { %8134 = dma.hbm_to_vmem [thread:$0]  (!%p9014_p11), %s9012_s20, 2048, %s9018_s6, %s9020_s8, %s9795_s24, %s9795_s24, %s9794_s16  }
 0x12b   : > { %p9802_p8 = scmp.ne.s32.totalorder %s9784_s0, 0 }
 0x12c   : > { %s9054_s10 = sand.u32 (!%p9802_p8), 1, %s8568_s25  }
 0x12d   : > { %713 = sbr.rel (%p9802_p8) target bundleno = 4912 (0x1330), region = 104  ;;  %s5807_s30 = sshll.u32 (!%p9802_p8), %s9054_s10, 7 }
 0x12e   : > { %s716_s11 = scalar_lea.sflag (!%p9802_p8), [#allocation3], %s9054_s10  ;;  %s9058_s1 = scalar_lea.vmem (!%p9802_p8), [#allocation2], %s5807_s30 }
 0x134   : > { %8535 = dma.done.wait (%p8994_p7), %s716_s11, 2048  }
 0x135   : > { %8537 = vsyncadd (%p8994_p7), %s716_s11, 4294965248  ;;  %p9803_p6 = scmp.eq.s32.totalorder %s8728_s29, 0 }
 0x137   : > { %8539 = dma.done.wait (%p9803_p6), [#allocation6], 20480   ;;  %p9804_p10 = pmov %p9803_p6 }
 0x138   : > { %p9805_p11 = pmov %p9803_p6 }
 0x139   : > { %8541 = vsyncadd (%p9804_p10), [#allocation6], 4294946816 }
 0x13a   : > { %8543 = dma.done.wait (%p9805_p11), [#allocation9], 16384   ;;  %p9806_p3 = pmov %p9803_p6 }
 0x13c   : > { %8545 = vsyncadd (%p9806_p3), [#allocation9], 4294950912  ;;  %p9807_p5 = pmov %p9806_p3 }
 0x13d   : > { %p9808_p9 = pmov %p9806_p3 }
 0x13e   : > { %8547 = dma.done.wait (%p9807_p5), [#allocation12], 16384  }
 0x13f   : > { %8549 = vsyncadd (%p9808_p9), [#allocation12], 4294950912  ;;  %p9809_p7 = pmov %p9806_p3 }
 0x140   : > { %p9810_p4 = pmov %p9806_p3 }
 0x141   : > { %8551 = dma.done.wait (%p9809_p7), [#allocation15], 12288  }
 0x142   : > { %8553 = vsyncadd (%p9810_p4), [#allocation15], 4294955008  ;;  %p9811_p12 = pmov %p9806_p3 }
 0x143   : > { %p9812_p1 = pmov %p9806_p3 }
 0x144   : > { %8555 = dma.done.wait (%p9811_p12), [#allocation18], 8192  }
 0x145   : > { %8557 = vsyncadd (%p9812_p1), [#allocation18], 4294959104  ;;  %v8592_v0 = vmov 0.0   ;;  %v8593_v1 = vmov 0.0|0.0   ;;  %v836_v2 = vlaneseq  ;;  %v821_v3 = vld [vmem:[%s9058_s1 + $0x8] sm:$0xff]  ;;  %v823_v4 = vld [vmem:[%s9058_s1 + $0x18] sm:$0xff] }
 0x146   : > { %936 = vmatprep.mubr.f32.mxu0 %v8592_v0  ;;  %7199 = vmatprep.subr.bf16.mxu1 %v8593_v1  ;;  %v820_v5 = vld [vmem:[%s9058_s1] sm:$0xff]  ;;  %v9089_v6 = vpack.c.bf16 %v823_v4, %v821_v3  ;;  %v822_v7 = vld [vmem:[%s9058_s1 + $0x10] sm:$0xff]  ;;  %v825_v8 = vld [vmem:[%s9058_s1 + $0x28] sm:$0xff]  ;;  %vm859_vm1 = vcmask 523264   ;;  %s9813_s0 = sld [smem:[#allocation30_spill]]  ;;  %s9814_s15 = sld [smem:[#allocation32_spill]] }
 0x147   : > { %v827_v9 = vld [vmem:[%s9058_s1 + $0x38] sm:$0xff]  ;;  %v9095_v10 = vshrl.u32 %v836_v2, 7  ;;  %v9097_v11 = vpack.c.bf16 %v822_v7, %v820_v5  ;;  %v824_v13 = vld [vmem:[%s9058_s1 + $0x20] sm:$0xff]  ;;  %v826_v14 = vld [vmem:[%s9058_s1 + $0x30] sm:$0xff]  ;;  %v9124_v31 = vand.u32 127, %v836_v2  ;;  %s9815_s21 = sld [smem:[#allocation35_spill]] }
 0x148   : > { %v9099_v12 = vpack.c.bf16 %v827_v9, %v825_v8  ;;  %v829_v15 = vld [vmem:[%s9058_s1 + $0x48] sm:$0xff]  ;;  %7132 = vmatprep.subr.bf16.mxu0 %v9089_v6  ;;  %v831_v16 = vld [vmem:[%s9058_s1 + $0x58] sm:$0xff]  ;;  %v9107_v17 = vpack.c.bf16 %v826_v14, %v824_v13  ;;  %v828_v18 = vld [vmem:[%s9058_s1 + $0x40] sm:$0xff]  ;;  %p817_p13 = scmp.lt.s32.totalorder %s8728_s29, 1  ;;  %s9818_s22 = sld [smem:[#allocation28_spill]] }
 0x149   : > { %7134 = vmatpush1.bf16.msra.mxu0 %v9097_v11  ;;  %v830_v19 = vld [vmem:[%s9058_s1 + $0x50] sm:$0xff]  ;;  %v9112_v20 = vpack.c.bf16 %v831_v16, %v829_v15  ;;  %v833_v21 = vld [vmem:[%s9058_s1 + $0x68] sm:$0xff]  ;;  %v9116_v22 = vmul.u32 2, %v9095_v10  ;;  %v838_v23 = vadd.s32 8, %v9095_v10  ;;  %v961_v24 = vld [vmem:[#allocation5] sm:$0xff]  ;;  %v839_v32 = vadd.s32 16, %v9095_v10 }
 0x14a   : > { %7136 = vmatprep.subr.bf16.mxu0 %v9099_v12  ;;  %v962_v25 = vld [vmem:[#allocation5 + $0x8] sm:$0xff]  ;;  %v835_v26 = vld [vmem:[%s9058_s1 + $0x78] sm:$0xff]  ;;  %v963_v27 = vld [vmem:[#allocation5 + $0x10] sm:$0xff]  ;;  %v9121_v30 = vpack.c.bf16 %v830_v19, %v828_v18  ;;  %v840_v42 = vadd.s32 24, %v9095_v10  ;;  %s818_s16 = scalar_select %p817_p13, %s8728_s29, 1 }
 0x14b   : > { %v964_v28 = vld [vmem:[#allocation5 + $0x18] sm:$0xff]  ;;  %v7200_v29 = vpack.c.bf16 %v962_v25, %v961_v24  ;;  %v9128_v33 = vpack.c.bf16 %v835_v26, %v833_v21  ;;  %v832_v34 = vld [vmem:[%s9058_s1 + $0x60] sm:$0xff]  ;;  %v834_v35 = vld [vmem:[%s9058_s1 + $0x70] sm:$0xff]  ;;  %v847_v36 = vadd.s32 4294967295, %v9116_v22  ;;  %v9133_v37 = vmul.u32 2, %v838_v23  ;;  %s9816_s1 = sld [smem:[#allocation37_spill]] }
 0x14c   : > { %v7203_v38 = vpack.c.bf16 %v964_v28, %v963_v27  ;;  %v965_v39 = vld [vmem:[#allocation5 + $0x20] sm:$0xff]  ;;  %v966_v40 = vld [vmem:[#allocation5 + $0x28] sm:$0xff]  ;;  %v9137_v41 = vpack.c.bf16 %v834_v35, %v832_v34  ;;  %v9143_v44 = vmul.u32 2, %v839_v32  ;;  %v967_v46 = vld [vmem:[#allocation5 + $0x30] sm:$0xff]  ;;  %v9153_v50 = vmul.u32 2, %v840_v42  ;;  %s9819_s11 = sld [smem:[#allocation38_spill]] }
 0x14d   : > { %7138 = vmatpush1.bf16.msra.mxu0 %v9107_v17  ;;  %7201 = vmatpush1.bf16.msra.mxu1 %v7200_v29  ;;  %vm851_vm0 = vcmp.eq.s32.totalorder %v9124_v31, %v847_v36  ;;  %v848_v43 = vadd.s32 4294967295, %v9133_v37  ;;  %v7206_v45 = vpack.c.bf16 %v966_v40, %v965_v39  ;;  %v968_v47 = vld [vmem:[#allocation5 + $0x38] sm:$0xff]  ;;  %v969_v52 = vld [vmem:[#allocation5 + $0x40] sm:$0xff]  ;;  %v970_v53 = vld [vmem:[#allocation5 + $0x48] sm:$0xff]  ;;  %vm985_vm5 = vcmp.eq.s32.totalorder %v9124_v31, %v9116_v22  ;;  %s9820_s8 = sld [smem:[#allocation40_spill]]  ;;  %s5612_s24 = scalar_lea.sflag [#allocation4], %s9054_s10 }
 0x14e   : > { %7140 = vmatprep.subr.bf16.mxu0 %v9112_v20  ;;  %7202 = vmatprep.subr.bf16.mxu1 %v8593_v1  ;;  %v9148_v48 = vsel %vm851_vm0, 1.0, %v8592_v0  ;;  %v849_v49 = vadd.s32 4294967295, %v9143_v44  ;;  %v7209_v51 = vpack.c.bf16 %v968_v47, %v967_v46  ;;  %v850_v55 = vadd.s32 4294967295, %v9153_v50  ;;  %v971_v57 = vld [vmem:[#allocation5 + $0x50] sm:$0xff]  ;;  %v972_v58 = vld [vmem:[#allocation5 + $0x58] sm:$0xff]  ;;  %v973_v61 = vld [vmem:[#allocation5 + $0x60] sm:$0xff]  ;;  %s819_s3 = scalar_lea.vmem %s9818_s22, %s818_s16 }
 0x14f   : > { %vm852_vm2 = vcmp.eq.s32.totalorder %v9124_v31, %v848_v43  ;;  %v7212_v56 = vpack.c.bf16 %v970_v53, %v969_v52  ;;  %v7215_v60 = vpack.c.bf16 %v972_v58, %v971_v57  ;;  %v974_v62 = vld [vmem:[#allocation5 + $0x68] sm:$0xff]  ;;  %v1095_v3 = vld [vmem:[#allocation5 + $0xc0] sm:$0xff]  ;;  %v975_v7 = vld [vmem:[#allocation5 + $0x70] sm:$0xff]  ;;  %v9187_v9 = vsel %vm985_vm5, 1.0, %v8592_v0  ;;  %s9822_s22 = sld [smem:[#allocation42_spill]]  ;;  %p9824_p2 = scmp.ne.s32.totalorder %s9798_s18, 0 }
 0x150   : > { %v9161_v54 = vsel %vm852_vm2, 1.0, %v8592_v0  ;;  %vm853_vm3 = vcmp.eq.s32.totalorder %v9124_v31, %v849_v49  ;;  %vm854_vm4 = vcmp.eq.s32.totalorder %v9124_v31, %v850_v55  ;;  %v1096_v4 = vld [vmem:[#allocation5 + $0xc8] sm:$0xff]  ;;  %v7218_v5 = vpack.c.bf16 %v974_v62, %v973_v61  ;;  %v976_v8 = vld [vmem:[#allocation5 + $0x78] sm:$0xff]  ;;  %v1097_v14 = vld [vmem:[#allocation5 + $0xd0] sm:$0xff] }
 0x151   : > { %7142 = vmatpush1.bf16.msra.mxu0 %v9121_v30  ;;  %7204 = vmatpush1.bf16.msra.mxu1 %v7203_v38  ;;  %v857_v59 = vsel %vm853_vm3, 1.0, %v8592_v0  ;;  %v858_v63 = vsel %vm854_vm4, 1.0, %v8592_v0  ;;  %v7164_v13 = vpack.c.bf16 %v1096_v4, %v1095_v3  ;;  %vm986_vm6 = vcmp.eq.s32.totalorder %v9124_v31, %v9133_v37  ;;  %v1098_v15 = vld [vmem:[#allocation5 + $0xd8] sm:$0xff]  ;;  %v977_v18 = vld [vmem:[#allocation5 + $0x80] sm:$0xff]  ;;  %v978_v19 = vld [vmem:[#allocation5 + $0x88] sm:$0xff] }
 0x152   : > { %7144 = vmatprep.subr.bf16.mxu0 %v9128_v33  ;;  %7205 = vmatprep.subr.bf16.mxu1 %v8593_v1  ;;  %v7221_v16 = vpack.c.bf16 %v976_v8, %v975_v7  ;;  %v9197_v21 = vsel %vm986_vm6, 1.0, %v8592_v0  ;;  %v7167_v23 = vpack.c.bf16 %v1098_v15, %v1097_v14  ;;  %vm987_vm7 = vcmp.eq.s32.totalorder %v9124_v31, %v9143_v44  ;;  %v1099_v24 = vld [vmem:[#allocation5 + $0xe0] sm:$0xff]  ;;  %v1100_v25 = vld [vmem:[#allocation5 + $0xe8] sm:$0xff]  ;;  %v979_v27 = vld [vmem:[#allocation5 + $0x90] sm:$0xff] }
 0x153   : > { %v7224_v26 = vpack.c.bf16 %v978_v19, %v977_v18  ;;  %v980_v28 = vld [vmem:[#allocation5 + $0x98] sm:$0xff]  ;;  %v991_v29 = vsel %vm987_vm7, 1.0, %v8592_v0  ;;  %v7170_v32 = vpack.c.bf16 %v1100_v25, %v1099_v24  ;;  %vm988_vm8 = vcmp.eq.s32.totalorder %v9124_v31, %v9153_v50  ;;  %v1101_v34 = vld [vmem:[#allocation5 + $0xf0] sm:$0xff]  ;;  %v981_v38 = vld [vmem:[#allocation5 + $0xa0] sm:$0xff] }
 0x154   : > { %v1102_v35 = vld [vmem:[#allocation5 + $0xf8] sm:$0xff]  ;;  %v7227_v36 = vpack.c.bf16 %v980_v28, %v979_v27  ;;  %v982_v39 = vld [vmem:[#allocation5 + $0xa8] sm:$0xff]  ;;  %v992_v40 = vsel %vm988_vm8, 1.0, %v8592_v0  ;;  %v1103_v43 = vld [vmem:[#allocation5 + $0x100] sm:$0xff]  ;;  %vm1806_vm2 = vcmask 261120   ;;  %vm2505_vm3 = vcmask 130048  }
 0x155   : > { %7146 = vmatpush1.bf16.msra.mxu0 %v9137_v41  ;;  %7207 = vmatpush1.bf16.msra.mxu1 %v7206_v45  ;;  %v7173_v42 = vpack.c.bf16 %v1102_v35, %v1101_v34  ;;  %v1104_v45 = vld [vmem:[#allocation5 + $0x108] sm:$0xff]  ;;  %v7230_v46 = vpack.c.bf16 %v982_v39, %v981_v38  ;;  %v1105_v49 = vld [vmem:[#allocation5 + $0x110] sm:$0xff]  ;;  %v1107_v53 = vld [vmem:[#allocation5 + $0x120] sm:$0xff]  ;;  %vm3152_vm4 = vcmask 64512   ;;  %vm3802_vm5 = vcmask 1043456  }
 0x156   : > { %7148 = vmatprep.subr.bf16.mxu0 %v9089_v6  ;;  %7208 = vmatprep.subr.bf16.mxu1 %v8593_v1  ;;  %v7176_v47 = vpack.c.bf16 %v1104_v45, %v1103_v43  ;;  %v1108_v55 = vld [vmem:[#allocation5 + $0x128] sm:$0xff]  ;;  %v1109_v57 = vld [vmem:[#allocation5 + $0x130] sm:$0xff]  ;;  %v1110_v58 = vld [vmem:[#allocation5 + $0x138] sm:$0xff]  ;;  %vm3799_vm6 = vcmask 31744   ;;  %vm4453_vm7 = vcmask 1041408   ;;  %vm4450_vm8 = vcmask 15360  }
 0x157   : > { %v984_v61 = vld [vmem:[#allocation5 + $0xb8] sm:$0xff]  ;;  %v1112_v3 = vld [vmem:[#allocation5 + $0x148] sm:$0xff]  ;;  %v1429_v28 = vld [vmem:[#allocation5 + $0x190] sm:$0xff] }
 0x158   : > { %5818 = vmatmul.mubr.msk.f32.vlgmr.msra.gmra.mrb[0].mxu0 %vm859_vm1, %v9148_v48  ;;  %v1114_v7 = vld [vmem:[#allocation5 + $0x158] sm:$0xff]  ;;  %v1116_v14 = vld [vmem:[#allocation5 + $0x168] sm:$0xff] }
 0x159   : > { %7150 = vmatpush1.bf16.msra.mxu0 %v9097_v11  ;;  %942 = vmatprep.mubr.f32.mxu0 %v8592_v0  ;;  %v1118_v18 = vld [vmem:[#allocation5 + $0x178] sm:$0xff]  ;;  %v1428_v24 = vld [vmem:[#allocation5 + $0x188] sm:$0xff] }
 0x15a   : > { %7152 = vmatprep.subr.bf16.mxu0 %v9099_v12  ;;  %7210 = vmatpush1.bf16.msra.mxu1 %v7209_v51  ;;  %v1106_v51 = vld [vmem:[#allocation5 + $0x118] sm:$0xff]  ;;  %v1432_v38 = vld [vmem:[#allocation5 + $0x1a8] sm:$0xff] }
 0x15b   : > { %7211 = vmatprep.subr.bf16.mxu1 %v8593_v1  ;;  %v7179_v52 = vpack.c.bf16 %v1106_v51, %v1105_v49 }
 0x15c   : > { %5819 = vmatmul.mubr.msk.f32.gmra.mrb[2].mxu0 %vm859_vm1, %v9161_v54 }
 0x15d   : > { %7154 = vmatpush1.bf16.msra.mxu0 %v9107_v17  ;;  %948 = vmatprep.mubr.f32.mxu0 %v8592_v0 }
 0x15e   : > { %7156 = vmatprep.subr.bf16.mxu0 %v9112_v20  ;;  %7213 = vmatpush1.bf16.msra.mxu1 %v7212_v56  ;;  %v7182_v56 = vpack.c.bf16 %v1108_v55, %v1107_v53  ;;  %v1313_v55 = vadd.s32 1, %v9116_v22 }
 0x15f   : > { %7214 = vmatprep.subr.bf16.mxu1 %v8593_v1 }
 0x160   : > { %5820 = vmatmul.mubr.msk.f32.gmra.mrb[4].mxu0 %vm859_vm1, %v857_v59  ;;  %v983_v59 = vld [vmem:[#allocation5 + $0xb0] sm:$0xff]  ;;  %vm1317_vm9 = vcmp.eq.s32.totalorder %v9124_v31, %v1313_v55 }
 0x161   : > { %7158 = vmatpush1.bf16.msra.mxu0 %v9121_v30  ;;  %954 = vmatprep.mubr.f32.mxu0 %v8592_v0  ;;  %v7233_v62 = vpack.c.bf16 %v984_v61, %v983_v59  ;;  %v9251_v59 = vsel %vm1317_vm9, 1.0, %v8592_v0  ;;  %vm5608_vm9 = vcmp.lt.s32.totalorder %v836_v2, 256 }
 0x162   : > { %7160 = vmatprep.subr.bf16.mxu0 %v9128_v33  ;;  %7216 = vmatpush1.bf16.msra.mxu1 %v7215_v60  ;;  %v7185_v60 = vpack.c.bf16 %v1110_v58, %v1109_v57  ;;  %v1314_v58 = vadd.s32 1, %v9133_v37 }
 0x163   : > { %7217 = vmatprep.subr.bf16.mxu1 %v8593_v1 }
 0x164   : > { %5821 = vmatmul.mubr.msk.f32.gmra.mrb[6].mxu0 %vm859_vm1, %v858_v63  ;;  %v1111_v63 = vld [vmem:[#allocation5 + $0x140] sm:$0xff]  ;;  %vm1318_vm10 = vcmp.eq.s32.totalorder %v9124_v31, %v1314_v58 }
 0x165   : > { %7162 = vmatpush1.bf16.msra.mxu0 %v9137_v41  ;;  %1069 = vmatprep.mubr.f32.mxu0 %v8592_v0  ;;  %v7188_v4 = vpack.c.bf16 %v1112_v3, %v1111_v63  ;;  %v9261_v61 = vsel %vm1318_vm10, 1.0, %v8592_v0  ;;  %v1434_v63 = vld [vmem:[#allocation5 + $0x1b8] sm:$0xff]  ;;  %v1435_v3 = vld [vmem:[#allocation5 + $0x1c0] sm:$0xff] }
 0x166   : > { %7163 = vmatprep.subr.bf16.mxu0 %v8593_v1  ;;  %7219 = vmatpush1.bf16.msra.mxu1 %v7218_v5  ;;  %v1113_v5 = vld [vmem:[#allocation5 + $0x150] sm:$0xff]  ;;  %v1678_v58 = vld [vmem:[#allocation5 + $0x2a0] sm:$0xff] }
 0x167   : > { %7220 = vmatprep.subr.bf16.mxu1 %v8593_v1  ;;  %v7191_v8 = vpack.c.bf16 %v1114_v7, %v1113_v5  ;;  %v1666_v5 = vld [vmem:[#allocation5 + $0x240] sm:$0xff] }
 0x168   : > { %5822 = vmatmul.mubr.msk.f32.vlgmr.msra.gmra.mrb[8].mxu0 %vm859_vm1, %v9187_v9 }
 0x169   : > { %1075 = vmatprep.mubr.f32.mxu0 %v8592_v0  ;;  %7165 = vmatpush1.bf16.msra.mxu0 %v7164_v13  ;;  %v1115_v13 = vld [vmem:[#allocation5 + $0x160] sm:$0xff] }
 0x16a   : > { %7166 = vmatprep.subr.bf16.mxu0 %v8593_v1  ;;  %7222 = vmatpush1.bf16.msra.mxu1 %v7221_v16  ;;  %v7194_v15 = vpack.c.bf16 %v1116_v14, %v1115_v13  ;;  %v1117_v16 = vld [vmem:[#allocation5 + $0x170] sm:$0xff]  ;;  %v1438_v14 = vld [vmem:[#allocation5 + $0x1d8] sm:$0xff] }
 0x16b   : > { %7223 = vmatprep.subr.bf16.mxu1 %v8593_v1  ;;  %v7197_v19 = vpack.c.bf16 %v1118_v18, %v1117_v16  ;;  %v1437_v13 = vld [vmem:[#allocation5 + $0x1d0] sm:$0xff]  ;;  %v1669_v18 = vld [vmem:[#allocation5 + $0x258] sm:$0xff] }
 0x16c   : > { %5823 = vmatmul.mubr.msk.f32.gmra.mrb[10].mxu0 %vm859_vm1, %v9197_v21  ;;  %v7267_v16 = vpack.c.bf16 %v1438_v14, %v1437_v13  ;;  %v1689_v13 = vld [vmem:[#allocation5 + $0x2f8] sm:$0xff] }
 0x16d   : > { %1081 = vmatprep.mubr.f32.mxu0 %v8592_v0  ;;  %7168 = vmatpush1.bf16.msra.mxu0 %v7167_v23  ;;  %v1427_v23 = vld [vmem:[#allocation5 + $0x180] sm:$0xff] }
 0x16e   : > { %7169 = vmatprep.subr.bf16.mxu0 %v8593_v1  ;;  %7225 = vmatpush1.bf16.msra.mxu1 %v7224_v26  ;;  %v7252_v26 = vpack.c.bf16 %v1428_v24, %v1427_v23  ;;  %v1439_v23 = vld [vmem:[#allocation5 + $0x1e0] sm:$0xff]  ;;  %v1440_v24 = vld [vmem:[#allocation5 + $0x1e8] sm:$0xff] }
 0x16f   : > { %7226 = vmatprep.subr.bf16.mxu1 %v8593_v1 }
 0x170   : > { %5824 = vmatmul.mubr.msk.f32.gmra.mrb[12].mxu0 %vm859_vm1, %v991_v29  ;;  %v1430_v29 = vld [vmem:[#allocation5 + $0x198] sm:$0xff] }
 0x171   : > { %1087 = vmatprep.mubr.f32.mxu0 %v8592_v0  ;;  %7171 = vmatpush1.bf16.msra.mxu0 %v7170_v32  ;;  %v7255_v34 = vpack.c.bf16 %v1430_v29, %v1429_v28  ;;  %v1441_v29 = vld [vmem:[#allocation5 + $0x1f0] sm:$0xff] }
 0x172   : > { %7172 = vmatprep.subr.bf16.mxu0 %v8593_v1  ;;  %7228 = vmatpush1.bf16.msra.mxu1 %v7227_v36  ;;  %v1431_v36 = vld [vmem:[#allocation5 + $0x1a0] sm:$0xff] }
 0x173   : > { %7229 = vmatprep.subr.bf16.mxu1 %v8593_v1 }
 0x174   : > { %5825 = vmatmul.mubr.msk.f32.gmra.mrb[14].mxu0 %vm859_vm1, %v992_v40  ;;  %v7258_v40 = vpack.c.bf16 %v1432_v38, %v1431_v36  ;;  %v1673_v36 = vld [vmem:[#allocation5 + $0x278] sm:$0xff] }
 0x175   : > { %7174 = vmatpush1.bf16.msra.mxu0 %v7173_v42 }
 0x176   : > { %7175 = vmatprep.subr.bf16.mxu0 %v8593_v1  ;;  %7231 = vmatpush1.bf16.msra.mxu1 %v7230_v46 }
 0x177   : > { %7232 = vmatprep.subr.bf16.mxu1 %v8593_v1 }
 0x179   : > { %7177 = vmatpush1.bf16.msra.mxu0 %v7176_v47 }
 0x17a   : > { %7178 = vmatprep.subr.bf16.mxu0 %v8593_v1  ;;  %7234 = vmatpush1.bf16.msra.mxu1 %v7233_v62  ;;  %v1552_v62 = vadd.s32 2, %v9116_v22  ;;  %v1554_v22 = vadd.s32 2, %v9143_v44 }
 0x17b   : > { %7251 = vmatprep.subr.bf16.mxu1 %v8593_v1 }
 0x17c   : > { %vm1556_vm13 = vcmp.eq.s32.totalorder %v9124_v31, %v1552_v62  ;;  %vm1558_vm15 = vcmp.eq.s32.totalorder %v9124_v31, %v1554_v22  ;;  %v1449_v62 = vld [vmem:[#allocation5 + $0x230] sm:$0xff] }
 0x17d   : > { %7180 = vmatpush1.bf16.msra.mxu0 %v7179_v52 }
 0x17e   : > { %7181 = vmatprep.subr.bf16.mxu0 %v8593_v1 }
 0x181   : > { %7183 = vmatpush1.bf16.msra.mxu0 %v7182_v56 }
 0x182   : > { %7184 = vmatprep.subr.bf16.mxu0 %v8593_v1 }
 0x185   : > { %7186 = vmatpush1.bf16.msra.mxu0 %v7185_v60  ;;  %v1315_v60 = vadd.s32 1, %v9143_v44  ;;  %v1433_v44 = vld [vmem:[#allocation5 + $0x1b0] sm:$0xff] }
 0x186   : > { %7187 = vmatprep.subr.bf16.mxu0 %v8593_v1 }
 0x187   : > { %vm1319_vm11 = vcmp.eq.s32.totalorder %v9124_v31, %v1315_v60 }
 0x189   : > { %7189 = vmatpush1.bf16.msra.mxu0 %v7188_v4  ;;  %v1436_v4 = vld [vmem:[#allocation5 + $0x1c8] sm:$0xff] }
 0x18a   : > { %7190 = vmatprep.subr.bf16.mxu0 %v8593_v1  ;;  %v7264_v7 = vpack.c.bf16 %v1436_v4, %v1435_v3  ;;  %v1685_v3 = vld [vmem:[#allocation5 + $0x2d8] sm:$0xff] }
 0x18d   : > { %7192 = vmatpush1.bf16.msra.mxu0 %v7191_v8  ;;  %v1667_v8 = vld [vmem:[#allocation5 + $0x248] sm:$0xff] }
 0x18e   : > { %7193 = vmatprep.subr.bf16.mxu0 %v8593_v1 }
 0x191   : > { %7195 = vmatpush1.bf16.msra.mxu0 %v7194_v15  ;;  %v1668_v15 = vld [vmem:[#allocation5 + $0x250] sm:$0xff] }
 0x192   : > { %7196 = vmatprep.subr.bf16.mxu0 %v8593_v1 }
 0x195   : > { %7198 = vmatpush1.bf16.msra.mxu0 %v7197_v19  ;;  %v7307_v19 = vpack.c.bf16 %v1669_v18, %v1668_v15 }
 0x196   : > { %7236 = vmatprep.subr.bf16.mxu0 %v9089_v6 }
 0x22b   : > { %v938_v25 = vpop.f32.mrb[0].mxu0 }
 0x22c   : > { %v940_v27 = vpop.f32.mrb[1].mxu0 }
 0x22d   : > { %5830 = vmatprep.mubr.msk.f32.mxu1 %vm859_vm1, %v940_v27  ;;  %v1671_v27 = vld [vmem:[#allocation5 + $0x268] sm:$0xff] }
 0x22e   : > { %1293 = vmatmul.mubr.f32.vlgmr.msra.gmra.mrb[0].mxu1 %v938_v25  ;;  %v1670_v25 = vld [vmem:[#allocation5 + $0x260] sm:$0xff] }
 0x22f   : > { %v944_v32 = vpop.f32.mrb[2].mxu0  ;;  %7253 = vmatpush1.bf16.msra.mxu1 %v7252_v26  ;;  %v7270_v26 = vpack.c.bf16 %v1440_v24, %v1439_v23  ;;  %v7310_v28 = vpack.c.bf16 %v1671_v27, %v1670_v25 }
 0x230   : > { %v946_v35 = vpop.f32.mrb[3].mxu0  ;;  %7254 = vmatprep.subr.bf16.mxu1 %v8593_v1 }
 0x231   : > { %5831 = vmatprep.mubr.msk.f32.mxu1 %vm859_vm1, %v946_v35 }
 0x232   : > { %1298 = vmatmul.mubr.f32.gmra.mrb[2].mxu1 %v944_v32  ;;  %v1442_v32 = vld [vmem:[#allocation5 + $0x1f8] sm:$0xff] }
 0x233   : > { %v950_v39 = vpop.f32.mrb[4].mxu0  ;;  %7256 = vmatpush1.bf16.msra.mxu1 %v7255_v34  ;;  %v1672_v34 = vld [vmem:[#allocation5 + $0x270] sm:$0xff]  ;;  %v7273_v35 = vpack.c.bf16 %v1442_v32, %v1441_v29 }
 0x234   : > { %v952_v42 = vpop.f32.mrb[5].mxu0  ;;  %7257 = vmatprep.subr.bf16.mxu1 %v8593_v1  ;;  %v7313_v38 = vpack.c.bf16 %v1673_v36, %v1672_v34 }
 0x235   : > { %5832 = vmatprep.mubr.msk.f32.mxu1 %vm859_vm1, %v952_v42  ;;  %v1674_v42 = vld [vmem:[#allocation5 + $0x280] sm:$0xff] }
 0x236   : > { %1303 = vmatmul.mubr.f32.gmra.mrb[4].mxu1 %v950_v39  ;;  %v1443_v39 = vld [vmem:[#allocation5 + $0x200] sm:$0xff] }
 0x237   : > { %v956_v43 = vpop.f32.mrb[6].mxu0  ;;  %7259 = vmatpush1.bf16.msra.mxu1 %v7258_v40  ;;  %v1444_v40 = vld [vmem:[#allocation5 + $0x208] sm:$0xff] }
 0x238   : > { %v958_v45 = vpop.f32.mrb[7].mxu0  ;;  %7260 = vmatprep.subr.bf16.mxu1 %v8593_v1 }
 0x239   : > { %5833 = vmatprep.mubr.msk.f32.mxu1 %vm859_vm1, %v958_v45  ;;  %v1675_v45 = vld [vmem:[#allocation5 + $0x288] sm:$0xff] }
 0x23a   : > { %1308 = vmatmul.mubr.f32.gmra.mrb[6].mxu1 %v956_v43  ;;  %v7276_v43 = vpack.c.bf16 %v1444_v40, %v1443_v39 }
 0x23b   : > { %v1071_v46 = vpop.f32.mrb[8].mxu0 }
 0x23c   : > { %v1073_v47 = vpop.f32.mrb[9].mxu0 }
 0x23d   : > { %5826 = vmatprep.mubr.msk.f32.mxu0 %vm859_vm1, %v1073_v47  ;;  %v1445_v47 = vld [vmem:[#allocation5 + $0x210] sm:$0xff] }
 0x23e   : > { %1196 = vmatmul.mubr.f32.vlgmr.msra.gmra.mrb[16].mxu0 %v1071_v46  ;;  %v7316_v46 = vpack.c.bf16 %v1675_v45, %v1674_v42 }
 0x23f   : > { %v1077_v49 = vpop.f32.mrb[10].mxu0  ;;  %7238 = vmatpush1.bf16.msra.mxu0 %v9097_v11 }
 0x240   : > { %v1079_v51 = vpop.f32.mrb[11].mxu0  ;;  %7240 = vmatprep.subr.bf16.mxu0 %v9099_v12 }
 0x241   : > { %5827 = vmatprep.mubr.msk.f32.mxu0 %vm859_vm1, %v1079_v51  ;;  %v1676_v51 = vld [vmem:[#allocation5 + $0x290] sm:$0xff] }
 0x242   : > { %1201 = vmatmul.mubr.f32.gmra.mrb[18].mxu0 %v1077_v49  ;;  %v1446_v49 = vld [vmem:[#allocation5 + $0x218] sm:$0xff] }
 0x243   : > { %v1083_v52 = vpop.f32.mrb[12].mxu0  ;;  %7242 = vmatpush1.bf16.msra.mxu0 %v9107_v17 }
 0x244   : > { %v1085_v53 = vpop.f32.mrb[13].mxu0  ;;  %7244 = vmatprep.subr.bf16.mxu0 %v9112_v20 }
 0x245   : > { %5828 = vmatprep.mubr.msk.f32.mxu0 %vm859_vm1, %v1085_v53  ;;  %v1677_v53 = vld [vmem:[#allocation5 + $0x298] sm:$0xff] }
 0x246   : > { %1206 = vmatmul.mubr.f32.gmra.mrb[20].mxu0 %v1083_v52  ;;  %v7279_v52 = vpack.c.bf16 %v1446_v49, %v1445_v47  ;;  %v7319_v55 = vpack.c.bf16 %v1677_v53, %v1676_v51 }
 0x247   : > { %v1089_v56 = vpop.f32.mrb[14].mxu0  ;;  %7246 = vmatpush1.bf16.msra.mxu0 %v9121_v30 }
 0x248   : > { %v1091_v57 = vpop.f32.mrb[15].mxu0  ;;  %7248 = vmatprep.subr.bf16.mxu0 %v9128_v33 }
 0x249   : > { %5829 = vmatprep.mubr.msk.f32.mxu0 %vm859_vm1, %v1091_v57  ;;  %v1448_v57 = vld [vmem:[#allocation5 + $0x228] sm:$0xff] }
 0x24a   : > { %1211 = vmatmul.mubr.f32.gmra.mrb[22].mxu0 %v1089_v56  ;;  %v1447_v56 = vld [vmem:[#allocation5 + $0x220] sm:$0xff] }
 0x24b   : > { %7250 = vmatpush1.bf16.msra.mxu0 %v9137_v41  ;;  %1401 = vmatprep.mubr.f32.mxu0 %v8592_v0  ;;  %v7282_v60 = vpack.c.bf16 %v1448_v57, %v1447_v56 }
 0x24c   : > { %7288 = vmatprep.subr.bf16.mxu0 %v9089_v6  ;;  %v1316_v6 = vadd.s32 1, %v9153_v50 }
 0x24e   : > { %5834 = vmatmul.mubr.msk.f32.vlgmr.msra.gmra.mrb[24].mxu0 %vm859_vm1, %v9251_v59  ;;  %vm1320_vm12 = vcmp.eq.s32.totalorder %v9124_v31, %v1316_v6  ;;  %v1679_v6 = vld [vmem:[#allocation5 + $0x2a8] sm:$0xff] }
 0x24f   : > { %7290 = vmatpush1.bf16.msra.mxu0 %v9097_v11  ;;  %1407 = vmatprep.mubr.f32.mxu0 %v8592_v0  ;;  %v1323_v11 = vsel %vm1319_vm11, 1.0, %v8592_v0 }
 0x250   : > { %7292 = vmatprep.subr.bf16.mxu0 %v9099_v12  ;;  %v1324_v12 = vsel %vm1320_vm12, 1.0, %v8592_v0 }
 0x252   : > { %5835 = vmatmul.mubr.msk.f32.gmra.mrb[26].mxu0 %vm859_vm1, %v9261_v61 }
 0x253   : > { %7294 = vmatpush1.bf16.msra.mxu0 %v9107_v17  ;;  %1413 = vmatprep.mubr.f32.mxu0 %v8592_v0  ;;  %v1553_v17 = vadd.s32 2, %v9133_v37  ;;  %v1562_v37 = vsel %vm1558_vm15, 1.0, %v8592_v0 }
 0x254   : > { %7296 = vmatprep.subr.bf16.mxu0 %v9112_v20  ;;  %v9285_v20 = vsel %vm1556_vm13, 1.0, %v8592_v0 }
 0x255   : > { %vm1557_vm14 = vcmp.eq.s32.totalorder %v9124_v31, %v1553_v17  ;;  %v1680_v17 = vld [vmem:[#allocation5 + $0x2b0] sm:$0xff] }
 0x256   : > { %5836 = vmatmul.mubr.msk.f32.gmra.mrb[28].mxu0 %vm859_vm1, %v1323_v11  ;;  %v7322_v11 = vpack.c.bf16 %v1679_v6, %v1678_v58 }
 0x257   : > { %7298 = vmatpush1.bf16.msra.mxu0 %v9121_v30  ;;  %1419 = vmatprep.mubr.f32.mxu0 %v8592_v0  ;;  %v9294_v30 = vsel %vm1557_vm14, 1.0, %v8592_v0 }
 0x258   : > { %7300 = vmatprep.subr.bf16.mxu0 %v9128_v33  ;;  %v1555_v33 = vadd.s32 2, %v9153_v50  ;;  %v7261_v50 = vpack.c.bf16 %v1434_v63, %v1433_v44  ;;  %v1683_v44 = vld [vmem:[#allocation5 + $0x2c8] sm:$0xff] }
 0x25a   : > { %5837 = vmatmul.mubr.msk.f32.gmra.mrb[30].mxu0 %vm859_vm1, %v1324_v12  ;;  %vm1559_vm0 = vcmp.eq.s32.totalorder %v9124_v31, %v1555_v33  ;;  %7262 = vmatpush1.bf16.msra.mxu1 %v7261_v50  ;;  %v7304_v31 = vpack.c.bf16 %v1667_v8, %v1666_v5  ;;  %v1450_v12 = vld [vmem:[#allocation5 + $0x238] sm:$0xff]  ;;  %v1684_v50 = vld [vmem:[#allocation5 + $0x2d0] sm:$0xff]  ;;  %v1686_v5 = vld [vmem:[#allocation5 + $0x2e0] sm:$0xff] }
 0x25b   : > { %7302 = vmatpush1.bf16.msra.mxu0 %v9137_v41  ;;  %1640 = vmatprep.mubr.f32.mxu0 %v8592_v0  ;;  %v1563_v41 = vsel %vm1559_vm0, 1.0, %v8592_v0  ;;  %v7285_v22 = vpack.c.bf16 %v1450_v12, %v1449_v62  ;;  %v1681_v33 = vld [vmem:[#allocation5 + $0x2b8] sm:$0xff]  ;;  %v7331_v4 = vpack.c.bf16 %v1685_v3, %v1684_v50 }
 0x25c   : > { %7303 = vmatprep.subr.bf16.mxu0 %v8593_v1  ;;  %7263 = vmatprep.subr.bf16.mxu1 %v8593_v1 }
 0x25e   : > { %5842 = vmatmul.mubr.msk.f32.vlgmr.msra.gmra.mrb[32].mxu0 %vm859_vm1, %v9285_v20  ;;  %7265 = vmatpush1.bf16.msra.mxu1 %v7264_v7  ;;  %v1687_v7 = vld [vmem:[#allocation5 + $0x2e8] sm:$0xff] }
 0x25f   : > { %1646 = vmatprep.mubr.f32.mxu0 %v8592_v0  ;;  %7305 = vmatpush1.bf16.msra.mxu0 %v7304_v31  ;;  %v7334_v8 = vpack.c.bf16 %v1687_v7, %v1686_v5  ;;  %v1688_v31 = vld [vmem:[#allocation5 + $0x2f0] sm:$0xff] }
 0x260   : > { %7266 = vmatprep.subr.bf16.mxu1 %v8593_v1  ;;  %7306 = vmatprep.subr.bf16.mxu0 %v8593_v1  ;;  %v7337_v14 = vpack.c.bf16 %v1689_v13, %v1688_v31 }
 0x262   : > { %5843 = vmatmul.mubr.msk.f32.gmra.mrb[34].mxu0 %vm859_vm1, %v9294_v30  ;;  %7268 = vmatpush1.bf16.msra.mxu1 %v7267_v16 }
 0x263   : > { %1652 = vmatprep.mubr.f32.mxu0 %v8592_v0  ;;  %7308 = vmatpush1.bf16.msra.mxu0 %v7307_v19 }
 0x264   : > { %7269 = vmatprep.subr.bf16.mxu1 %v8593_v1  ;;  %7309 = vmatprep.subr.bf16.mxu0 %v8593_v1 }
 0x266   : > { %5844 = vmatmul.mubr.msk.f32.gmra.mrb[36].mxu0 %vm859_vm1, %v1562_v37  ;;  %7271 = vmatpush1.bf16.msra.mxu1 %v7270_v26  ;;  %v7325_v37 = vpack.c.bf16 %v1681_v33, %v1680_v17 }
 0x267   : > { %1658 = vmatprep.mubr.f32.mxu0 %v8592_v0  ;;  %7311 = vmatpush1.bf16.msra.mxu0 %v7310_v28 }
 0x268   : > { %7272 = vmatprep.subr.bf16.mxu1 %v8593_v1  ;;  %7312 = vmatprep.subr.bf16.mxu0 %v8593_v1 }
 0x26a   : > { %5845 = vmatmul.mubr.msk.f32.gmra.mrb[38].mxu0 %vm859_vm1, %v1563_v41  ;;  %7274 = vmatpush1.bf16.msra.mxu1 %v7273_v35  ;;  %v1682_v41 = vld [vmem:[#allocation5 + $0x2c0] sm:$0xff] }
 0x26b   : > { %7314 = vmatpush1.bf16.msra.mxu0 %v7313_v38  ;;  %7275 = vmatprep.subr.bf16.mxu1 %v8593_v1  ;;  %v7328_v63 = vpack.c.bf16 %v1683_v44, %v1682_v41 }
 0x26c   : > { %7315 = vmatprep.subr.bf16.mxu0 %v8593_v1 }
 0x26e   : > { %7277 = vmatpush1.bf16.msra.mxu1 %v7276_v43 }
 0x26f   : > { %7317 = vmatpush1.bf16.msra.mxu0 %v7316_v46  ;;  %7278 = vmatprep.subr.bf16.mxu1 %v8593_v1 }
 0x270   : > { %7318 = vmatprep.subr.bf16.mxu0 %v8593_v1 }
 0x272   : > { %7280 = vmatpush1.bf16.msra.mxu1 %v7279_v52 }
 0x273   : > { %7320 = vmatpush1.bf16.msra.mxu0 %v7319_v55  ;;  %7281 = vmatprep.subr.bf16.mxu1 %v8593_v1 }
 0x274   : > { %7321 = vmatprep.subr.bf16.mxu0 %v8593_v1 }
 0x276   : > { %7283 = vmatpush1.bf16.msra.mxu1 %v7282_v60 }
 0x277   : > { %7323 = vmatpush1.bf16.msra.mxu0 %v7322_v11  ;;  %7284 = vmatprep.subr.bf16.mxu1 %v8593_v1 }
 0x278   : > { %7324 = vmatprep.subr.bf16.mxu0 %v8593_v1 }
 0x27a   : > { %7286 = vmatpush1.bf16.msra.mxu1 %v7285_v22 }
 0x27b   : > { %7326 = vmatpush1.bf16.msra.mxu0 %v7325_v37 }
 0x27c   : > { %7327 = vmatprep.subr.bf16.mxu0 %v8593_v1 }
 0x27f   : > { %7329 = vmatpush1.bf16.msra.mxu0 %v7328_v63 }
 0x280   : > { %7330 = vmatprep.subr.bf16.mxu0 %v8593_v1 }
 0x283   : > { %7332 = vmatpush1.bf16.msra.mxu0 %v7331_v4 }
 0x284   : > { %7333 = vmatprep.subr.bf16.mxu0 %v8593_v1 }
 0x287   : > { %7335 = vmatpush1.bf16.msra.mxu0 %v7334_v8 }
 0x288   : > { %7336 = vmatprep.subr.bf16.mxu0 %v8593_v1 }
 0x28b   : > { %7338 = vmatpush1.bf16.msra.mxu0 %v7337_v14  ;;  %v5850_v14 = vld [vmem:[%s9813_s0] ss:$0 sm:$0xff]  ;;  %s9817_s0 = sld [smem:[#allocation39_spill]] }
 0x301   : > { %v1294_v15 = vpop.f32.mrb[0].mxu1 }
 0x302   : > { %v1296_v16 = vpop.f32.mrb[1].mxu1 }
 0x305   : > { %v1299_v18 = vpop.f32.mrb[2].mxu1 }
 0x306   : > { %v1301_v19 = vpop.f32.mrb[3].mxu1 }
 0x309   : > { %v1304_v23 = vpop.f32.mrb[4].mxu1 }
 0x30a   : > { %v1306_v24 = vpop.f32.mrb[5].mxu1 }
 0x30d   : > { %v1309_v25 = vpop.f32.mrb[6].mxu1 }
 0x30e   : > { %v1311_v26 = vpop.f32.mrb[7].mxu1 }
 0x311   : > { %v1197_v27 = vpop.f32.mrb[16].mxu0 }
 0x312   : > { %v1295_v28 = vadd.f32 %v1294_v15, %v1197_v27  ;;  %v1199_v29 = vpop.f32.mrb[17].mxu0 }
 0x315   : > { %v1202_v32 = vpop.f32.mrb[18].mxu0 }
 0x316   : > { %v1300_v34 = vadd.f32 %v1299_v18, %v1202_v32  ;;  %v1204_v35 = vpop.f32.mrb[19].mxu0 }
 0x319   : > { %v1207_v36 = vpop.f32.mrb[20].mxu0 }
 0x31a   : > { %v1305_v38 = vadd.f32 %v1304_v23, %v1207_v36  ;;  %v1209_v39 = vpop.f32.mrb[21].mxu0 }
 0x31d   : > { %v1212_v40 = vpop.f32.mrb[22].mxu0 }
 0x31e   : > { %v1310_v42 = vadd.f32 %v1309_v25, %v1212_v40  ;;  %v1214_v43 = vpop.f32.mrb[23].mxu0 }
 0x31f   : > { %v1982_v43 = vld [vmem:[#allocation7 + $0x80] sm:$0xff] }
 0x321   : > { %v1403_v45 = vpop.f32.mrb[24].mxu0 }
 0x322   : > { %v1405_v46 = vpop.f32.mrb[25].mxu0 }
 0x323   : > { %5838 = vmatprep.mubr.msk.f32.mxu1 %vm859_vm1, %v1405_v46 }
 0x324   : > { %1528 = vmatmul.mubr.f32.vlgmr.msra.gmra.mrb[8].mxu1 %v1403_v45  ;;  %v1983_v45 = vld [vmem:[#allocation7 + $0x88] sm:$0xff] }
 0x325   : > { %v1409_v47 = vpop.f32.mrb[26].mxu0  ;;  %v7355_v46 = vpack.c.bf16 %v1983_v45, %v1982_v43  ;;  %v2228_v43 = vld [vmem:[#allocation7 + $0x100] sm:$0xff]  ;;  %v2229_v45 = vld [vmem:[#allocation7 + $0x108] sm:$0xff] }
 0x326   : > { %v1411_v49 = vpop.f32.mrb[27].mxu0 }
 0x327   : > { %5839 = vmatprep.mubr.msk.f32.mxu1 %vm859_vm1, %v1411_v49  ;;  %v1985_v49 = vld [vmem:[#allocation7 + $0x98] sm:$0xff] }
 0x328   : > { %1533 = vmatmul.mubr.f32.gmra.mrb[10].mxu1 %v1409_v47  ;;  %v1984_v47 = vld [vmem:[#allocation7 + $0x90] sm:$0xff] }
 0x329   : > { %v1415_v51 = vpop.f32.mrb[28].mxu0 }
 0x32a   : > { %v1417_v52 = vpop.f32.mrb[29].mxu0 }
 0x32b   : > { %5840 = vmatprep.mubr.msk.f32.mxu1 %vm859_vm1, %v1417_v52 }
 0x32c   : > { %1538 = vmatmul.mubr.f32.gmra.mrb[12].mxu1 %v1415_v51  ;;  %v1987_v51 = vld [vmem:[#allocation7 + $0xa8] sm:$0xff] }
 0x32d   : > { %v1421_v53 = vpop.f32.mrb[30].mxu0 }
 0x32e   : > { %v1423_v55 = vpop.f32.mrb[31].mxu0 }
 0x32f   : > { %5841 = vmatprep.mubr.msk.f32.mxu1 %vm859_vm1, %v1423_v55  ;;  %v1989_v55 = vld [vmem:[#allocation7 + $0xb8] sm:$0xff] }
 0x330   : > { %1543 = vmatmul.mubr.f32.gmra.mrb[14].mxu1 %v1421_v53  ;;  %v1988_v53 = vld [vmem:[#allocation7 + $0xb0] sm:$0xff] }
 0x331   : > { %v1642_v56 = vpop.f32.mrb[32].mxu0  ;;  %6307 = vmatprep.mubr.msk.f32.mxu1 %vm1806_vm2, %v9148_v48 }
 0x332   : > { %v1644_v57 = vpop.f32.mrb[33].mxu0 }
 0x333   : > { %5846 = vmatprep.mubr.msk.f32.mxu0 %vm859_vm1, %v1644_v57  ;;  %v1990_v57 = vld [vmem:[#allocation7 + $0xc0] sm:$0xff] }
 0x334   : > { %1767 = vmatmul.mubr.f32.vlgmr.msra.gmra.mrb[40].mxu0 %v1642_v56  ;;  %v7367_v56 = vpack.c.bf16 %v1989_v55, %v1988_v53  ;;  %v2234_v53 = vld [vmem:[#allocation7 + $0x130] sm:$0xff]  ;;  %v2235_v55 = vld [vmem:[#allocation7 + $0x138] sm:$0xff] }
 0x335   : > { %v1648_v58 = vpop.f32.mrb[34].mxu0 }
 0x336   : > { %v1650_v60 = vpop.f32.mrb[35].mxu0 }
 0x337   : > { %5847 = vmatprep.mubr.msk.f32.mxu0 %vm859_vm1, %v1650_v60 }
 0x338   : > { %1772 = vmatmul.mubr.f32.gmra.mrb[42].mxu0 %v1648_v58  ;;  %v1991_v58 = vld [vmem:[#allocation7 + $0xc8] sm:$0xff] }
 0x339   : > { %v1654_v6 = vpop.f32.mrb[36].mxu0  ;;  %v7371_v60 = vpack.c.bf16 %v1991_v58, %v1990_v57  ;;  %v2236_v57 = vld [vmem:[#allocation7 + $0x140] sm:$0xff]  ;;  %v2237_v58 = vld [vmem:[#allocation7 + $0x148] sm:$0xff] }
 0x33a   : > { %v1656_v11 = vpop.f32.mrb[37].mxu0 }
 0x33b   : > { %5848 = vmatprep.mubr.msk.f32.mxu0 %vm859_vm1, %v1656_v11  ;;  %v1993_v11 = vld [vmem:[#allocation7 + $0xd8] sm:$0xff] }
 0x33c   : > { %1777 = vmatmul.mubr.f32.gmra.mrb[44].mxu0 %v1654_v6  ;;  %v1992_v6 = vld [vmem:[#allocation7 + $0xd0] sm:$0xff] }
 0x33d   : > { %v1660_v62 = vpop.f32.mrb[38].mxu0 }
 0x33e   : > { %v1662_v12 = vpop.f32.mrb[39].mxu0 }
 0x33f   : > { %5849 = vmatprep.mubr.msk.f32.mxu0 %vm859_vm1, %v1662_v12  ;;  %vm8594_vm1 = vmmov 0  }
 0x340   : > { %1782 = vmatmul.mubr.f32.gmra.mrb[46].mxu0 %v1660_v62  ;;  %v1995_v62 = vld [vmem:[#allocation7 + $0xe8] sm:$0xff] }
 0x341   : > { %6399 = vmatprep.mubr.msk.f32.mxu0 %vm1806_vm2, %v9251_v59 }
 0x3f7   : > { %v1529_v17 = vpop.f32.mrb[8].mxu1 }
 0x3f8   : > { %v1548_v22 = vadd.f32 %v1529_v17, %v1295_v28  ;;  %v1531_v33 = vpop.f32.mrb[9].mxu1  ;;  %v1996_v17 = vld [vmem:[#allocation7 + $0xf0] sm:$0xff] }
 0x3fb   : > { %v1534_v37 = vpop.f32.mrb[10].mxu1 }
 0x3fc   : > { %v1549_v41 = vadd.f32 %v1534_v37, %v1300_v34  ;;  %v1536_v44 = vpop.f32.mrb[11].mxu1  ;;  %v1886_v37 = vld [vmem:[#allocation7] sm:$0xff] }
 0x3ff   : > { %v1539_v63 = vpop.f32.mrb[12].mxu1 }
 0x400   : > { %v1550_v50 = vadd.f32 %v1539_v63, %v1305_v38  ;;  %v1541_v3 = vpop.f32.mrb[13].mxu1 }
 0x403   : > { %v1544_v4 = vpop.f32.mrb[14].mxu1 }
 0x404   : > { %v1551_v5 = vadd.f32 %v1544_v4, %v1310_v42  ;;  %v1546_v7 = vpop.f32.mrb[15].mxu1 }
 0x405   : > { %v1889_v7 = vld [vmem:[#allocation7 + $0x18] sm:$0xff] }
 0x407   : > { %v1768_v8 = vpop.f32.mrb[40].mxu0 }
 0x408   : > { %v1787_v31 = vadd.f32 %v1768_v8, %v1548_v22  ;;  %v1770_v13 = vpop.f32.mrb[41].mxu0  ;;  %v1997_v22 = vld [vmem:[#allocation7 + $0xf8] sm:$0xff] }
 0x409   : > { %v7383_v33 = vpack.c.bf16 %v1997_v22, %v1996_v17  ;;  %v2242_v17 = vld [vmem:[#allocation7 + $0x170] sm:$0xff]  ;;  %v2243_v22 = vld [vmem:[#allocation7 + $0x178] sm:$0xff] }
 0x40a   : > { %v1798_v16 = vadd.f32 %v5850_v14, %v1787_v31 }
 0x40b   : > { %v1773_v15 = vpop.f32.mrb[42].mxu0 }
 0x40c   : > { %v1788_v18 = vadd.f32 %v1773_v15, %v1549_v41  ;;  %v1775_v19 = vpop.f32.mrb[43].mxu0  ;;  %v1802_v25 = vmax.f32 %v1798_v16, 0.0  ;;  %v1887_v41 = vld [vmem:[#allocation7 + $0x8] sm:$0xff]  ;;  %v1890_v16 = vld [vmem:[#allocation7 + $0x20] sm:$0xff] }
 0x40d   : > { %v7387_v44 = vpack.c.bf16 %v1887_v41, %v1886_v37  ;;  %v2401_v37 = vld [vmem:[#allocation7 + $0x180] sm:$0xff]  ;;  %v2402_v41 = vld [vmem:[#allocation7 + $0x188] sm:$0xff] }
 0x40e   : > { %v1799_v23 = vadd.f32 %v5850_v14, %v1788_v18  ;;  %v1891_v18 = vld [vmem:[#allocation7 + $0x28] sm:$0xff] }
 0x40f   : > { %v1778_v24 = vpop.f32.mrb[44].mxu0  ;;  %v7395_v19 = vpack.c.bf16 %v1891_v18, %v1890_v16  ;;  %v2409_v18 = vld [vmem:[#allocation7 + $0x1c0] sm:$0xff] }
 0x410   : > { %v1803_v26 = vmax.f32 %v1799_v23, 0.0  ;;  %v1789_v27 = vadd.f32 %v1778_v24, %v1550_v50  ;;  %v1780_v28 = vpop.f32.mrb[45].mxu0  ;;  %v1892_v23 = vld [vmem:[#allocation7 + $0x30] sm:$0xff]  ;;  %v1893_v24 = vld [vmem:[#allocation7 + $0x38] sm:$0xff] }
 0x412   : > { %v7339_v29 = vpack.c.bf16 %v1803_v26, %v1802_v25  ;;  %v1800_v34 = vadd.f32 %v5850_v14, %v1789_v27  ;;  %v7399_v25 = vpack.c.bf16 %v1893_v24, %v1892_v23  ;;  %v1894_v26 = vld [vmem:[#allocation7 + $0x40] sm:$0xff]  ;;  %v1895_v27 = vld [vmem:[#allocation7 + $0x48] sm:$0xff]  ;;  %v2411_v24 = vld [vmem:[#allocation7 + $0x1d0] sm:$0xff] }
 0x413   : > { %v1783_v32 = vpop.f32.mrb[46].mxu0  ;;  %v7403_v28 = vpack.c.bf16 %v1895_v27, %v1894_v26  ;;  %v2413_v26 = vld [vmem:[#allocation7 + $0x1e0] sm:$0xff]  ;;  %v2414_v27 = vld [vmem:[#allocation7 + $0x1e8] sm:$0xff] }
 0x414   : > { %v1790_v35 = vadd.f32 %v1783_v32, %v1551_v5  ;;  %v1785_v36 = vpop.f32.mrb[47].mxu0  ;;  %7340 = vmatprep.subr.bf16.mxu1 %v7339_v29  ;;  %7420 = vmatprep.subr.bf16.mxu0 %v7339_v29  ;;  %v1804_v39 = vmax.f32 %v1800_v34, 0.0  ;;  %v1888_v5 = vld [vmem:[#allocation7 + $0x10] sm:$0xff]  ;;  %v1897_v32 = vld [vmem:[#allocation7 + $0x58] sm:$0xff] }
 0x415   : > { %7342 = vmatpush3.bf16.msra.mxu1 %v7339_v29  ;;  %7422 = vmatpush3.bf16.msra.mxu0 %v7339_v29  ;;  %v1899_v36 = vld [vmem:[#allocation7 + $0x68] sm:$0xff] }
 0x416   : > { %v1801_v38 = vadd.f32 %v5850_v14, %v1790_v35  ;;  %v7391_v14 = vpack.c.bf16 %v1889_v7, %v1888_v5  ;;  %v1898_v35 = vld [vmem:[#allocation7 + $0x60] sm:$0xff]  ;;  %v2406_v7 = vld [vmem:[#allocation7 + $0x1a8] sm:$0xff] }
 0x417   : > { %v2405_v5 = vld [vmem:[#allocation7 + $0x1a0] sm:$0xff] }
 0x418   : > { %v1805_v40 = vmax.f32 %v1801_v38, 0.0  ;;  %v7411_v38 = vpack.c.bf16 %v1899_v36, %v1898_v35 }
 0x41a   : > { %v7343_v42 = vpack.c.bf16 %v1805_v40, %v1804_v39  ;;  %v1900_v39 = vld [vmem:[#allocation7 + $0x70] sm:$0xff]  ;;  %v1901_v40 = vld [vmem:[#allocation7 + $0x78] sm:$0xff] }
 0x41c   : > { %7344 = vmatprep.subr.bf16.mxu1 %v7343_v42  ;;  %7424 = vmatprep.subr.bf16.mxu0 %v7343_v42 }
 0x41d   : > { %7346 = vmatpush3.bf16.msra.mxu1 %v7343_v42  ;;  %7426 = vmatpush3.bf16.msra.mxu0 %v7343_v42 }
 0x41e   : > { %7348 = vmatprep.subr.bf16.mxu1 %v7339_v29  ;;  %7460 = vmatprep.subr.bf16.mxu0 %v7339_v29 }
 0x420   : > { %6308 = vmatmul.mubr.msk.f32.vlgmr.msra.gmra.mrb[16].mxu1 %vm1806_vm2, %v9161_v54  ;;  %6400 = vmatmul.mubr.msk.f32.vlgmr.msra.gmra.mrb[48].mxu0 %vm1806_vm2, %v9261_v61  ;;  %v7359_v54 = vpack.c.bf16 %v1985_v49, %v1984_v47  ;;  %v1986_v61 = vld [vmem:[#allocation7 + $0xa0] sm:$0xff]  ;;  %v2230_v47 = vld [vmem:[#allocation7 + $0x110] sm:$0xff]  ;;  %v2231_v49 = vld [vmem:[#allocation7 + $0x118] sm:$0xff] }
 0x421   : > { %7350 = vmatpush3.bf16.msra.mxu1 %v7339_v29  ;;  %7462 = vmatpush3.bf16.msra.mxu0 %v7339_v29  ;;  %v7363_v52 = vpack.c.bf16 %v1987_v51, %v1986_v61  ;;  %v1896_v29 = vld [vmem:[#allocation7 + $0x50] sm:$0xff]  ;;  %v2232_v61 = vld [vmem:[#allocation7 + $0x120] sm:$0xff]  ;;  %v2233_v51 = vld [vmem:[#allocation7 + $0x128] sm:$0xff] }
 0x422   : > { %7352 = vmatprep.subr.bf16.mxu1 %v7343_v42  ;;  %7464 = vmatprep.subr.bf16.mxu0 %v7343_v42  ;;  %v7407_v34 = vpack.c.bf16 %v1897_v32, %v1896_v29  ;;  %v2416_v29 = vld [vmem:[#allocation7 + $0x1f8] sm:$0xff] }
 0x423   : > { %6318 = vmatprep.mubr.msk.f32.mxu1 %vm1806_vm2, %v9187_v9  ;;  %6445 = vmatprep.mubr.msk.f32.mxu0 %vm1806_vm2, %v9285_v20 }
 0x425   : > { %7354 = vmatpush3.bf16.msra.mxu1 %v7343_v42  ;;  %7466 = vmatpush3.bf16.msra.mxu0 %v7343_v42  ;;  %v7415_v42 = vpack.c.bf16 %v1901_v40, %v1900_v39 }
 0x426   : > { %7356 = vmatprep.subr.bf16.mxu1 %v7355_v46  ;;  %7499 = vmatprep.subr.bf16.mxu0 %v8593_v1 }
 0x428   : > { %6319 = vmatmul.mubr.msk.f32.vlgmr.msra.gmra.mrb[18].mxu1 %vm1806_vm2, %v9197_v21  ;;  %6446 = vmatmul.mubr.msk.f32.vlgmr.msra.gmra.mrb[50].mxu0 %vm1806_vm2, %v9294_v30  ;;  %v7375_v21 = vpack.c.bf16 %v1993_v11, %v1992_v6  ;;  %v1994_v30 = vld [vmem:[#allocation7 + $0xe0] sm:$0xff]  ;;  %v2238_v6 = vld [vmem:[#allocation7 + $0x150] sm:$0xff]  ;;  %v2239_v11 = vld [vmem:[#allocation7 + $0x158] sm:$0xff] }
 0x429   : > { %7358 = vmatpush3.bf16.msra.mxu1 %v7355_v46  ;;  %v7379_v12 = vpack.c.bf16 %v1995_v62, %v1994_v30  ;;  %v7427_v46 = vpack.c.bf16 %v2229_v45, %v2228_v43  ;;  %v2240_v30 = vld [vmem:[#allocation7 + $0x160] sm:$0xff]  ;;  %v2241_v62 = vld [vmem:[#allocation7 + $0x168] sm:$0xff]  ;;  %6487 = vmatprep.mubr.msk.f32.mxu0 %vm8594_vm1, %v8592_v0 }
 0x42a   : > { %7360 = vmatprep.subr.bf16.mxu1 %v7359_v54  ;;  %v2668_v45 = vld [vmem:[#allocation8 + $0x88] sm:$0xff] }
 0x42d   : > { %7362 = vmatpush3.bf16.msra.mxu1 %v7359_v54  ;;  %v7431_v54 = vpack.c.bf16 %v2231_v49, %v2230_v47  ;;  %v2669_v47 = vld [vmem:[#allocation8 + $0x90] sm:$0xff]  ;;  %v2670_v49 = vld [vmem:[#allocation8 + $0x98] sm:$0xff] }
 0x42e   : > { %7364 = vmatprep.subr.bf16.mxu1 %v7363_v52 }
 0x431   : > { %7366 = vmatpush3.bf16.msra.mxu1 %v7363_v52  ;;  %v7435_v52 = vpack.c.bf16 %v2233_v51, %v2232_v61  ;;  %v2671_v61 = vld [vmem:[#allocation8 + $0xa0] sm:$0xff]  ;;  %v2672_v51 = vld [vmem:[#allocation8 + $0xa8] sm:$0xff] }
 0x432   : > { %7368 = vmatprep.subr.bf16.mxu1 %v7367_v56 }
 0x435   : > { %7370 = vmatpush3.bf16.msra.mxu1 %v7367_v56  ;;  %v7439_v56 = vpack.c.bf16 %v2235_v55, %v2234_v53  ;;  %v2673_v53 = vld [vmem:[#allocation8 + $0xb0] sm:$0xff]  ;;  %v2674_v55 = vld [vmem:[#allocation8 + $0xb8] sm:$0xff] }
 0x436   : > { %7372 = vmatprep.subr.bf16.mxu1 %v7371_v60 }
 0x439   : > { %7374 = vmatpush3.bf16.msra.mxu1 %v7371_v60  ;;  %v7443_v60 = vpack.c.bf16 %v2237_v58, %v2236_v57  ;;  %v2675_v57 = vld [vmem:[#allocation8 + $0xc0] sm:$0xff]  ;;  %v2676_v58 = vld [vmem:[#allocation8 + $0xc8] sm:$0xff] }
 0x43a   : > { %7376 = vmatprep.subr.bf16.mxu1 %v7375_v21 }
 0x43d   : > { %7378 = vmatpush3.bf16.msra.mxu1 %v7375_v21  ;;  %v7447_v21 = vpack.c.bf16 %v2239_v11, %v2238_v6  ;;  %v2677_v6 = vld [vmem:[#allocation8 + $0xd0] sm:$0xff]  ;;  %v2678_v11 = vld [vmem:[#allocation8 + $0xd8] sm:$0xff] }
 0x43e   : > { %7380 = vmatprep.subr.bf16.mxu1 %v7379_v12 }
 0x441   : > { %7382 = vmatpush3.bf16.msra.mxu1 %v7379_v12  ;;  %v7451_v12 = vpack.c.bf16 %v2241_v62, %v2240_v30  ;;  %v2679_v30 = vld [vmem:[#allocation8 + $0xe0] sm:$0xff]  ;;  %v2680_v62 = vld [vmem:[#allocation8 + $0xe8] sm:$0xff] }
 0x442   : > { %7384 = vmatprep.subr.bf16.mxu1 %v7383_v33 }
 0x445   : > { %7386 = vmatpush3.bf16.msra.mxu1 %v7383_v33  ;;  %v7455_v33 = vpack.c.bf16 %v2243_v22, %v2242_v17  ;;  %v2681_v17 = vld [vmem:[#allocation8 + $0xf0] sm:$0xff]  ;;  %v2682_v22 = vld [vmem:[#allocation8 + $0xf8] sm:$0xff] }
 0x446   : > { %7388 = vmatprep.subr.bf16.mxu1 %v7387_v44 }
 0x4f3   : > { %v6309_v63 = vpop.f32.mrb[16].mxu1  ;;  %v9354_v50 = vpop.f32.mrb[48].mxu0 }
 0x4f4   : > { %v1877_v3 = vpop.f32.mrb[17].mxu1  ;;  %v2218_v4 = vpop.f32.mrb[49].mxu0 }
 0x4fb   : > { %v6320_v8 = vpop.f32.mrb[18].mxu1  ;;  %v9356_v31 = vpop.f32.mrb[50].mxu0 }
 0x4fc   : > { %v1972_v13 = vpop.f32.mrb[19].mxu1  ;;  %v9358_v15 = vpop.f32.mrb[51].mxu0 }
 0x4fd   : > { %6353 = vmatprep.mubr.f32.mxu1 %v1972_v13  ;;  %v2407_v13 = vld [vmem:[#allocation7 + $0x1b0] sm:$0xff] }
 0x4fe   : > { %6354 = vmatmul.mubr.f32.vlgmr.msra.gmra.mrb[20].mxu1 %v6320_v8  ;;  %v7475_v8 = vpack.c.bf16 %v2406_v7, %v2405_v5  ;;  %v2581_v5 = vld [vmem:[#allocation8 + $0x18] sm:$0xff] }
 0x4ff   : > { %7390 = vmatpush3.bf16.msra.mxu1 %v7387_v44  ;;  %6388 = vmatprep.mubr.f32.mxu1 %v1877_v3  ;;  %v7467_v44 = vpack.c.bf16 %v2402_v41, %v2401_v37  ;;  %v2404_v3 = vld [vmem:[#allocation7 + $0x198] sm:$0xff]  ;;  %v2578_v37 = vld [vmem:[#allocation8] sm:$0xff]  ;;  %v2579_v41 = vld [vmem:[#allocation8 + $0x8] sm:$0xff] }
 0x500   : > { %7392 = vmatprep.subr.bf16.mxu1 %v7391_v14 }
 0x503   : > { %7394 = vmatpush3.bf16.msra.mxu1 %v7391_v14  ;;  %v2408_v14 = vld [vmem:[#allocation7 + $0x1b8] sm:$0xff] }
 0x504   : > { %7396 = vmatprep.subr.bf16.mxu1 %v7395_v19  ;;  %v7479_v16 = vpack.c.bf16 %v2408_v14, %v2407_v13  ;;  %v2582_v14 = vld [vmem:[#allocation8 + $0x20] sm:$0xff] }
 0x507   : > { %7398 = vmatpush3.bf16.msra.mxu1 %v7395_v19  ;;  %v2410_v19 = vld [vmem:[#allocation7 + $0x1c8] sm:$0xff] }
 0x508   : > { %7400 = vmatprep.subr.bf16.mxu1 %v7399_v25  ;;  %v7483_v23 = vpack.c.bf16 %v2410_v19, %v2409_v18  ;;  %v2584_v19 = vld [vmem:[#allocation8 + $0x30] sm:$0xff] }
 0x50b   : > { %7402 = vmatpush3.bf16.msra.mxu1 %v7399_v25  ;;  %v2412_v25 = vld [vmem:[#allocation7 + $0x1d8] sm:$0xff] }
 0x50c   : > { %7404 = vmatprep.subr.bf16.mxu1 %v7403_v28 }
 0x50f   : > { %7406 = vmatpush3.bf16.msra.mxu1 %v7403_v28  ;;  %v2415_v28 = vld [vmem:[#allocation7 + $0x1f0] sm:$0xff] }
 0x510   : > { %7408 = vmatprep.subr.bf16.mxu1 %v7407_v34  ;;  %v7495_v32 = vpack.c.bf16 %v2416_v29, %v2415_v28  ;;  %v2590_v29 = vld [vmem:[#allocation8 + $0x60] sm:$0xff] }
 0x513   : > { %7410 = vmatpush3.bf16.msra.mxu1 %v7407_v34  ;;  %v5859_v34 = vld [vmem:[%s9814_s15] ss:$0 sm:$0xff]  ;;  %s9821_s15 = sld [smem:[#allocation41_spill]] }
 0x514   : > { %7412 = vmatprep.subr.bf16.mxu1 %v7411_v38 }
 0x517   : > { %7414 = vmatpush3.bf16.msra.mxu1 %v7411_v38 }
 0x518   : > { %7416 = vmatprep.subr.bf16.mxu1 %v7415_v42 }
 0x51b   : > { %7418 = vmatpush3.bf16.msra.mxu1 %v7415_v42 }
 0x51c   : > { %7428 = vmatprep.subr.bf16.mxu1 %v7427_v46 }
 0x51e   : > { %6389 = vmatmul.mubr.f32.vlgmr.msra.gmra.mrb[20].mxu1 %v6309_v63  ;;  %v2403_v63 = vld [vmem:[#allocation7 + $0x190] sm:$0xff] }
 0x51f   : > { %7430 = vmatpush3.bf16.msra.mxu1 %v7427_v46  ;;  %6434 = vmatprep.mubr.f32.mxu1 %v2218_v4  ;;  %v7471_v4 = vpack.c.bf16 %v2404_v3, %v2403_v63  ;;  %v7530_v3 = vpack.c.bf16 %v2579_v41, %v2578_v37 }
 0x520   : > { %7432 = vmatprep.subr.bf16.mxu1 %v7431_v54 }
 0x523   : > { %7434 = vmatpush3.bf16.msra.mxu1 %v7431_v54  ;;  %v7509_v54 = vpack.c.bf16 %v2670_v49, %v2669_v47  ;;  %v2899_v47 = vld [vmem:[#allocation8 + $0x118] sm:$0xff] }
 0x524   : > { %7436 = vmatprep.subr.bf16.mxu1 %v7435_v52 }
 0x527   : > { %7438 = vmatpush3.bf16.msra.mxu1 %v7435_v52  ;;  %v7512_v52 = vpack.c.bf16 %v2672_v51, %v2671_v61 }
 0x528   : > { %7440 = vmatprep.subr.bf16.mxu1 %v7439_v56 }
 0x52b   : > { %7442 = vmatpush3.bf16.msra.mxu1 %v7439_v56  ;;  %v7515_v56 = vpack.c.bf16 %v2674_v55, %v2673_v53  ;;  %v2901_v53 = vld [vmem:[#allocation8 + $0x128] sm:$0xff]  ;;  %v3060_v55 = vld [vmem:[#allocation8 + $0x1a0] sm:$0xff] }
 0x52c   : > { %7444 = vmatprep.subr.bf16.mxu1 %v7443_v60 }
 0x52f   : > { %7446 = vmatpush3.bf16.msra.mxu1 %v7443_v60  ;;  %v7518_v60 = vpack.c.bf16 %v2676_v58, %v2675_v57 }
 0x530   : > { %7448 = vmatprep.subr.bf16.mxu1 %v7447_v21 }
 0x533   : > { %7450 = vmatpush3.bf16.msra.mxu1 %v7447_v21  ;;  %v7521_v21 = vpack.c.bf16 %v2678_v11, %v2677_v6  ;;  %v2903_v6 = vld [vmem:[#allocation8 + $0x138] sm:$0xff]  ;;  %v3062_v11 = vld [vmem:[#allocation8 + $0x1b0] sm:$0xff] }
 0x534   : > { %7452 = vmatprep.subr.bf16.mxu1 %v7451_v12 }
 0x537   : > { %7454 = vmatpush3.bf16.msra.mxu1 %v7451_v12  ;;  %v7524_v12 = vpack.c.bf16 %v2680_v62, %v2679_v30 }
 0x538   : > { %7456 = vmatprep.subr.bf16.mxu1 %v7455_v33 }
 0x53b   : > { %7458 = vmatpush3.bf16.msra.mxu1 %v7455_v33  ;;  %v7527_v33 = vpack.c.bf16 %v2682_v22, %v2681_v17  ;;  %v2905_v17 = vld [vmem:[#allocation8 + $0x148] sm:$0xff]  ;;  %v3064_v22 = vld [vmem:[#allocation8 + $0x1c0] sm:$0xff] }
 0x53c   : > { %7468 = vmatprep.subr.bf16.mxu1 %v7467_v44 }
 0x53e   : > { %6435 = vmatmul.mubr.f32.vlgmr.msra.gmra.mrb[20].mxu1 %v9354_v50  ;;  %v7487_v50 = vpack.c.bf16 %v2412_v25, %v2411_v24  ;;  %v2586_v25 = vld [vmem:[#allocation8 + $0x40] sm:$0xff] }
 0x53f   : > { %7470 = vmatpush3.bf16.msra.mxu1 %v7467_v44  ;;  %6480 = vmatprep.mubr.f32.mxu1 %v9358_v15  ;;  %v7491_v15 = vpack.c.bf16 %v2414_v27, %v2413_v26  ;;  %v2588_v27 = vld [vmem:[#allocation8 + $0x50] sm:$0xff] }
 0x540   : > { %7472 = vmatprep.subr.bf16.mxu1 %v7471_v4 }
 0x543   : > { %7474 = vmatpush3.bf16.msra.mxu1 %v7471_v4  ;;  %v2580_v4 = vld [vmem:[#allocation8 + $0x10] sm:$0xff] }
 0x544   : > { %7476 = vmatprep.subr.bf16.mxu1 %v7475_v8  ;;  %v7533_v13 = vpack.c.bf16 %v2581_v5, %v2580_v4  ;;  %v3067_v4 = vld [vmem:[#allocation8 + $0x1d8] sm:$0xff] }
 0x547   : > { %7478 = vmatpush3.bf16.msra.mxu1 %v7475_v8 }
 0x548   : > { %7480 = vmatprep.subr.bf16.mxu1 %v7479_v16 }
 0x54b   : > { %7482 = vmatpush3.bf16.msra.mxu1 %v7479_v16  ;;  %v2583_v16 = vld [vmem:[#allocation8 + $0x28] sm:$0xff] }
 0x54c   : > { %7484 = vmatprep.subr.bf16.mxu1 %v7483_v23  ;;  %v7536_v18 = vpack.c.bf16 %v2583_v16, %v2582_v14  ;;  %v3068_v16 = vld [vmem:[#allocation8 + $0x1e0] sm:$0xff] }
 0x54f   : > { %7486 = vmatpush3.bf16.msra.mxu1 %v7483_v23  ;;  %v2585_v23 = vld [vmem:[#allocation8 + $0x38] sm:$0xff] }
 0x550   : > { %7488 = vmatprep.subr.bf16.mxu1 %v7487_v50  ;;  %v7539_v24 = vpack.c.bf16 %v2585_v23, %v2584_v19  ;;  %v2910_v23 = vld [vmem:[#allocation8 + $0x170] sm:$0xff] }
 0x553   : > { %7490 = vmatpush3.bf16.msra.mxu1 %v7487_v50  ;;  %v2587_v50 = vld [vmem:[#allocation8 + $0x48] sm:$0xff] }
 0x554   : > { %7492 = vmatprep.subr.bf16.mxu1 %v7491_v15  ;;  %v7542_v26 = vpack.c.bf16 %v2587_v50, %v2586_v25  ;;  %v3070_v50 = vld [vmem:[#allocation8 + $0x1f0] sm:$0xff] }
 0x557   : > { %7494 = vmatpush3.bf16.msra.mxu1 %v7491_v15  ;;  %v2589_v15 = vld [vmem:[#allocation8 + $0x58] sm:$0xff] }
 0x558   : > { %7496 = vmatprep.subr.bf16.mxu1 %v7495_v32  ;;  %v7545_v28 = vpack.c.bf16 %v2589_v15, %v2588_v27 }
 0x55b   : > { %7498 = vmatpush3.bf16.msra.mxu1 %v7495_v32  ;;  %v2591_v32 = vld [vmem:[#allocation8 + $0x68] sm:$0xff] }
 0x55c   : > { %7580 = vmatprep.subr.bf16.mxu1 %v8593_v1 }
 0x55e   : > { %6481 = vmatmul.mubr.f32.vlgmr.msra.gmra.mrb[20].mxu1 %v9356_v31  ;;  %v2667_v31 = vld [vmem:[#allocation8 + $0x80] sm:$0xff] }
 0x55f   : > { %6613 = vmatprep.mubr.msk.f32.mxu1 %vm8594_vm1, %v8592_v0  ;;  %v7506_v46 = vpack.c.bf16 %v2668_v45, %v2667_v31  ;;  %v3057_v45 = vld [vmem:[#allocation8 + $0x188] sm:$0xff] }
 0x631   : > { %v6482_v35 = vpop.f32.mrb[20].mxu1 }
 0x632   : > { %v2502_v36 = vadd.f32 %v6482_v35, %v5859_v34  ;;  %v2483_v38 = vpop.f32.mrb[21].mxu1  ;;  %v2592_v35 = vld [vmem:[#allocation8 + $0x70] sm:$0xff] }
 0x633   : > { %v2501_v39 = vadd.f32 %v5859_v34, %v2483_v38  ;;  %v7548_v34 = vpack.c.bf16 %v2591_v32, %v2590_v29 }
 0x634   : > { %v2504_v40 = vmax.f32 %v2502_v36, 0.0  ;;  %v2593_v36 = vld [vmem:[#allocation8 + $0x78] sm:$0xff] }
 0x635   : > { %v2503_v42 = vmax.f32 %v2501_v39, 0.0  ;;  %v7551_v38 = vpack.c.bf16 %v2593_v36, %v2592_v35  ;;  %v2896_v39 = vld [vmem:[#allocation8 + $0x100] sm:$0xff] }
 0x637   : > { %v9371_v43 = vpack.c.bf16 %v2504_v40, %v2503_v42  ;;  %v2897_v40 = vld [vmem:[#allocation8 + $0x108] sm:$0xff]  ;;  %v3056_v42 = vld [vmem:[#allocation8 + $0x180] sm:$0xff] }
 0x638   : > { %v7557_v31 = vpack.c.bf16 %v2897_v40, %v2896_v39  ;;  %v7584_v49 = vpack.c.bf16 %v3057_v45, %v3056_v42  ;;  %v3226_v45 = vld [vmem:[#allocation10 + $0x8] sm:$0xff] }
 0x639   : > { %7501 = vmatpush3.bf16.msra.mxu0 %v9371_v43  ;;  %7582 = vmatpush3.bf16.msra.mxu1 %v9371_v43 }
 0x63a   : > { %7502 = vmatprep.subr.bf16.mxu0 %v8593_v1  ;;  %7583 = vmatprep.subr.bf16.mxu1 %v8593_v1 }
 0x63c   : > { %6488 = vmatmul.mubr.msk.f32.vlgmr.msra.gmra.mrb[52].mxu0 %vm2505_vm3, %v9148_v48  ;;  %6614 = vmatmul.mubr.msk.f32.vlgmr.msra.gmra.mrb[22].mxu1 %vm2505_vm3, %v9285_v20 }
 0x63d   : > { %7504 = vmatpush3.bf16.msra.mxu0 %v9371_v43  ;;  %6494 = vmatprep.mubr.msk.f32.mxu0 %vm8594_vm1, %v8592_v0 }
 0x63e   : > { %7505 = vmatprep.subr.bf16.mxu0 %v8593_v1  ;;  %6648 = vmatprep.mubr.msk.f32.mxu1 %vm8594_vm1, %v8592_v0 }
 0x63f   : > { %7585 = vmatpush3.bf16.msra.mxu1 %v7584_v49  ;;  %v3228_v49 = vld [vmem:[#allocation10 + $0x18] sm:$0xff] }
 0x640   : > { %6495 = vmatmul.mubr.msk.f32.vlgmr.msra.gmra.mrb[54].mxu0 %vm2505_vm3, %v9187_v9  ;;  %7586 = vmatprep.subr.bf16.mxu1 %v8593_v1 }
 0x641   : > { %7507 = vmatpush3.bf16.msra.mxu0 %v7506_v46  ;;  %6529 = vmatprep.mubr.msk.f32.mxu0 %vm8594_vm1, %v8592_v0  ;;  %v2898_v46 = vld [vmem:[#allocation8 + $0x110] sm:$0xff] }
 0x642   : > { %7508 = vmatprep.subr.bf16.mxu0 %v8593_v1  ;;  %v7560_v61 = vpack.c.bf16 %v2899_v47, %v2898_v46  ;;  %v3227_v47 = vld [vmem:[#allocation10 + $0x10] sm:$0xff] }
 0x645   : > { %7510 = vmatpush3.bf16.msra.mxu0 %v7509_v54  ;;  %v3059_v54 = vld [vmem:[#allocation8 + $0x198] sm:$0xff] }
 0x646   : > { %7511 = vmatprep.subr.bf16.mxu0 %v8593_v1 }
 0x649   : > { %7513 = vmatpush3.bf16.msra.mxu0 %v7512_v52  ;;  %v2900_v52 = vld [vmem:[#allocation8 + $0x120] sm:$0xff] }
 0x64a   : > { %7514 = vmatprep.subr.bf16.mxu0 %v8593_v1  ;;  %v7563_v57 = vpack.c.bf16 %v2901_v53, %v2900_v52  ;;  %v3231_v52 = vld [vmem:[#allocation10 + $0x30] sm:$0xff]  ;;  %v3232_v53 = vld [vmem:[#allocation10 + $0x38] sm:$0xff] }
 0x64d   : > { %7516 = vmatpush3.bf16.msra.mxu0 %v7515_v56  ;;  %v3061_v56 = vld [vmem:[#allocation8 + $0x1a8] sm:$0xff] }
 0x64e   : > { %7517 = vmatprep.subr.bf16.mxu0 %v8593_v1  ;;  %v7590_v58 = vpack.c.bf16 %v3061_v56, %v3060_v55  ;;  %v7641_v55 = vpack.c.bf16 %v3232_v53, %v3231_v52  ;;  %v3233_v56 = vld [vmem:[#allocation10 + $0x40] sm:$0xff] }
 0x651   : > { %7519 = vmatpush3.bf16.msra.mxu0 %v7518_v60  ;;  %v2902_v60 = vld [vmem:[#allocation8 + $0x130] sm:$0xff] }
 0x652   : > { %7520 = vmatprep.subr.bf16.mxu0 %v8593_v1  ;;  %v7566_v30 = vpack.c.bf16 %v2903_v6, %v2902_v60  ;;  %v3235_v60 = vld [vmem:[#allocation10 + $0x50] sm:$0xff]  ;;  %v3236_v6 = vld [vmem:[#allocation10 + $0x58] sm:$0xff] }
 0x655   : > { %7522 = vmatpush3.bf16.msra.mxu0 %v7521_v21  ;;  %v3063_v21 = vld [vmem:[#allocation8 + $0x1b8] sm:$0xff] }
 0x656   : > { %7523 = vmatprep.subr.bf16.mxu0 %v8593_v1  ;;  %v7593_v62 = vpack.c.bf16 %v3063_v21, %v3062_v11  ;;  %v7647_v11 = vpack.c.bf16 %v3236_v6, %v3235_v60  ;;  %v3237_v21 = vld [vmem:[#allocation10 + $0x60] sm:$0xff]  ;;  %v3708_v60 = vld [vmem:[#allocation10 + $0x1a8] sm:$0xff] }
 0x659   : > { %7525 = vmatpush3.bf16.msra.mxu0 %v7524_v12  ;;  %v2904_v12 = vld [vmem:[#allocation8 + $0x140] sm:$0xff] }
 0x65a   : > { %7526 = vmatprep.subr.bf16.mxu0 %v8593_v1  ;;  %v7569_v37 = vpack.c.bf16 %v2905_v17, %v2904_v12  ;;  %v3239_v12 = vld [vmem:[#allocation10 + $0x70] sm:$0xff]  ;;  %v3240_v17 = vld [vmem:[#allocation10 + $0x78] sm:$0xff] }
 0x65d   : > { %7528 = vmatpush3.bf16.msra.mxu0 %v7527_v33  ;;  %v3065_v33 = vld [vmem:[#allocation8 + $0x1c8] sm:$0xff] }
 0x65e   : > { %7529 = vmatprep.subr.bf16.mxu0 %v8593_v1  ;;  %v7596_v41 = vpack.c.bf16 %v3065_v33, %v3064_v22  ;;  %v7653_v22 = vpack.c.bf16 %v3240_v17, %v3239_v12  ;;  %v3710_v12 = vld [vmem:[#allocation10 + $0x1b8] sm:$0xff] }
 0x70f   : > { %v2574_v44 = vpop.f32.mrb[52].mxu0  ;;  %v3051_v15 = vpop.f32.mrb[22].mxu1 }
 0x710   : > { %v6489_v63 = vpop.f32.mrb[53].mxu0 }
 0x711   : > { %v2907_v63 = vld [vmem:[#allocation8 + $0x158] sm:$0xff] }
 0x713   : > { %v2662_v7 = vpop.f32.mrb[54].mxu0 }
 0x714   : > { %v6496_v8 = vpop.f32.mrb[55].mxu0  ;;  %6530 = vmatmul.mubr.f32.vlgmr.msra.gmra.mrb[56].mxu0 %v2662_v7 }
 0x715   : > { %7531 = vmatpush3.bf16.msra.mxu0 %v7530_v3  ;;  %6564 = vmatprep.mubr.msk.f32.mxu0 %vm8594_vm1, %v8592_v0  ;;  %v3066_v3 = vld [vmem:[#allocation8 + $0x1d0] sm:$0xff]  ;;  %v2908_v8 = vld [vmem:[#allocation8 + $0x160] sm:$0xff] }
 0x716   : > { %7532 = vmatprep.subr.bf16.mxu0 %v8593_v1  ;;  %v7599_v7 = vpack.c.bf16 %v3067_v4, %v3066_v3 }
 0x719   : > { %7534 = vmatpush3.bf16.msra.mxu0 %v7533_v13  ;;  %v2909_v13 = vld [vmem:[#allocation8 + $0x168] sm:$0xff] }
 0x71a   : > { %7535 = vmatprep.subr.bf16.mxu0 %v8593_v1  ;;  %v7575_v14 = vpack.c.bf16 %v2909_v13, %v2908_v8  ;;  %v3316_v13 = vld [vmem:[#allocation10 + $0x90] sm:$0xff] }
 0x71d   : > { %7537 = vmatpush3.bf16.msra.mxu0 %v7536_v18  ;;  %v3069_v18 = vld [vmem:[#allocation8 + $0x1e8] sm:$0xff] }
 0x71e   : > { %7538 = vmatprep.subr.bf16.mxu0 %v8593_v1  ;;  %v7602_v19 = vpack.c.bf16 %v3069_v18, %v3068_v16  ;;  %v3318_v18 = vld [vmem:[#allocation10 + $0xa0] sm:$0xff] }
 0x721   : > { %7540 = vmatpush3.bf16.msra.mxu0 %v7539_v24  ;;  %v2911_v24 = vld [vmem:[#allocation8 + $0x178] sm:$0xff] }
 0x722   : > { %7541 = vmatprep.subr.bf16.mxu0 %v8593_v1  ;;  %v7578_v25 = vpack.c.bf16 %v2911_v24, %v2910_v23  ;;  %v3320_v24 = vld [vmem:[#allocation10 + $0xb0] sm:$0xff] }
 0x725   : > { %7543 = vmatpush3.bf16.msra.mxu0 %v7542_v26  ;;  %v3071_v26 = vld [vmem:[#allocation8 + $0x1f8] sm:$0xff] }
 0x726   : > { %7544 = vmatprep.subr.bf16.mxu0 %v8593_v1  ;;  %v7605_v27 = vpack.c.bf16 %v3071_v26, %v3070_v50  ;;  %v3322_v26 = vld [vmem:[#allocation10 + $0xc0] sm:$0xff] }
 0x729   : > { %7546 = vmatpush3.bf16.msra.mxu0 %v7545_v28  ;;  %v6615_v28 = vpop.f32.mrb[23].mxu1 }
 0x72a   : > { %7547 = vmatprep.subr.bf16.mxu0 %v8593_v1  ;;  %v3324_v28 = vld [vmem:[#allocation10 + $0xd0] sm:$0xff] }
 0x72d   : > { %7549 = vmatpush3.bf16.msra.mxu0 %v7548_v34 }
 0x72e   : > { %7550 = vmatprep.subr.bf16.mxu0 %v8593_v1 }
 0x731   : > { %7552 = vmatpush3.bf16.msra.mxu0 %v7551_v38 }
 0x732   : > { %7553 = vmatprep.subr.bf16.mxu0 %v8593_v1 }
 0x734   : > { %6565 = vmatmul.mubr.f32.vlgmr.msra.gmra.mrb[58].mxu0 %v2574_v44  ;;  %v2906_v44 = vld [vmem:[#allocation8 + $0x150] sm:$0xff] }
 0x735   : > { %7555 = vmatpush3.bf16.msra.mxu0 %v9371_v43  ;;  %6571 = vmatprep.mubr.msk.f32.mxu0 %vm8594_vm1, %v8592_v0  ;;  %v3058_v43 = vld [vmem:[#allocation8 + $0x190] sm:$0xff]  ;;  %v7572_v5 = vpack.c.bf16 %v2907_v63, %v2906_v44  ;;  %v5864_v44 = vld [vmem:[%s9735_s7] ss:$0 sm:$0xff] }
 0x736   : > { %7556 = vmatprep.subr.bf16.mxu0 %v8593_v1  ;;  %v7587_v51 = vpack.c.bf16 %v3059_v54, %v3058_v43  ;;  %v7635_v43 = vpack.c.bf16 %v3228_v49, %v3227_v47  ;;  %v3229_v54 = vld [vmem:[#allocation10 + $0x20] sm:$0xff]  ;;  %v3544_v49 = vld [vmem:[#allocation10 + $0x108] sm:$0xff] }
 0x737   : > { %v3543_v47 = vld [vmem:[#allocation10 + $0x100] sm:$0xff] }
 0x738   : > { %6572 = vmatmul.mubr.msk.f32.vlgmr.msra.gmra.mrb[60].mxu0 %vm2505_vm3, %v9251_v59  ;;  %7588 = vmatpush3.bf16.msra.mxu1 %v7587_v51  ;;  %v7656_v53 = vpack.c.bf16 %v3544_v49, %v3543_v47  ;;  %v3876_v49 = vld [vmem:[#allocation11] sm:$0xff] }
 0x739   : > { %6606 = vmatprep.mubr.msk.f32.mxu0 %vm8594_vm1, %v8592_v0  ;;  %7558 = vmatpush3.bf16.msra.mxu0 %v7557_v31  ;;  %v3225_v31 = vld [vmem:[#allocation10] sm:$0xff] }
 0x73a   : > { %7559 = vmatprep.subr.bf16.mxu0 %v8593_v1  ;;  %7589 = vmatprep.subr.bf16.mxu1 %v8593_v1  ;;  %v7632_v46 = vpack.c.bf16 %v3226_v45, %v3225_v31  ;;  %v3703_v31 = vld [vmem:[#allocation10 + $0x180] sm:$0xff]  ;;  %v3704_v45 = vld [vmem:[#allocation10 + $0x188] sm:$0xff] }
 0x73c   : > { %7591 = vmatpush3.bf16.msra.mxu1 %v7590_v58 }
 0x73d   : > { %7561 = vmatpush3.bf16.msra.mxu0 %v7560_v61  ;;  %7592 = vmatprep.subr.bf16.mxu1 %v8593_v1  ;;  %v3230_v61 = vld [vmem:[#allocation10 + $0x28] sm:$0xff] }
 0x73e   : > { %7562 = vmatprep.subr.bf16.mxu0 %v8593_v1  ;;  %v7638_v51 = vpack.c.bf16 %v3230_v61, %v3229_v54  ;;  %v3705_v61 = vld [vmem:[#allocation10 + $0x190] sm:$0xff] }
 0x740   : > { %7594 = vmatpush3.bf16.msra.mxu1 %v7593_v62 }
 0x741   : > { %7564 = vmatpush3.bf16.msra.mxu0 %v7563_v57  ;;  %7595 = vmatprep.subr.bf16.mxu1 %v8593_v1  ;;  %v3234_v57 = vld [vmem:[#allocation10 + $0x48] sm:$0xff] }
 0x742   : > { %7565 = vmatprep.subr.bf16.mxu0 %v8593_v1  ;;  %v7644_v58 = vpack.c.bf16 %v3234_v57, %v3233_v56  ;;  %v3546_v56 = vld [vmem:[#allocation10 + $0x118] sm:$0xff] }
 0x744   : > { %7597 = vmatpush3.bf16.msra.mxu1 %v7596_v41 }
 0x745   : > { %7567 = vmatpush3.bf16.msra.mxu0 %v7566_v30  ;;  %7598 = vmatprep.subr.bf16.mxu1 %v8593_v1  ;;  %v3238_v30 = vld [vmem:[#allocation10 + $0x68] sm:$0xff] }
 0x746   : > { %7568 = vmatprep.subr.bf16.mxu0 %v8593_v1  ;;  %v7650_v62 = vpack.c.bf16 %v3238_v30, %v3237_v21  ;;  %v3548_v21 = vld [vmem:[#allocation10 + $0x128] sm:$0xff] }
 0x748   : > { %7600 = vmatpush3.bf16.msra.mxu1 %v7599_v7  ;;  %v3315_v7 = vld [vmem:[#allocation10 + $0x88] sm:$0xff] }
 0x749   : > { %7570 = vmatpush3.bf16.msra.mxu0 %v7569_v37  ;;  %7601 = vmatprep.subr.bf16.mxu1 %v8593_v1 }
 0x74a   : > { %7571 = vmatprep.subr.bf16.mxu0 %v8593_v1 }
 0x74c   : > { %7603 = vmatpush3.bf16.msra.mxu1 %v7602_v19  ;;  %v3319_v19 = vld [vmem:[#allocation10 + $0xa8] sm:$0xff] }
 0x74d   : > { %7573 = vmatpush3.bf16.msra.mxu0 %v7572_v5  ;;  %7604 = vmatprep.subr.bf16.mxu1 %v8593_v1  ;;  %v3314_v5 = vld [vmem:[#allocation10 + $0x80] sm:$0xff]  ;;  %v7614_v23 = vpack.c.bf16 %v3319_v19, %v3318_v18  ;;  %v3714_v18 = vld [vmem:[#allocation10 + $0x1d8] sm:$0xff] }
 0x74e   : > { %7574 = vmatprep.subr.bf16.mxu0 %v8593_v1  ;;  %v7608_v8 = vpack.c.bf16 %v3315_v7, %v3314_v5 }
 0x750   : > { %7606 = vmatpush3.bf16.msra.mxu1 %v7605_v27  ;;  %v3323_v27 = vld [vmem:[#allocation10 + $0xc8] sm:$0xff] }
 0x751   : > { %7576 = vmatpush3.bf16.msra.mxu0 %v7575_v14  ;;  %7631 = vmatprep.subr.bf16.mxu1 %v8593_v1  ;;  %v3317_v14 = vld [vmem:[#allocation10 + $0x98] sm:$0xff] }
 0x752   : > { %7577 = vmatprep.subr.bf16.mxu0 %v8593_v1  ;;  %v7611_v16 = vpack.c.bf16 %v3317_v14, %v3316_v13  ;;  %v3554_v13 = vld [vmem:[#allocation10 + $0x158] sm:$0xff] }
 0x753   : > { %6649 = vmatmul.mubr.f32.vlgmr.msra.gmra.mrb[24].mxu1 %v3051_v15  ;;  %v7620_v15 = vpack.c.bf16 %v3323_v27, %v3322_v26  ;;  %v3716_v26 = vld [vmem:[#allocation10 + $0x1e8] sm:$0xff] }
 0x754   : > { %6728 = vmatprep.mubr.msk.f32.mxu1 %vm8594_vm1, %v8592_v0  ;;  %7633 = vmatpush3.bf16.msra.mxu1 %v7632_v46 }
 0x755   : > { %7579 = vmatpush3.bf16.msra.mxu0 %v7578_v25  ;;  %7634 = vmatprep.subr.bf16.mxu1 %v8593_v1  ;;  %v3321_v25 = vld [vmem:[#allocation10 + $0xb8] sm:$0xff] }
 0x756   : > { %6651 = vmatprep.subr.mxu0 %v8592_v0  ;;  %v7617_v50 = vpack.c.bf16 %v3321_v25, %v3320_v24  ;;  %v3556_v24 = vld [vmem:[#allocation10 + $0x168] sm:$0xff] }
 0x758   : > { %7636 = vmatpush3.bf16.msra.mxu1 %v7635_v43  ;;  %v7680_v43 = vpack.c.bf16 %v3704_v45, %v3703_v31 }
 0x759   : > { %7637 = vmatprep.subr.bf16.mxu1 %v8593_v1 }
 0x75c   : > { %7639 = vmatpush3.bf16.msra.mxu1 %v7638_v51  ;;  %v3706_v51 = vld [vmem:[#allocation10 + $0x198] sm:$0xff] }
 0x75d   : > { %7640 = vmatprep.subr.bf16.mxu1 %v8593_v1  ;;  %v7683_v57 = vpack.c.bf16 %v3706_v51, %v3705_v61  ;;  %v3878_v61 = vld [vmem:[#allocation11 + $0x10] sm:$0xff]  ;;  %v3879_v51 = vld [vmem:[#allocation11 + $0x18] sm:$0xff] }
 0x760   : > { %7642 = vmatpush3.bf16.msra.mxu1 %v7641_v55  ;;  %v3545_v55 = vld [vmem:[#allocation10 + $0x110] sm:$0xff] }
 0x761   : > { %7643 = vmatprep.subr.bf16.mxu1 %v8593_v1  ;;  %v7659_v6 = vpack.c.bf16 %v3546_v56, %v3545_v55  ;;  %v3881_v55 = vld [vmem:[#allocation11 + $0x28] sm:$0xff] }
 0x764   : > { %7645 = vmatpush3.bf16.msra.mxu1 %v7644_v58  ;;  %v3707_v58 = vld [vmem:[#allocation10 + $0x1a0] sm:$0xff] }
 0x765   : > { %7646 = vmatprep.subr.bf16.mxu1 %v8593_v1  ;;  %v7686_v30 = vpack.c.bf16 %v3708_v60, %v3707_v58  ;;  %v3883_v58 = vld [vmem:[#allocation11 + $0x38] sm:$0xff] }
 0x768   : > { %7648 = vmatpush3.bf16.msra.mxu1 %v7647_v11  ;;  %v3547_v11 = vld [vmem:[#allocation10 + $0x120] sm:$0xff] }
 0x769   : > { %7649 = vmatprep.subr.bf16.mxu1 %v8593_v1  ;;  %v7662_v17 = vpack.c.bf16 %v3548_v21, %v3547_v11  ;;  %v3885_v11 = vld [vmem:[#allocation11 + $0x48] sm:$0xff] }
 0x76c   : > { %7651 = vmatpush3.bf16.msra.mxu1 %v7650_v62  ;;  %v3709_v62 = vld [vmem:[#allocation10 + $0x1b0] sm:$0xff] }
 0x76d   : > { %7652 = vmatprep.subr.bf16.mxu1 %v8593_v1 }
 0x770   : > { %7654 = vmatpush3.bf16.msra.mxu1 %v7653_v22  ;;  %v3549_v22 = vld [vmem:[#allocation10 + $0x130] sm:$0xff] }
 0x771   : > { %6771 = vmatprep.subr.mxu1 %v8592_v0 }
 0x7e7   : > { %v2749_v29 = vpop.f32.mrb[56].mxu0 }
 0x7e8   : > { %v6531_v32 = vpop.f32.mrb[57].mxu0 }
 0x807   : > { %v2819_v34 = vpop.f32.mrb[58].mxu0 }
 0x808   : > { %v2820_v35 = vadd.f32 %v2819_v34, %v2749_v29  ;;  %v6566_v36 = vpop.f32.mrb[59].mxu0  ;;  %v3325_v29 = vld [vmem:[#allocation10 + $0xd8] sm:$0xff]  ;;  %v3326_v34 = vld [vmem:[#allocation10 + $0xe0] sm:$0xff] }
 0x809   : > { %v7623_v32 = vpack.c.bf16 %v3325_v29, %v3324_v28  ;;  %v3558_v28 = vld [vmem:[#allocation10 + $0x178] sm:$0xff] }
 0x80b   : > { %v2891_v38 = vpop.f32.mrb[60].mxu0 }
 0x80c   : > { %v6573_v39 = vpop.f32.mrb[61].mxu0  ;;  %6607 = vmatmul.mubr.f32.vlgmr.msra.gmra.mrb[62].mxu0 %v2891_v38  ;;  %v3328_v38 = vld [vmem:[#allocation10 + $0xf0] sm:$0xff] }
 0x80d   : > { %6653 = vmatprep.mubr.msk.f32.mxu0 %vm8594_vm1, %v8592_v0  ;;  %v3329_v39 = vld [vmem:[#allocation10 + $0xf8] sm:$0xff] }
 0x826   : > { %v3138_v40 = vpop.f32.mrb[24].mxu1 }
 0x827   : > { %v6650_v42 = vpop.f32.mrb[25].mxu1 }
 0x8df   : > { %v2978_v33 = vpop.f32.mrb[62].mxu0 }
 0x8e0   : > { %v2982_v37 = vadd.f32 %v2978_v33, %v2820_v35  ;;  %v6608_v41 = vpop.f32.mrb[63].mxu0  ;;  %v3327_v35 = vld [vmem:[#allocation10 + $0xe8] sm:$0xff]  ;;  %v3550_v33 = vld [vmem:[#allocation10 + $0x138] sm:$0xff] }
 0x8e1   : > { %v7626_v36 = vpack.c.bf16 %v3327_v35, %v3326_v34  ;;  %v3711_v41 = vld [vmem:[#allocation10 + $0x1c0] sm:$0xff]  ;;  %v3718_v34 = vld [vmem:[#allocation10 + $0x1f8] sm:$0xff] }
 0x8e2   : > { %v3142_v63 = vadd.f32 %v3138_v40, %v2982_v37  ;;  %v7629_v40 = vpack.c.bf16 %v3329_v39, %v3328_v38  ;;  %v7689_v37 = vpack.c.bf16 %v3710_v12, %v3709_v62  ;;  %v3887_v62 = vld [vmem:[#allocation11 + $0x58] sm:$0xff] }
 0x8e4   : > { %v3150_v3 = vadd.f32 %v5864_v44, %v3142_v63  ;;  %v3712_v44 = vld [vmem:[#allocation10 + $0x1c8] sm:$0xff]  ;;  %v7665_v63 = vpack.c.bf16 %v3550_v33, %v3549_v22 }
 0x8e5   : > { %v7692_v5 = vpack.c.bf16 %v3712_v44, %v3711_v41  ;;  %v3889_v22 = vld [vmem:[#allocation11 + $0x68] sm:$0xff]  ;;  %v3891_v41 = vld [vmem:[#allocation11 + $0x78] sm:$0xff] }
 0x8e6   : > { %v9448_v4 = vmax.f32 %v3150_v3, 0.0  ;;  %v3551_v3 = vld [vmem:[#allocation10 + $0x140] sm:$0xff] }
 0x8e8   : > { %6652 = vmatpush3.msra.mxu0 %v9448_v4 }
 0x8e9   : > { %6654 = vmatmul.mubr.msk.f32.vlgmr.msra.gmra.mrb[64].mxu0 %vm3152_vm4, %v9148_v48  ;;  %6656 = vmatprep.subr.mxu0 %v8592_v0 }
 0x8ea   : > { %6657 = vmatpush3.msra.mxu0 %v9448_v4  ;;  %6658 = vmatprep.mubr.msk.f32.mxu0 %vm8594_vm1, %v8592_v0 }
 0x8eb   : > { %7607 = vmatprep.subr.bf16.mxu0 %v8593_v1 }
 0x8ed   : > { %6659 = vmatmul.mubr.msk.f32.vlgmr.msra.gmra.mrb[66].mxu0 %vm3152_vm4, %v9187_v9 }
 0x8ee   : > { %7609 = vmatpush3.bf16.msra.mxu0 %v7608_v8  ;;  %6693 = vmatprep.mubr.msk.f32.mxu0 %vm8594_vm1, %v8592_v0  ;;  %v3553_v8 = vld [vmem:[#allocation10 + $0x150] sm:$0xff] }
 0x8ef   : > { %7610 = vmatprep.subr.bf16.mxu0 %v8593_v1  ;;  %v7671_v14 = vpack.c.bf16 %v3554_v13, %v3553_v8  ;;  %v5869_v8 = vld [vmem:[%s9815_s21] ss:$0 sm:$0xff]  ;;  %s5894_s21 = sshll.u32 %s8728_s29, 5  ;;  %s8596_s29 = smov [#allocation19]  }
 0x8f0   : > { %s8494_s20 = sshll.u32 %s8596_s29, 4  ;;  %s8495_s20 = int_to_ptr.vmem [resolvable:$false] %s8494_s20 }
 0x8f1   : > { %s8496_s5 = scalar_lea.vmem %s8495_s20, 64 }
 0x8f2   : > { %7612 = vmatpush3.bf16.msra.mxu0 %v7611_v16  ;;  %v3713_v16 = vld [vmem:[#allocation10 + $0x1d0] sm:$0xff] }
 0x8f3   : > { %7613 = vmatprep.subr.bf16.mxu0 %v8593_v1  ;;  %v7695_v19 = vpack.c.bf16 %v3714_v18, %v3713_v16  ;;  %v3965_v18 = vld [vmem:[#allocation11 + $0x80] sm:$0xff] }
 0x8f6   : > { %7615 = vmatpush3.bf16.msra.mxu0 %v7614_v23  ;;  %v3555_v23 = vld [vmem:[#allocation10 + $0x160] sm:$0xff] }
 0x8f7   : > { %7616 = vmatprep.subr.bf16.mxu0 %v8593_v1  ;;  %v7674_v25 = vpack.c.bf16 %v3556_v24, %v3555_v23  ;;  %v3967_v24 = vld [vmem:[#allocation11 + $0x90] sm:$0xff] }
 0x8fa   : > { %7618 = vmatpush3.bf16.msra.mxu0 %v7617_v50  ;;  %v3715_v50 = vld [vmem:[#allocation10 + $0x1e0] sm:$0xff] }
 0x8fb   : > { %7619 = vmatprep.subr.bf16.mxu0 %v8593_v1  ;;  %v7698_v27 = vpack.c.bf16 %v3716_v26, %v3715_v50  ;;  %v3969_v26 = vld [vmem:[#allocation11 + $0xa0] sm:$0xff] }
 0x8fe   : > { %7621 = vmatpush3.bf16.msra.mxu0 %v7620_v15  ;;  %v3557_v15 = vld [vmem:[#allocation10 + $0x170] sm:$0xff] }
 0x8ff   : > { %7622 = vmatprep.subr.bf16.mxu0 %v8593_v1  ;;  %v7677_v29 = vpack.c.bf16 %v3558_v28, %v3557_v15  ;;  %v3971_v28 = vld [vmem:[#allocation11 + $0xb0] sm:$0xff] }
 0x902   : > { %7624 = vmatpush3.bf16.msra.mxu0 %v7623_v32  ;;  %v3717_v32 = vld [vmem:[#allocation10 + $0x1f0] sm:$0xff] }
 0x903   : > { %7625 = vmatprep.subr.bf16.mxu0 %v8593_v1  ;;  %v7701_v35 = vpack.c.bf16 %v3718_v34, %v3717_v32  ;;  %v3973_v34 = vld [vmem:[#allocation11 + $0xc0] sm:$0xff] }
 0x906   : > { %7627 = vmatpush3.bf16.msra.mxu0 %v7626_v36 }
 0x907   : > { %7628 = vmatprep.subr.bf16.mxu0 %v8593_v1 }
 0x90a   : > { %7630 = vmatpush3.bf16.msra.mxu0 %v7629_v40 }
 0x90b   : > { %6731 = vmatprep.subr.mxu0 %v8592_v0 }
 0x9bc   : > { %v3221_v42 = vpop.f32.mrb[64].mxu0 }
 0x9bd   : > { %v6655_v46 = vpop.f32.mrb[65].mxu0  ;;  %6729 = vmatmul.mubr.f32.vlgmr.msra.gmra.mrb[26].mxu1 %v3221_v42 }
 0x9be   : > { %6772 = vmatpush3.msra.mxu1 %v9448_v4  ;;  %6773 = vmatprep.mubr.msk.f32.mxu1 %vm8594_vm1, %v8592_v0 }
 0x9bf   : > { %7679 = vmatprep.subr.bf16.mxu1 %v8593_v1 }
 0x9c0   : > { %v3309_v54 = vpop.f32.mrb[66].mxu0 }
 0x9c1   : > { %v6660_v52 = vpop.f32.mrb[67].mxu0  ;;  %6694 = vmatmul.mubr.f32.vlgmr.msra.gmra.mrb[68].mxu0 %v3309_v54  ;;  %6774 = vmatmul.mubr.msk.f32.vlgmr.msra.gmra.mrb[28].mxu1 %vm3152_vm4, %v9285_v20 }
 0x9c2   : > { %6732 = vmatpush3.msra.mxu0 %v9448_v4  ;;  %6733 = vmatprep.mubr.msk.f32.mxu0 %vm8594_vm1, %v8592_v0  ;;  %v3552_v4 = vld [vmem:[#allocation10 + $0x148] sm:$0xff]  ;;  %v7731_v52 = vpack.c.bf16 %v3879_v51, %v3878_v61 }
 0x9c3   : > { %7655 = vmatprep.subr.bf16.mxu0 %v8593_v1  ;;  %7681 = vmatpush3.bf16.msra.mxu1 %v7680_v43  ;;  %v7668_v7 = vpack.c.bf16 %v3552_v4, %v3551_v3  ;;  %v3877_v43 = vld [vmem:[#allocation11 + $0x8] sm:$0xff] }
 0x9c4   : > { %7682 = vmatprep.subr.bf16.mxu1 %v8593_v1  ;;  %6808 = vmatprep.mubr.msk.f32.mxu1 %vm8594_vm1, %v8592_v0  ;;  %v7728_v54 = vpack.c.bf16 %v3877_v43, %v3876_v49  ;;  %v4355_v61 = vld [vmem:[#allocation11 + $0x188] sm:$0xff] }
 0x9c5   : > { %6734 = vmatmul.mubr.msk.f32.vlgmr.msra.gmra.mrb[70].mxu0 %vm3152_vm4, %v9251_v59 }
 0x9c6   : > { %7657 = vmatpush3.bf16.msra.mxu0 %v7656_v53  ;;  %6768 = vmatprep.mubr.msk.f32.mxu0 %vm8594_vm1, %v8592_v0  ;;  %v3880_v53 = vld [vmem:[#allocation11 + $0x20] sm:$0xff] }
 0x9c7   : > { %7658 = vmatprep.subr.bf16.mxu0 %v8593_v1  ;;  %7684 = vmatpush3.bf16.msra.mxu1 %v7683_v57  ;;  %v7734_v56 = vpack.c.bf16 %v3881_v55, %v3880_v53  ;;  %v3882_v57 = vld [vmem:[#allocation11 + $0x30] sm:$0xff]  ;;  %v4195_v53 = vld [vmem:[#allocation11 + $0x108] sm:$0xff] }
 0x9c8   : > { %7685 = vmatprep.subr.bf16.mxu1 %v8593_v1  ;;  %v7737_v60 = vpack.c.bf16 %v3883_v58, %v3882_v57  ;;  %v4356_v57 = vld [vmem:[#allocation11 + $0x190] sm:$0xff]  ;;  %v4357_v58 = vld [vmem:[#allocation11 + $0x198] sm:$0xff] }
 0x9ca   : > { %7660 = vmatpush3.bf16.msra.mxu0 %v7659_v6  ;;  %v3884_v6 = vld [vmem:[#allocation11 + $0x40] sm:$0xff] }
 0x9cb   : > { %7661 = vmatprep.subr.bf16.mxu0 %v8593_v1  ;;  %7687 = vmatpush3.bf16.msra.mxu1 %v7686_v30  ;;  %v7740_v21 = vpack.c.bf16 %v3885_v11, %v3884_v6  ;;  %v3886_v30 = vld [vmem:[#allocation11 + $0x50] sm:$0xff] }
 0x9cc   : > { %7688 = vmatprep.subr.bf16.mxu1 %v8593_v1  ;;  %v7743_v12 = vpack.c.bf16 %v3887_v62, %v3886_v30  ;;  %v4196_v11 = vld [vmem:[#allocation11 + $0x110] sm:$0xff]  ;;  %v7779_v30 = vpack.c.bf16 %v4357_v58, %v4356_v57  ;;  %v4358_v62 = vld [vmem:[#allocation11 + $0x1a0] sm:$0xff]  ;;  %v4530_v58 = vld [vmem:[#allocation13 + $0x18] sm:$0xff] }
 0x9cd   : > { %v4529_v57 = vld [vmem:[#allocation13 + $0x10] sm:$0xff] }
 0x9ce   : > { %7663 = vmatpush3.bf16.msra.mxu0 %v7662_v17  ;;  %v3888_v17 = vld [vmem:[#allocation11 + $0x60] sm:$0xff] }
 0x9cf   : > { %7664 = vmatprep.subr.bf16.mxu0 %v8593_v1  ;;  %7690 = vmatpush3.bf16.msra.mxu1 %v7689_v37  ;;  %v7746_v33 = vpack.c.bf16 %v3889_v22, %v3888_v17  ;;  %v3890_v37 = vld [vmem:[#allocation11 + $0x70] sm:$0xff]  ;;  %v4198_v22 = vld [vmem:[#allocation11 + $0x120] sm:$0xff] }
 0x9d0   : > { %7691 = vmatprep.subr.bf16.mxu1 %v8593_v1  ;;  %v7749_v44 = vpack.c.bf16 %v3891_v41, %v3890_v37  ;;  %v4360_v41 = vld [vmem:[#allocation11 + $0x1b0] sm:$0xff] }
 0x9d2   : > { %7666 = vmatpush3.bf16.msra.mxu0 %v7665_v63 }
 0x9d3   : > { %7667 = vmatprep.subr.bf16.mxu0 %v8593_v1  ;;  %7693 = vmatpush3.bf16.msra.mxu1 %v7692_v5 }
 0x9d4   : > { %7694 = vmatprep.subr.bf16.mxu1 %v8593_v1 }
 0x9d6   : > { %7669 = vmatpush3.bf16.msra.mxu0 %v7668_v7 }
 0x9d7   : > { %7670 = vmatprep.subr.bf16.mxu0 %v8593_v1  ;;  %7696 = vmatpush3.bf16.msra.mxu1 %v7695_v19  ;;  %v3966_v19 = vld [vmem:[#allocation11 + $0x88] sm:$0xff] }
 0x9d8   : > { %7697 = vmatprep.subr.bf16.mxu1 %v8593_v1  ;;  %v7704_v23 = vpack.c.bf16 %v3966_v19, %v3965_v18 }
 0x9da   : > { %7672 = vmatpush3.bf16.msra.mxu0 %v7671_v14 }
 0x9db   : > { %7673 = vmatprep.subr.bf16.mxu0 %v8593_v1  ;;  %7699 = vmatpush3.bf16.msra.mxu1 %v7698_v27  ;;  %v3970_v27 = vld [vmem:[#allocation11 + $0xa8] sm:$0xff] }
 0x9dc   : > { %7700 = vmatprep.subr.bf16.mxu1 %v8593_v1  ;;  %v7710_v15 = vpack.c.bf16 %v3970_v27, %v3969_v26  ;;  %v4365_v26 = vld [vmem:[#allocation11 + $0x1d8] sm:$0xff] }
 0x9de   : > { %7675 = vmatpush3.bf16.msra.mxu0 %v7674_v25  ;;  %v3968_v25 = vld [vmem:[#allocation11 + $0x98] sm:$0xff] }
 0x9df   : > { %7676 = vmatprep.subr.bf16.mxu0 %v8593_v1  ;;  %7702 = vmatpush3.bf16.msra.mxu1 %v7701_v35  ;;  %v7707_v50 = vpack.c.bf16 %v3968_v25, %v3967_v24  ;;  %v3974_v35 = vld [vmem:[#allocation11 + $0xc8] sm:$0xff]  ;;  %v4205_v24 = vld [vmem:[#allocation11 + $0x158] sm:$0xff] }
 0x9e0   : > { %7727 = vmatprep.subr.bf16.mxu1 %v8593_v1 }
 0x9e2   : > { %7678 = vmatpush3.bf16.msra.mxu0 %v7677_v29  ;;  %v3972_v29 = vld [vmem:[#allocation11 + $0xb8] sm:$0xff] }
 0x9e3   : > { %6811 = vmatprep.subr.mxu0 %v8592_v0  ;;  %v7713_v32 = vpack.c.bf16 %v3972_v29, %v3971_v28  ;;  %v4207_v28 = vld [vmem:[#allocation11 + $0x168] sm:$0xff] }
 0xa90   : > { %v3466_v36 = vpop.f32.mrb[26].mxu1 }
 0xa91   : > { %v6730_v38 = vpop.f32.mrb[27].mxu1 }
 0xa92   : > { %v3975_v38 = vld [vmem:[#allocation11 + $0xd0] sm:$0xff] }
 0xa94   : > { %v3396_v39 = vpop.f32.mrb[68].mxu0  ;;  %v3698_v40 = vpop.f32.mrb[28].mxu1 }
 0xa95   : > { %v3467_v42 = vadd.f32 %v3466_v36, %v3396_v39  ;;  %v6695_v31 = vpop.f32.mrb[69].mxu0  ;;  %v6775_v45 = vpop.f32.mrb[29].mxu1  ;;  %6809 = vmatmul.mubr.f32.vlgmr.msra.gmra.mrb[30].mxu1 %v3698_v40  ;;  %v7716_v36 = vpack.c.bf16 %v3974_v35, %v3973_v34  ;;  %v3976_v39 = vld [vmem:[#allocation11 + $0xd8] sm:$0xff]  ;;  %v4367_v34 = vld [vmem:[#allocation11 + $0x1e8] sm:$0xff] }
 0xa96   : > { %6888 = vmatprep.mubr.msk.f32.mxu1 %vm8594_vm1, %v8592_v0  ;;  %7729 = vmatpush3.bf16.msra.mxu1 %v7728_v54  ;;  %v7719_v40 = vpack.c.bf16 %v3976_v39, %v3975_v38  ;;  %v3978_v31 = vld [vmem:[#allocation11 + $0xe8] sm:$0xff]  ;;  %v4354_v54 = vld [vmem:[#allocation11 + $0x180] sm:$0xff]  ;;  %v4209_v38 = vld [vmem:[#allocation11 + $0x178] sm:$0xff] }
 0xa97   : > { %7730 = vmatprep.subr.bf16.mxu1 %v8593_v1  ;;  %v7776_v55 = vpack.c.bf16 %v4355_v61, %v4354_v54 }
 0xa98   : > { %v3538_v46 = vpop.f32.mrb[70].mxu0 }
 0xa99   : > { %v6735_v47 = vpop.f32.mrb[71].mxu0  ;;  %6769 = vmatmul.mubr.f32.vlgmr.msra.gmra.mrb[72].mxu0 %v3538_v46  ;;  %v3979_v46 = vld [vmem:[#allocation11 + $0xf0] sm:$0xff] }
 0xa9a   : > { %6813 = vmatprep.mubr.msk.f32.mxu0 %vm8594_vm1, %v8592_v0  ;;  %7732 = vmatpush3.bf16.msra.mxu1 %v7731_v52  ;;  %v3980_v47 = vld [vmem:[#allocation11 + $0xf8] sm:$0xff]  ;;  %v4194_v52 = vld [vmem:[#allocation11 + $0x100] sm:$0xff] }
 0xa9b   : > { %7733 = vmatprep.subr.bf16.mxu1 %v8593_v1  ;;  %v7725_v49 = vpack.c.bf16 %v3980_v47, %v3979_v46  ;;  %v7752_v6 = vpack.c.bf16 %v4195_v53, %v4194_v52  ;;  %v4527_v53 = vld [vmem:[#allocation13] sm:$0xff] }
 0xa9e   : > { %7735 = vmatpush3.bf16.msra.mxu1 %v7734_v56 }
 0xa9f   : > { %7736 = vmatprep.subr.bf16.mxu1 %v8593_v1 }
 0xaa2   : > { %7738 = vmatpush3.bf16.msra.mxu1 %v7737_v60 }
 0xaa3   : > { %7739 = vmatprep.subr.bf16.mxu1 %v8593_v1 }
 0xaa6   : > { %7741 = vmatpush3.bf16.msra.mxu1 %v7740_v21  ;;  %v4197_v21 = vld [vmem:[#allocation11 + $0x118] sm:$0xff] }
 0xaa7   : > { %7742 = vmatprep.subr.bf16.mxu1 %v8593_v1  ;;  %v7755_v17 = vpack.c.bf16 %v4197_v21, %v4196_v11  ;;  %v4532_v11 = vld [vmem:[#allocation13 + $0x28] sm:$0xff] }
 0xaaa   : > { %7744 = vmatpush3.bf16.msra.mxu1 %v7743_v12  ;;  %v4359_v12 = vld [vmem:[#allocation11 + $0x1a8] sm:$0xff] }
 0xaab   : > { %7745 = vmatprep.subr.bf16.mxu1 %v8593_v1  ;;  %v7782_v37 = vpack.c.bf16 %v4359_v12, %v4358_v62  ;;  %v4534_v62 = vld [vmem:[#allocation13 + $0x38] sm:$0xff] }
 0xaae   : > { %7747 = vmatpush3.bf16.msra.mxu1 %v7746_v33  ;;  %v4199_v33 = vld [vmem:[#allocation11 + $0x128] sm:$0xff] }
 0xaaf   : > { %7748 = vmatprep.subr.bf16.mxu1 %v8593_v1 }
 0xab2   : > { %7750 = vmatpush3.bf16.msra.mxu1 %v7749_v44  ;;  %v4361_v44 = vld [vmem:[#allocation11 + $0x1b8] sm:$0xff] }
 0xab3   : > { %6931 = vmatprep.subr.mxu1 %v8592_v0 }
 0xb68   : > { %v3785_v63 = vpop.f32.mrb[30].mxu1 }
 0xb69   : > { %v6810_v3 = vpop.f32.mrb[31].mxu1 }
 0xb6a   : > { %v4200_v3 = vld [vmem:[#allocation11 + $0x130] sm:$0xff] }
 0xb6c   : > { %v3625_v4 = vpop.f32.mrb[72].mxu0 }
 0xb6d   : > { %v3629_v5 = vadd.f32 %v3625_v4, %v3467_v42  ;;  %v6770_v7 = vpop.f32.mrb[73].mxu0  ;;  %v3977_v42 = vld [vmem:[#allocation11 + $0xe0] sm:$0xff]  ;;  %v4201_v4 = vld [vmem:[#allocation11 + $0x138] sm:$0xff] }
 0xb6e   : > { %v7722_v45 = vpack.c.bf16 %v3978_v31, %v3977_v42  ;;  %v4362_v7 = vld [vmem:[#allocation11 + $0x1c0] sm:$0xff]  ;;  %v4369_v42 = vld [vmem:[#allocation11 + $0x1f8] sm:$0xff] }
 0xb6f   : > { %v3789_v13 = vadd.f32 %v3785_v63, %v3629_v5  ;;  %v7758_v63 = vpack.c.bf16 %v4199_v33, %v4198_v22  ;;  %v7785_v5 = vpack.c.bf16 %v4361_v44, %v4360_v41  ;;  %v4536_v22 = vld [vmem:[#allocation13 + $0x48] sm:$0xff]  ;;  %v4538_v41 = vld [vmem:[#allocation13 + $0x58] sm:$0xff] }
 0xb71   : > { %v3797_v14 = vadd.f32 %v5869_v8, %v3789_v13  ;;  %v4363_v8 = vld [vmem:[#allocation11 + $0x1c8] sm:$0xff]  ;;  %v7761_v13 = vpack.c.bf16 %v4201_v4, %v4200_v3 }
 0xb72   : > { %v7788_v18 = vpack.c.bf16 %v4363_v8, %v4362_v7  ;;  %v4540_v3 = vld [vmem:[#allocation13 + $0x68] sm:$0xff]  ;;  %v4542_v7 = vld [vmem:[#allocation13 + $0x78] sm:$0xff] }
 0xb73   : > { %v9517_v16 = vmax.f32 %v3797_v14, 0.0  ;;  %v4202_v14 = vld [vmem:[#allocation11 + $0x140] sm:$0xff] }
 0xb75   : > { %6812 = vmatpush3.msk.msra.mxu0 %vm3802_vm5, %v9517_v16 }
 0xb76   : > { %6814 = vmatmul.mubr.msk.f32.vlgmr.msra.gmra.mrb[74].mxu0 %vm3799_vm6, %v9148_v48  ;;  %6816 = vmatprep.subr.mxu0 %v8592_v0 }
 0xb77   : > { %6817 = vmatpush3.msk.msra.mxu0 %vm3802_vm5, %v9517_v16  ;;  %6818 = vmatprep.mubr.msk.f32.mxu0 %vm8594_vm1, %v8592_v0 }
 0xb78   : > { %7703 = vmatprep.subr.bf16.mxu0 %v8593_v1 }
 0xb7a   : > { %6819 = vmatmul.mubr.msk.f32.vlgmr.msra.gmra.mrb[76].mxu0 %vm3799_vm6, %v9187_v9 }
 0xb7b   : > { %7705 = vmatpush3.bf16.msra.mxu0 %v7704_v23  ;;  %6853 = vmatprep.mubr.msk.f32.mxu0 %vm8594_vm1, %v8592_v0  ;;  %v4204_v23 = vld [vmem:[#allocation11 + $0x150] sm:$0xff] }
 0xb7c   : > { %7706 = vmatprep.subr.bf16.mxu0 %v8593_v1  ;;  %v7767_v25 = vpack.c.bf16 %v4205_v24, %v4204_v23  ;;  %v5878_v23 = vld [vmem:[%s9816_s1] ss:$0 sm:$0xff] }
 0xb7f   : > { %7708 = vmatpush3.bf16.msra.mxu0 %v7707_v50  ;;  %v4364_v50 = vld [vmem:[#allocation11 + $0x1d0] sm:$0xff] }
 0xb80   : > { %7709 = vmatprep.subr.bf16.mxu0 %v8593_v1  ;;  %v7791_v27 = vpack.c.bf16 %v4365_v26, %v4364_v50  ;;  %v4616_v26 = vld [vmem:[#allocation13 + $0x80] sm:$0xff] }
 0xb83   : > { %7711 = vmatpush3.bf16.msra.mxu0 %v7710_v15  ;;  %v4206_v15 = vld [vmem:[#allocation11 + $0x160] sm:$0xff] }
 0xb84   : > { %7712 = vmatprep.subr.bf16.mxu0 %v8593_v1  ;;  %v7770_v29 = vpack.c.bf16 %v4207_v28, %v4206_v15  ;;  %v4618_v28 = vld [vmem:[#allocation13 + $0x90] sm:$0xff] }
 0xb87   : > { %7714 = vmatpush3.bf16.msra.mxu0 %v7713_v32  ;;  %v4366_v32 = vld [vmem:[#allocation11 + $0x1e0] sm:$0xff] }
 0xb88   : > { %7715 = vmatprep.subr.bf16.mxu0 %v8593_v1  ;;  %v7794_v35 = vpack.c.bf16 %v4367_v34, %v4366_v32  ;;  %v4621_v34 = vld [vmem:[#allocation13 + $0xa8] sm:$0xff] }
 0xb8b   : > { %7717 = vmatpush3.bf16.msra.mxu0 %v7716_v36  ;;  %v4208_v36 = vld [vmem:[#allocation11 + $0x170] sm:$0xff] }
 0xb8c   : > { %7718 = vmatprep.subr.bf16.mxu0 %v8593_v1  ;;  %v7773_v39 = vpack.c.bf16 %v4209_v38, %v4208_v36  ;;  %v4622_v36 = vld [vmem:[#allocation13 + $0xb0] sm:$0xff]  ;;  %v4623_v38 = vld [vmem:[#allocation13 + $0xb8] sm:$0xff] }
 0xb8f   : > { %7720 = vmatpush3.bf16.msra.mxu0 %v7719_v40  ;;  %v4368_v40 = vld [vmem:[#allocation11 + $0x1f0] sm:$0xff] }
 0xb90   : > { %7721 = vmatprep.subr.bf16.mxu0 %v8593_v1  ;;  %v7797_v31 = vpack.c.bf16 %v4369_v42, %v4368_v40  ;;  %v4625_v40 = vld [vmem:[#allocation13 + $0xc8] sm:$0xff] }
 0xb93   : > { %7723 = vmatpush3.bf16.msra.mxu0 %v7722_v45 }
 0xb94   : > { %7724 = vmatprep.subr.bf16.mxu0 %v8593_v1 }
 0xb97   : > { %7726 = vmatpush3.bf16.msra.mxu0 %v7725_v49 }
 0xb98   : > { %6891 = vmatprep.subr.mxu0 %v8592_v0 }
 0xc49   : > { %v3872_v43 = vpop.f32.mrb[74].mxu0 }
 0xc4a   : > { %v6815_v51 = vpop.f32.mrb[75].mxu0  ;;  %6889 = vmatmul.mubr.f32.vlgmr.msra.gmra.mrb[32].mxu1 %v3872_v43 }
 0xc4b   : > { %6932 = vmatpush3.msk.msra.mxu1 %vm3802_vm5, %v9517_v16  ;;  %6933 = vmatprep.mubr.msk.f32.mxu1 %vm8594_vm1, %v8592_v0 }
 0xc4c   : > { %7775 = vmatprep.subr.bf16.mxu1 %v8593_v1 }
 0xc4d   : > { %v3960_v56 = vpop.f32.mrb[76].mxu0 }
 0xc4e   : > { %v6820_v60 = vpop.f32.mrb[77].mxu0  ;;  %6854 = vmatmul.mubr.f32.vlgmr.msra.gmra.mrb[78].mxu0 %v3960_v56  ;;  %6934 = vmatmul.mubr.msk.f32.vlgmr.msra.gmra.mrb[34].mxu1 %vm3799_vm6, %v9285_v20 }
 0xc4f   : > { %6892 = vmatpush3.msk.msra.mxu0 %vm3802_vm5, %v9517_v16  ;;  %6893 = vmatprep.mubr.msk.f32.mxu0 %vm8594_vm1, %v8592_v0  ;;  %v4203_v16 = vld [vmem:[#allocation11 + $0x148] sm:$0xff]  ;;  %v7827_v60 = vpack.c.bf16 %v4530_v58, %v4529_v57  ;;  %v4847_v57 = vld [vmem:[#allocation13 + $0x110] sm:$0xff]  ;;  %v4848_v58 = vld [vmem:[#allocation13 + $0x118] sm:$0xff] }
 0xc50   : > { %7751 = vmatprep.subr.bf16.mxu0 %v8593_v1  ;;  %7777 = vmatpush3.bf16.msra.mxu1 %v7776_v55  ;;  %v7764_v19 = vpack.c.bf16 %v4203_v16, %v4202_v14  ;;  %v4528_v55 = vld [vmem:[#allocation13 + $0x8] sm:$0xff] }
 0xc51   : > { %7778 = vmatprep.subr.bf16.mxu1 %v8593_v1  ;;  %6968 = vmatprep.mubr.msk.f32.mxu1 %vm8594_vm1, %v8592_v0  ;;  %v7824_v56 = vpack.c.bf16 %v4528_v55, %v4527_v53  ;;  %v4846_v53 = vld [vmem:[#allocation13 + $0x108] sm:$0xff] }
 0xc52   : > { %6894 = vmatmul.mubr.msk.f32.vlgmr.msra.gmra.mrb[80].mxu0 %vm3799_vm6, %v9251_v59 }
 0xc53   : > { %7753 = vmatpush3.bf16.msra.mxu0 %v7752_v6  ;;  %6928 = vmatprep.mubr.msk.f32.mxu0 %vm8594_vm1, %v8592_v0  ;;  %v4531_v6 = vld [vmem:[#allocation13 + $0x20] sm:$0xff] }
 0xc54   : > { %7754 = vmatprep.subr.bf16.mxu0 %v8593_v1  ;;  %7780 = vmatpush3.bf16.msra.mxu1 %v7779_v30  ;;  %v7830_v21 = vpack.c.bf16 %v4532_v11, %v4531_v6  ;;  %v4533_v30 = vld [vmem:[#allocation13 + $0x30] sm:$0xff]  ;;  %v7851_v6 = vpack.c.bf16 %v4848_v58, %v4847_v57  ;;  %v5102_v57 = vld [vmem:[#allocation14 + $0x28] sm:$0xff]  ;;  %v5104_v58 = vld [vmem:[#allocation14 + $0x38] sm:$0xff] }
 0xc55   : > { %7781 = vmatprep.subr.bf16.mxu1 %v8593_v1  ;;  %v7833_v12 = vpack.c.bf16 %v4534_v62, %v4533_v30  ;;  %v4850_v30 = vld [vmem:[#allocation13 + $0x128] sm:$0xff] }
 0xc57   : > { %7756 = vmatpush3.bf16.msra.mxu0 %v7755_v17  ;;  %v4535_v17 = vld [vmem:[#allocation13 + $0x40] sm:$0xff] }
 0xc58   : > { %7757 = vmatprep.subr.bf16.mxu0 %v8593_v1  ;;  %7783 = vmatpush3.bf16.msra.mxu1 %v7782_v37  ;;  %v7836_v33 = vpack.c.bf16 %v4536_v22, %v4535_v17  ;;  %v4537_v37 = vld [vmem:[#allocation13 + $0x50] sm:$0xff]  ;;  %v5006_v17 = vld [vmem:[#allocation13 + $0x188] sm:$0xff] }
 0xc59   : > { %7784 = vmatprep.subr.bf16.mxu1 %v8593_v1  ;;  %v7839_v44 = vpack.c.bf16 %v4538_v41, %v4537_v37  ;;  %v4852_v37 = vld [vmem:[#allocation13 + $0x138] sm:$0xff] }
 0xc5b   : > { %7759 = vmatpush3.bf16.msra.mxu0 %v7758_v63  ;;  %v4539_v63 = vld [vmem:[#allocation13 + $0x60] sm:$0xff] }
 0xc5c   : > { %7760 = vmatprep.subr.bf16.mxu0 %v8593_v1  ;;  %7786 = vmatpush3.bf16.msra.mxu1 %v7785_v5  ;;  %v7842_v4 = vpack.c.bf16 %v4540_v3, %v4539_v63  ;;  %v4541_v5 = vld [vmem:[#allocation13 + $0x70] sm:$0xff]  ;;  %v5008_v63 = vld [vmem:[#allocation13 + $0x198] sm:$0xff] }
 0xc5d   : > { %7787 = vmatprep.subr.bf16.mxu1 %v8593_v1  ;;  %v7845_v8 = vpack.c.bf16 %v4542_v7, %v4541_v5  ;;  %v4854_v5 = vld [vmem:[#allocation13 + $0x148] sm:$0xff]  ;;  %v5009_v7 = vld [vmem:[#allocation13 + $0x1a0] sm:$0xff] }
 0xc5f   : > { %7762 = vmatpush3.bf16.msra.mxu0 %v7761_v13 }
 0xc60   : > { %7763 = vmatprep.subr.bf16.mxu0 %v8593_v1  ;;  %7789 = vmatpush3.bf16.msra.mxu1 %v7788_v18 }
 0xc61   : > { %7790 = vmatprep.subr.bf16.mxu1 %v8593_v1 }
 0xc63   : > { %7765 = vmatpush3.bf16.msra.mxu0 %v7764_v19 }
 0xc64   : > { %7766 = vmatprep.subr.bf16.mxu0 %v8593_v1  ;;  %7792 = vmatpush3.bf16.msra.mxu1 %v7791_v27  ;;  %v4617_v27 = vld [vmem:[#allocation13 + $0x88] sm:$0xff] }
 0xc65   : > { %7793 = vmatprep.subr.bf16.mxu1 %v8593_v1  ;;  %v7800_v15 = vpack.c.bf16 %v4617_v27, %v4616_v26  ;;  %v5013_v26 = vld [vmem:[#allocation13 + $0x1c0] sm:$0xff]  ;;  %v5014_v27 = vld [vmem:[#allocation13 + $0x1c8] sm:$0xff] }
 0xc67   : > { %7768 = vmatpush3.bf16.msra.mxu0 %v7767_v25 }
 0xc68   : > { %7769 = vmatprep.subr.bf16.mxu0 %v8593_v1  ;;  %7795 = vmatpush3.bf16.msra.mxu1 %v7794_v35 }
 0xc69   : > { %7796 = vmatprep.subr.bf16.mxu1 %v8593_v1 }
 0xc6b   : > { %7771 = vmatpush3.bf16.msra.mxu0 %v7770_v29  ;;  %v4619_v29 = vld [vmem:[#allocation13 + $0x98] sm:$0xff] }
 0xc6c   : > { %7772 = vmatprep.subr.bf16.mxu0 %v8593_v1  ;;  %7798 = vmatpush3.bf16.msra.mxu1 %v7797_v31  ;;  %v7803_v32 = vpack.c.bf16 %v4619_v29, %v4618_v28  ;;  %v4626_v31 = vld [vmem:[#allocation13 + $0xd0] sm:$0xff]  ;;  %v7884_v28 = vpack.c.bf16 %v5014_v27, %v5013_v26 }
 0xc6d   : > { %7823 = vmatprep.subr.bf16.mxu1 %v8593_v1  ;;  %v5015_v29 = vld [vmem:[#allocation13 + $0x1d0] sm:$0xff] }
 0xc6e   : > { %v5119_v26 = vld [vmem:[#allocation14 + $0xb0] sm:$0xff] }
 0xc6f   : > { %7774 = vmatpush3.bf16.msra.mxu0 %v7773_v39  ;;  %v7809_v39 = vpack.c.bf16 %v4623_v38, %v4622_v36  ;;  %v5017_v36 = vld [vmem:[#allocation13 + $0x1e0] sm:$0xff] }
 0xc70   : > { %6971 = vmatprep.subr.mxu0 %v8592_v0 }
 0xd1d   : > { %v4117_v45 = vpop.f32.mrb[32].mxu1 }
 0xd1e   : > { %v6890_v46 = vpop.f32.mrb[33].mxu1 }
 0xd21   : > { %v4047_v47 = vpop.f32.mrb[78].mxu0  ;;  %v4349_v49 = vpop.f32.mrb[34].mxu1 }
 0xd22   : > { %v4118_v43 = vadd.f32 %v4117_v45, %v4047_v47  ;;  %v6855_v54 = vpop.f32.mrb[79].mxu0  ;;  %v6935_v61 = vpop.f32.mrb[35].mxu1  ;;  %6969 = vmatmul.mubr.f32.vlgmr.msra.gmra.mrb[36].mxu1 %v4349_v49  ;;  %v4627_v45 = vld [vmem:[#allocation13 + $0xd8] sm:$0xff]  ;;  %v4628_v47 = vld [vmem:[#allocation13 + $0xe0] sm:$0xff]  ;;  %v4629_v49 = vld [vmem:[#allocation13 + $0xe8] sm:$0xff] }
 0xd23   : > { %7048 = vmatprep.mubr.msk.f32.mxu1 %vm8594_vm1, %v8592_v0  ;;  %7825 = vmatpush3.bf16.msra.mxu1 %v7824_v56  ;;  %v7815_v46 = vpack.c.bf16 %v4627_v45, %v4626_v31  ;;  %v4630_v54 = vld [vmem:[#allocation13 + $0xf0] sm:$0xff]  ;;  %v4631_v61 = vld [vmem:[#allocation13 + $0xf8] sm:$0xff]  ;;  %v5130_v45 = vld [vmem:[%s9817_s0 + $0x8] sm:$0xff] }
 0xd24   : > { %7826 = vmatprep.subr.bf16.mxu1 %v8593_v1 }
 0xd25   : > { %v4189_v51 = vpop.f32.mrb[80].mxu0 }
 0xd26   : > { %v6895_v52 = vpop.f32.mrb[81].mxu0  ;;  %6929 = vmatmul.mubr.f32.vlgmr.msra.gmra.mrb[82].mxu0 %v4189_v51  ;;  %v7821_v51 = vpack.c.bf16 %v4631_v61, %v4630_v54  ;;  %v5100_v54 = vld [vmem:[#allocation14 + $0x18] sm:$0xff] }
 0xd27   : > { %6973 = vmatprep.mubr.msk.f32.mxu0 %vm8594_vm1, %v8592_v0  ;;  %7828 = vmatpush3.bf16.msra.mxu1 %v7827_v60  ;;  %v4845_v52 = vld [vmem:[#allocation13 + $0x100] sm:$0xff] }
 0xd28   : > { %7829 = vmatprep.subr.bf16.mxu1 %v8593_v1  ;;  %v7848_v55 = vpack.c.bf16 %v4846_v53, %v4845_v52  ;;  %v5097_v53 = vld [vmem:[#allocation14] sm:$0xff] }
 0xd2b   : > { %7831 = vmatpush3.bf16.msra.mxu1 %v7830_v21  ;;  %v4849_v21 = vld [vmem:[#allocation13 + $0x120] sm:$0xff] }
 0xd2c   : > { %7832 = vmatprep.subr.bf16.mxu1 %v8593_v1  ;;  %v7854_v22 = vpack.c.bf16 %v4850_v30, %v4849_v21  ;;  %v7899_v21 = vpack.c.bf16 %v5104_v58, %v5102_v57  ;;  %v5101_v30 = vld [vmem:[#allocation14 + $0x20] sm:$0xff] }
 0xd2d   : > { %v5300_v58 = vld [vmem:[#allocation16 + $0x40] sm:$0xff] }
 0xd2f   : > { %7834 = vmatpush3.bf16.msra.mxu1 %v7833_v12  ;;  %v5005_v12 = vld [vmem:[#allocation13 + $0x180] sm:$0xff] }
 0xd30   : > { %7835 = vmatprep.subr.bf16.mxu1 %v8593_v1  ;;  %v7872_v41 = vpack.c.bf16 %v5006_v17, %v5005_v12  ;;  %v5106_v17 = vld [vmem:[#allocation14 + $0x48] sm:$0xff] }
 0xd33   : > { %7837 = vmatpush3.bf16.msra.mxu1 %v7836_v33  ;;  %v4851_v33 = vld [vmem:[#allocation13 + $0x130] sm:$0xff] }
 0xd34   : > { %7838 = vmatprep.subr.bf16.mxu1 %v8593_v1  ;;  %v7857_v3 = vpack.c.bf16 %v4852_v37, %v4851_v33 }
 0xd37   : > { %7840 = vmatpush3.bf16.msra.mxu1 %v7839_v44  ;;  %v5007_v44 = vld [vmem:[#allocation13 + $0x190] sm:$0xff] }
 0xd38   : > { %7841 = vmatprep.subr.bf16.mxu1 %v8593_v1 }
 0xd3b   : > { %7843 = vmatpush3.bf16.msra.mxu1 %v7842_v4  ;;  %v4853_v4 = vld [vmem:[#allocation13 + $0x140] sm:$0xff] }
 0xd3c   : > { %7844 = vmatprep.subr.bf16.mxu1 %v8593_v1 }
 0xd3f   : > { %7846 = vmatpush3.bf16.msra.mxu1 %v7845_v8  ;;  %v5010_v8 = vld [vmem:[#allocation13 + $0x1a8] sm:$0xff] }
 0xd40   : > { %7847 = vmatprep.subr.bf16.mxu1 %v8593_v1 }
 0xdf5   : > { %v4436_v13 = vpop.f32.mrb[36].mxu1 }
 0xdf6   : > { %v6970_v14 = vpop.f32.mrb[37].mxu1 }
 0xdf7   : > { %v4855_v14 = vld [vmem:[#allocation13 + $0x150] sm:$0xff] }
 0xdf9   : > { %v4276_v16 = vpop.f32.mrb[82].mxu0 }
 0xdfa   : > { %v4280_v18 = vadd.f32 %v4276_v16, %v4118_v43  ;;  %v6930_v19 = vpop.f32.mrb[83].mxu0  ;;  %v7818_v43 = vpack.c.bf16 %v4629_v49, %v4628_v47  ;;  %v4856_v16 = vld [vmem:[#allocation13 + $0x158] sm:$0xff] }
 0xdfb   : > { %v5012_v19 = vld [vmem:[#allocation13 + $0x1b8] sm:$0xff] }
 0xdfc   : > { %v4440_v24 = vadd.f32 %v4436_v13, %v4280_v18  ;;  %v7860_v13 = vpack.c.bf16 %v4854_v5, %v4853_v4  ;;  %v7878_v18 = vpack.c.bf16 %v5010_v8, %v5009_v7  ;;  %v5112_v4 = vld [vmem:[#allocation14 + $0x78] sm:$0xff]  ;;  %v5109_v7 = vld [vmem:[#allocation14 + $0x60] sm:$0xff]  ;;  %v5111_v8 = vld [vmem:[#allocation14 + $0x70] sm:$0xff] }
 0xdfe   : > { %v4448_v25 = vadd.f32 %v5878_v23, %v4440_v24  ;;  %v7863_v23 = vpack.c.bf16 %v4856_v16, %v4855_v14  ;;  %v4857_v24 = vld [vmem:[#allocation13 + $0x160] sm:$0xff]  ;;  %v5116_v14 = vld [vmem:[#allocation14 + $0x98] sm:$0xff]  ;;  %v7909_v16 = vpack.c.bf16 %v5111_v8, %v5109_v7  ;;  %v5314_v7 = vld [vmem:[#allocation16 + $0xb0] sm:$0xff] }
 0xdff   : > { %v5317_v8 = vld [vmem:[#allocation16 + $0xc8] sm:$0xff] }
 0xe00   : > { %v9590_v50 = vmax.f32 %v4448_v25, 0.0  ;;  %v4858_v25 = vld [vmem:[#allocation13 + $0x168] sm:$0xff] }
 0xe02   : > { %6972 = vmatpush3.msk.msra.mxu0 %vm4453_vm7, %v9590_v50 }
 0xe03   : > { %6974 = vmatmul.mubr.msk.f32.vlgmr.msra.gmra.mrb[84].mxu0 %vm4450_vm8, %v9148_v48  ;;  %6976 = vmatprep.subr.mxu0 %v8592_v0  ;;  %v4620_v48 = vld [vmem:[#allocation13 + $0xa0] sm:$0xff] }
 0xe04   : > { %6977 = vmatpush3.msk.msra.mxu0 %vm4453_vm7, %v9590_v50  ;;  %6978 = vmatprep.mubr.msk.f32.mxu0 %vm8594_vm1, %v8592_v0  ;;  %v7806_v35 = vpack.c.bf16 %v4621_v34, %v4620_v48  ;;  %v4859_v34 = vld [vmem:[#allocation13 + $0x170] sm:$0xff] }
 0xe05   : > { %7799 = vmatprep.subr.bf16.mxu0 %v8593_v1 }
 0xe07   : > { %6979 = vmatmul.mubr.msk.f32.vlgmr.msra.gmra.mrb[86].mxu0 %vm4450_vm8, %v9187_v9  ;;  %v4624_v9 = vld [vmem:[#allocation13 + $0xc0] sm:$0xff] }
 0xe08   : > { %7801 = vmatpush3.bf16.msra.mxu0 %v7800_v15  ;;  %7013 = vmatprep.mubr.msk.f32.mxu0 %vm8594_vm1, %v8592_v0  ;;  %v7812_v42 = vpack.c.bf16 %v4625_v40, %v4624_v9  ;;  %v7866_v15 = vpack.c.bf16 %v4858_v25, %v4857_v24  ;;  %v5019_v40 = vld [vmem:[#allocation13 + $0x1f0] sm:$0xff] }
 0xe09   : > { %7802 = vmatprep.subr.bf16.mxu0 %v8593_v1 }
 0xe0c   : > { %7804 = vmatpush3.bf16.msra.mxu0 %v7803_v32  ;;  %v5016_v32 = vld [vmem:[#allocation13 + $0x1d8] sm:$0xff] }
 0xe0d   : > { %7805 = vmatprep.subr.bf16.mxu0 %v8593_v1  ;;  %v7887_v48 = vpack.c.bf16 %v5016_v32, %v5015_v29  ;;  %v5121_v32 = vld [vmem:[#allocation14 + $0xc0] sm:$0xff] }
 0xe10   : > { %7807 = vmatpush3.bf16.msra.mxu0 %v7806_v35  ;;  %v4860_v35 = vld [vmem:[#allocation13 + $0x178] sm:$0xff] }
 0xe11   : > { %7808 = vmatprep.subr.bf16.mxu0 %v8593_v1  ;;  %v7869_v38 = vpack.c.bf16 %v4860_v35, %v4859_v34  ;;  %v5126_v35 = vld [vmem:[#allocation14 + $0xe8] sm:$0xff] }
 0xe14   : > { %7810 = vmatpush3.bf16.msra.mxu0 %v7809_v39  ;;  %v5018_v39 = vld [vmem:[#allocation13 + $0x1e8] sm:$0xff] }
 0xe15   : > { %7811 = vmatprep.subr.bf16.mxu0 %v8593_v1  ;;  %v7890_v9 = vpack.c.bf16 %v5018_v39, %v5017_v36  ;;  %v5128_v36 = vld [vmem:[#allocation14 + $0xf8] sm:$0xff]  ;;  %v5125_v39 = vld [vmem:[#allocation14 + $0xe0] sm:$0xff] }
 0xe18   : > { %7813 = vmatpush3.bf16.msra.mxu0 %v7812_v42  ;;  %v5020_v42 = vld [vmem:[#allocation13 + $0x1f8] sm:$0xff] }
 0xe19   : > { %7814 = vmatprep.subr.bf16.mxu0 %v8593_v1  ;;  %v7893_v31 = vpack.c.bf16 %v5020_v42, %v5019_v40  ;;  %v5293_v42 = vld [vmem:[#allocation16 + $0x8] sm:$0xff] }
 0xe1c   : > { %7816 = vmatpush3.bf16.msra.mxu0 %v7815_v46 }
 0xe1d   : > { %7817 = vmatprep.subr.bf16.mxu0 %v8593_v1 }
 0xe20   : > { %7819 = vmatpush3.bf16.msra.mxu0 %v7818_v43  ;;  %v5098_v43 = vld [vmem:[#allocation14 + $0x8] sm:$0xff] }
 0xe21   : > { %7820 = vmatprep.subr.bf16.mxu0 %v8593_v1  ;;  %v7895_v52 = vpack.c.bf16 %v5100_v54, %v5098_v43  ;;  %v5299_v43 = vld [vmem:[#allocation16 + $0x38] sm:$0xff] }
 0xe24   : > { %7822 = vmatpush3.bf16.msra.mxu0 %v7821_v51 }
 0xe25   : > { %7051 = vmatprep.subr.mxu0 %v8592_v0 }
 0xed6   : > { %v4523_v56 = vpop.f32.mrb[84].mxu0 }
 0xed7   : > { %v6975_v60 = vpop.f32.mrb[85].mxu0  ;;  %7049 = vmatmul.mubr.f32.vlgmr.msra.gmra.mrb[38].mxu1 %v4523_v56 }
 0xed8   : > { %7849 = vmatpush3.bf16.msra.mxu1 %v7848_v55  ;;  %7088 = vmatprep.mubr.msk.f32.mxu1 %vm8594_vm1, %v8592_v0  ;;  %v5099_v55 = vld [vmem:[#allocation14 + $0x10] sm:$0xff] }
 0xed9   : > { %7850 = vmatprep.subr.bf16.mxu1 %v8593_v1 }
 0xeda   : > { %v4611_v11 = vpop.f32.mrb[86].mxu0 }
 0xedb   : > { %7014 = vmatmul.mubr.f32.vlgmr.msra.gmra.mrb[88].mxu0 %v4611_v11  ;;  %v6980_v62 = vpop.f32.mrb[87].mxu0  ;;  %v7897_v11 = vpack.c.bf16 %v5099_v55, %v5097_v53  ;;  %v5301_v53 = vld [vmem:[#allocation16 + $0x48] sm:$0xff]  ;;  %v5303_v55 = vld [vmem:[#allocation16 + $0x58] sm:$0xff] }
 0xedc   : > { %7052 = vmatpush3.msk.msra.mxu0 %vm4453_vm7, %v9590_v50  ;;  %7053 = vmatprep.mubr.msk.f32.mxu0 %vm8594_vm1, %v8592_v0  ;;  %v5103_v62 = vld [vmem:[#allocation14 + $0x30] sm:$0xff]  ;;  %v7935_v57 = vpack.c.bf16 %v5303_v55, %v5301_v53  ;;  %v5343_v53 = vld [vmem:[#allocation16 + $0x198] sm:$0xff] }
 0xedd   : > { %7091 = vmatprep.subr.mxu0 %v8592_v0  ;;  %7852 = vmatpush3.bf16.msra.mxu1 %v7851_v6  ;;  %v5096_v6 = vld [vmem:[%s819_s3] sm:$0x1]  ;;  %v7901_v37 = vpack.c.bf16 %v5103_v62, %v5101_v30  ;;  %s5817_s3 = sshll.u32 %s9054_s10, 1 }
 0xede   : > { %7853 = vmatprep.subr.bf16.mxu1 %v8593_v1  ;;  %v5304_v62 = vld [vmem:[#allocation16 + $0x60] sm:$0xff]  ;;  %s816_s30 = scalar_lea.vmem [#allocation19], %s5817_s3 }
 0xedf   : > { %7054 = vmatmul.mubr.msk.f32.vlgmr.msra.gmra.mrb[90].mxu0 %vm4450_vm8, %v9251_v59  ;;  %v7875_v59 = vpack.c.bf16 %v5008_v63, %v5007_v44  ;;  %v5105_v44 = vld [vmem:[#allocation14 + $0x40] sm:$0xff]  ;;  %v5107_v63 = vld [vmem:[#allocation14 + $0x50] sm:$0xff] }
 0xee0   : > { %7092 = vmatpush3.msk.msra.mxu0 %vm4453_vm7, %v9590_v50  ;;  %7093 = vmatprep.mubr.msk.f32.mxu0 %vm8594_vm1, %v8592_v0  ;;  %v7905_v5 = vpack.c.bf16 %v5107_v63, %v5105_v44  ;;  %v5310_v44 = vld [vmem:[#allocation16 + $0x90] sm:$0xff]  ;;  %v5313_v63 = vld [vmem:[#allocation16 + $0xa8] sm:$0xff] }
 0xee1   : > { %7871 = vmatprep.subr.bf16.mxu0 %v8593_v1  ;;  %7855 = vmatpush3.bf16.msra.mxu1 %v7854_v22  ;;  %v5108_v22 = vld [vmem:[#allocation14 + $0x58] sm:$0xff] }
 0xee2   : > { %7856 = vmatprep.subr.bf16.mxu1 %v8593_v1 }
 0xee3   : > { %7094 = vmatmul.mubr.msk.f32.vlgmr.msra.gmra.mrb[92].mxu0 %vm4450_vm8, %v9285_v20  ;;  %v5011_v20 = vld [vmem:[#allocation13 + $0x1b0] sm:$0xff] }
 0xee4   : > { %7873 = vmatpush3.bf16.msra.mxu0 %v7872_v41  ;;  %7128 = vmatprep.mubr.msk.f32.mxu0 %vm8594_vm1, %v8592_v0  ;;  %v7881_v50 = vpack.c.bf16 %v5012_v19, %v5011_v20  ;;  %v7903_v41 = vpack.c.bf16 %v5108_v22, %v5106_v17  ;;  %v5113_v20 = vld [vmem:[#allocation14 + $0x80] sm:$0xff]  ;;  %v5118_v19 = vld [vmem:[#allocation14 + $0xa8] sm:$0xff]  ;;  %v5311_v22 = vld [vmem:[#allocation16 + $0x98] sm:$0xff] }
 0xee5   : > { %7874 = vmatprep.subr.bf16.mxu0 %v8593_v1  ;;  %7858 = vmatpush3.bf16.msra.mxu1 %v7857_v3  ;;  %v5110_v3 = vld [vmem:[#allocation14 + $0x68] sm:$0xff] }
 0xee6   : > { %7859 = vmatprep.subr.bf16.mxu1 %v8593_v1  ;;  %v5309_v17 = vld [vmem:[#allocation16 + $0x88] sm:$0xff] }
 0xee8   : > { %7876 = vmatpush3.bf16.msra.mxu0 %v7875_v59  ;;  %v7907_v59 = vpack.c.bf16 %v5112_v4, %v5110_v3  ;;  %v5315_v3 = vld [vmem:[#allocation16 + $0xb8] sm:$0xff] }
 0xee9   : > { %7877 = vmatprep.subr.bf16.mxu0 %v8593_v1  ;;  %7861 = vmatpush3.bf16.msra.mxu1 %v7860_v13  ;;  %v5114_v13 = vld [vmem:[#allocation14 + $0x88] sm:$0xff] }
 0xeea   : > { %7862 = vmatprep.subr.bf16.mxu1 %v8593_v1 }
 0xeec   : > { %7879 = vmatpush3.bf16.msra.mxu0 %v7878_v18  ;;  %v7911_v18 = vpack.c.bf16 %v5116_v14, %v5114_v13  ;;  %v5319_v13 = vld [vmem:[#allocation16 + $0xd8] sm:$0xff] }
 0xeed   : > { %7880 = vmatprep.subr.bf16.mxu0 %v8593_v1  ;;  %7864 = vmatpush3.bf16.msra.mxu1 %v7863_v23  ;;  %v5120_v23 = vld [vmem:[#allocation14 + $0xb8] sm:$0xff] }
 0xeee   : > { %7865 = vmatprep.subr.bf16.mxu1 %v8593_v1  ;;  %v7915_v25 = vpack.c.bf16 %v5120_v23, %v5118_v19  ;;  %v5323_v19 = vld [vmem:[#allocation16 + $0xf8] sm:$0xff] }
 0xef0   : > { %7882 = vmatpush3.bf16.msra.mxu0 %v7881_v50  ;;  %v5117_v50 = vld [vmem:[#allocation14 + $0xa0] sm:$0xff] }
 0xef1   : > { %7883 = vmatprep.subr.bf16.mxu0 %v8593_v1  ;;  %7867 = vmatpush3.bf16.msra.mxu1 %v7866_v15  ;;  %v7917_v27 = vpack.c.bf16 %v5119_v26, %v5117_v50  ;;  %v5122_v15 = vld [vmem:[#allocation14 + $0xc8] sm:$0xff]  ;;  %v5322_v50 = vld [vmem:[#allocation16 + $0xf0] sm:$0xff] }
 0xef2   : > { %7868 = vmatprep.subr.bf16.mxu1 %v8593_v1  ;;  %v5325_v26 = vld [vmem:[#allocation16 + $0x108] sm:$0xff] }
 0xef4   : > { %7885 = vmatpush3.bf16.msra.mxu0 %v7884_v28  ;;  %v5124_v28 = vld [vmem:[#allocation14 + $0xd8] sm:$0xff] }
 0xef5   : > { %7886 = vmatprep.subr.bf16.mxu0 %v8593_v1  ;;  %7870 = vmatpush3.bf16.msra.mxu1 %v7869_v38  ;;  %v7919_v29 = vpack.c.bf16 %v5124_v28, %v5122_v15  ;;  %v7923_v38 = vpack.c.bf16 %v5128_v36, %v5126_v35 }
 0xef6   : > { %5134 = vmatprep.subr.mxu1 %v5130_v45  ;;  %v5292_v45 = vld [vmem:[#allocation16] sm:$0xff] }
 0xef8   : > { %7888 = vmatpush3.bf16.msra.mxu0 %v7887_v48  ;;  %v5123_v48 = vld [vmem:[#allocation14 + $0xd0] sm:$0xff] }
 0xef9   : > { %7889 = vmatprep.subr.bf16.mxu0 %v8593_v1  ;;  %v7921_v34 = vpack.c.bf16 %v5123_v48, %v5121_v32  ;;  %v5326_v32 = vld [vmem:[#allocation16 + $0x110] sm:$0xff]  ;;  %v5329_v48 = vld [vmem:[#allocation16 + $0x128] sm:$0xff] }
 0xefc   : > { %7891 = vmatpush3.bf16.msra.mxu0 %v7890_v9  ;;  %v5127_v9 = vld [vmem:[#allocation14 + $0xf0] sm:$0xff] }
 0xefd   : > { %7892 = vmatprep.subr.bf16.mxu0 %v8593_v1  ;;  %v5129_v1 = vld [vmem:[%s9817_s0] sm:$0xff]  ;;  %v7925_v40 = vpack.c.bf16 %v5127_v9, %v5125_v39  ;;  %v5330_v39 = vld [vmem:[#allocation16 + $0x130] sm:$0xff]  ;;  %v5333_v9 = vld [vmem:[#allocation16 + $0x148] sm:$0xff] }
 0xf00   : > { %7894 = vmatpush3.bf16.msra.mxu0 %v7893_v31  ;;  %v5295_v31 = vld [vmem:[#allocation16 + $0x18] sm:$0xff] }
 0xfaa   : > { %v4768_v46 = vpop.f32.mrb[38].mxu1 }
 0xfab   : > { %v7050_v47 = vpop.f32.mrb[39].mxu1 }
 0xfac   : > { %v5294_v47 = vld [vmem:[#allocation16 + $0x10] sm:$0xff] }
 0xfad   : > { %v7929_v54 = vpack.c.bf16 %v5294_v47, %v5292_v45  ;;  %v5332_v45 = vld [vmem:[#allocation16 + $0x140] sm:$0xff]  ;;  %v5337_v47 = vld [vmem:[#allocation16 + $0x168] sm:$0xff] }
 0xfae   : > { %v4698_v49 = vpop.f32.mrb[88].mxu0 }
 0xfaf   : > { %v9651_v61 = vadd.f32 %v4768_v46, %v4698_v49  ;;  %v7015_v51 = vpop.f32.mrb[89].mxu0  ;;  %v7927_v46 = vpack.c.bf16 %v5295_v31, %v5293_v42  ;;  %v5297_v49 = vld [vmem:[#allocation16 + $0x28] sm:$0xff] }
 0xfb0   : > { %v7931_v51 = vpack.c.bf16 %v5299_v43, %v5297_v49  ;;  %v5339_v49 = vld [vmem:[#allocation16 + $0x178] sm:$0xff] }
 0xfb1   : > { %7928 = vmatprep.subr.bf16.mxu0 %v7927_v46  ;;  %v5334_v46 = vld [vmem:[#allocation16 + $0x150] sm:$0xff] }
 0xfb2   : > { %v4840_v56 = vpop.f32.mrb[90].mxu0  ;;  %v7969_v43 = vpack.c.bf16 %v5334_v46, %v5332_v45  ;;  %v5453_v46 = vld [vmem:[#allocation17 + $0x60] sm:$0xff] }
 0xfb3   : > { %7089 = vmatmul.mubr.f32.vlgmr.msra.gmra.mrb[40].mxu1 %v4840_v56  ;;  %v7055_v60 = vpop.f32.mrb[91].mxu0 }
 0xfb4   : > { %5135 = vmatpush1.msra.mxu1 %v5129_v1  ;;  %5198 = vmatprep.mubr.f32.mxu1 %v8592_v0  ;;  %v5296_v1 = vld [vmem:[#allocation16 + $0x20] sm:$0xff]  ;;  %v5302_v60 = vld [vmem:[#allocation16 + $0x50] sm:$0xff] }
 0xfb5   : > { %7896 = vmatprep.subr.bf16.mxu1 %v7895_v52  ;;  %v5298_v52 = vld [vmem:[#allocation16 + $0x30] sm:$0xff] }
 0xfb6   : > { %v5000_v12 = vpop.f32.mrb[92].mxu0  ;;  %v7933_v56 = vpack.c.bf16 %v5298_v52, %v5296_v1  ;;  %v5338_v1 = vld [vmem:[#allocation16 + $0x170] sm:$0xff]  ;;  %v5341_v52 = vld [vmem:[#allocation16 + $0x188] sm:$0xff] }
 0xfb7   : > { %7129 = vmatmul.mubr.f32.vlgmr.msra.gmra.mrb[94].mxu0 %v5000_v12  ;;  %v7095_v33 = vpop.f32.mrb[93].mxu0  ;;  %5887 = vmatmul.mubr.msk.f32.vlgmr.msra.gmra.mrb[42].mxu1 %vm3152_vm4, %v5096_v6  ;;  %v5305_v6 = vld [vmem:[#allocation16 + $0x68] sm:$0xff]  ;;  %v5306_v12 = vld [vmem:[#allocation16 + $0x70] sm:$0xff] }
 0xfb8   : > { %7898 = vmatpush1.bf16.msra.mxu1 %v7897_v11  ;;  %5269 = vmatprep.mubr.f32.mxu1 %v8592_v0  ;;  %v5115_v0 = vld [vmem:[#allocation14 + $0x90] sm:$0xff]  ;;  %v5307_v11 = vld [vmem:[#allocation16 + $0x78] sm:$0xff]  ;;  %v7941_v33 = vpack.c.bf16 %v5306_v12, %v5304_v62  ;;  %v5349_v12 = vld [vmem:[#allocation16 + $0x1c8] sm:$0xff] }
 0xfb9   : > { %7900 = vmatprep.subr.bf16.mxu1 %v7899_v21  ;;  %v7913_v24 = vpack.c.bf16 %v5115_v0, %v5113_v20  ;;  %7930 = vmatpush1.bf16.msra.mxu0 %v7929_v54  ;;  %v7937_v21 = vpack.c.bf16 %v5302_v60, %v5300_v58  ;;  %v7939_v30 = vpack.c.bf16 %v5307_v11, %v5305_v6  ;;  %v5318_v20 = vld [vmem:[#allocation16 + $0xd0] sm:$0xff]  ;;  %v5321_v0 = vld [vmem:[#allocation16 + $0xe8] sm:$0xff]  ;;  %v5347_v6 = vld [vmem:[#allocation16 + $0x1b8] sm:$0xff] }
 0xfba   : > { %7932 = vmatprep.subr.bf16.mxu0 %v7931_v51  ;;  %v7971_v54 = vpack.c.bf16 %v5339_v49, %v5337_v47  ;;  %v5336_v51 = vld [vmem:[#allocation16 + $0x160] sm:$0xff]  ;;  %v5342_v58 = vld [vmem:[#allocation16 + $0x190] sm:$0xff]  ;;  %v5345_v60 = vld [vmem:[#allocation16 + $0x1a8] sm:$0xff] }
 0xfbb   : > { %v7973_v55 = vpack.c.bf16 %v5338_v1, %v5336_v51  ;;  %v5346_v62 = vld [vmem:[#allocation16 + $0x1b0] sm:$0xff]  ;;  %v5458_v49 = vld [vmem:[#allocation17 + $0x88] sm:$0xff]  ;;  %v5457_v1 = vld [vmem:[#allocation17 + $0x80] sm:$0xff] }
 0xfbc   : > { %7902 = vmatpush1.bf16.msra.mxu1 %v7901_v37  ;;  %v7943_v37 = vpack.c.bf16 %v5311_v22, %v5309_v17  ;;  %v5351_v17 = vld [vmem:[#allocation16 + $0x1d8] sm:$0xff]  ;;  %v5455_v47 = vld [vmem:[#allocation17 + $0x70] sm:$0xff] }
 0xfbd   : > { %7904 = vmatprep.subr.bf16.mxu1 %v7903_v41  ;;  %7934 = vmatpush1.bf16.msra.mxu0 %v7933_v56  ;;  %v5308_v41 = vld [vmem:[#allocation16 + $0x80] sm:$0xff]  ;;  %v7975_v56 = vpack.c.bf16 %v5343_v53, %v5341_v52  ;;  %v5459_v52 = vld [vmem:[#allocation17 + $0x90] sm:$0xff]  ;;  %v5462_v53 = vld [vmem:[#allocation17 + $0xa8] sm:$0xff] }
 0xfbe   : > { %7936 = vmatprep.subr.bf16.mxu0 %v7935_v57  ;;  %v7945_v4 = vpack.c.bf16 %v5310_v44, %v5308_v41  ;;  %v5340_v57 = vld [vmem:[#allocation16 + $0x180] sm:$0xff] }
 0xfbf   : > { %v7977_v11 = vpack.c.bf16 %v5342_v58, %v5340_v57  ;;  %v5461_v58 = vld [vmem:[#allocation17 + $0xa0] sm:$0xff] }
 0xfc0   : > { %7906 = vmatpush1.bf16.msra.mxu1 %v7905_v5  ;;  %v7947_v5 = vpack.c.bf16 %v5315_v3, %v5313_v63  ;;  %v5092_v3 = vld [vmem:[%s9819_s11] sm:$0x1]  ;;  %s5626_s11 = sshll.u32 %s816_s30, 4  ;;  %s9686_s11 = int_to_ptr.vmem [resolvable:$true] %s5626_s11 }
 0xfc1   : > { %7908 = vmatprep.subr.bf16.mxu1 %v7907_v59  ;;  %7938 = vmatpush1.bf16.msra.mxu0 %v7937_v21  ;;  %v5312_v59 = vld [vmem:[#allocation16 + $0xa0] sm:$0xff]  ;;  %v7979_v21 = vpack.c.bf16 %v5347_v6, %v5345_v60  ;;  %v5463_v60 = vld [vmem:[#allocation17 + $0xb0] sm:$0xff]  ;;  %v5466_v6 = vld [vmem:[#allocation17 + $0xc8] sm:$0xff]  ;;  %p8497_p10 = scmp.lt.s32.totalorder %s9686_s11, %s8495_s20 }
 0xfc2   : > { %7940 = vmatprep.subr.bf16.mxu0 %v7939_v30  ;;  %v7949_v14 = vpack.c.bf16 %v5314_v7, %v5312_v59  ;;  %v5344_v30 = vld [vmem:[#allocation16 + $0x1a0] sm:$0xff] }
 0xfc3   : > { %v7981_v22 = vpack.c.bf16 %v5346_v62, %v5344_v30  ;;  %v5465_v62 = vld [vmem:[#allocation17 + $0xc0] sm:$0xff] }
 0xfc4   : > { %7910 = vmatpush1.bf16.msra.mxu1 %v7909_v16  ;;  %v7951_v16 = vpack.c.bf16 %v5319_v13, %v5317_v8  ;;  %v5348_v8 = vld [vmem:[#allocation16 + $0x1c0] sm:$0xff]  ;;  %v5350_v13 = vld [vmem:[#allocation16 + $0x1d0] sm:$0xff] }
 0xfc5   : > { %7912 = vmatprep.subr.bf16.mxu1 %v7911_v18  ;;  %7942 = vmatpush1.bf16.msra.mxu0 %v7941_v33  ;;  %v5316_v18 = vld [vmem:[#allocation16 + $0xc0] sm:$0xff]  ;;  %v7983_v33 = vpack.c.bf16 %v5351_v17, %v5349_v12  ;;  %v5467_v12 = vld [vmem:[#allocation17 + $0xd0] sm:$0xff]  ;;  %v5470_v17 = vld [vmem:[#allocation17 + $0xe8] sm:$0xff] }
 0xfc6   : > { %7944 = vmatprep.subr.bf16.mxu0 %v7943_v37  ;;  %v7953_v23 = vpack.c.bf16 %v5318_v20, %v5316_v18  ;;  %v5355_v18 = vld [vmem:[#allocation16 + $0x1f8] sm:$0xff] }
 0xfc8   : > { %7914 = vmatpush1.bf16.msra.mxu1 %v7913_v24  ;;  %v7955_v24 = vpack.c.bf16 %v5323_v19, %v5321_v0  ;;  %v5352_v0 = vld [vmem:[#allocation16 + $0x1e0] sm:$0xff] }
 0xfc9   : > { %7916 = vmatprep.subr.bf16.mxu1 %v7915_v25  ;;  %7946 = vmatpush1.bf16.msra.mxu0 %v7945_v4  ;;  %v5320_v25 = vld [vmem:[#allocation16 + $0xe0] sm:$0xff] }
 0xfca   : > { %7948 = vmatprep.subr.bf16.mxu0 %v7947_v5  ;;  %v7957_v15 = vpack.c.bf16 %v5322_v50, %v5320_v25  ;;  %v5441_v25 = vld [vmem:[#allocation17] sm:$0xff] }
 0xfcc   : > { %7918 = vmatpush1.bf16.msra.mxu1 %v7917_v27  ;;  %v5327_v27 = vld [vmem:[#allocation16 + $0x118] sm:$0xff] }
 0xfcd   : > { %7920 = vmatprep.subr.bf16.mxu1 %v7919_v29  ;;  %7950 = vmatpush1.bf16.msra.mxu0 %v7949_v14  ;;  %v7959_v28 = vpack.c.bf16 %v5327_v27, %v5325_v26  ;;  %v5324_v29 = vld [vmem:[#allocation16 + $0x100] sm:$0xff]  ;;  %v7985_v14 = vpack.c.bf16 %v5350_v13, %v5348_v8  ;;  %v5443_v26 = vld [vmem:[#allocation17 + $0x10] sm:$0xff]  ;;  %v5446_v27 = vld [vmem:[#allocation17 + $0x28] sm:$0xff] }
 0xfce   : > { %7952 = vmatprep.subr.bf16.mxu0 %v7951_v16  ;;  %v7961_v35 = vpack.c.bf16 %v5326_v32, %v5324_v29  ;;  %v5353_v16 = vld [vmem:[#allocation16 + $0x1e8] sm:$0xff]  ;;  %v5445_v32 = vld [vmem:[#allocation17 + $0x20] sm:$0xff]  ;;  %v5480_v13 = vld [vmem:[#allocation17 + $0x138] sm:$0xff] }
 0xfcf   : > { %v7987_v20 = vpack.c.bf16 %v5355_v18, %v5353_v16  ;;  %v5478_v8 = vld [vmem:[#allocation17 + $0x128] sm:$0xff]  ;;  %v5477_v18 = vld [vmem:[#allocation17 + $0x120] sm:$0xff] }
 0xfd0   : > { %7922 = vmatpush1.bf16.msra.mxu1 %v7921_v34  ;;  %v5331_v34 = vld [vmem:[#allocation16 + $0x138] sm:$0xff]  ;;  %v8027_v16 = vpack.c.bf16 %v5480_v13, %v5478_v8  ;;  %v5505_v13 = vld [vmem:[%s9822_s22] sm:$0x3] }
 0xfd1   : > { %7924 = vmatprep.subr.bf16.mxu1 %v7923_v38  ;;  %7954 = vmatpush1.bf16.msra.mxu0 %v7953_v23  ;;  %v7963_v36 = vpack.c.bf16 %v5331_v34, %v5329_v48  ;;  %v5328_v38 = vld [vmem:[#allocation16 + $0x120] sm:$0xff]  ;;  %v5442_v23 = vld [vmem:[#allocation17 + $0x8] sm:$0xff]  ;;  %v5447_v48 = vld [vmem:[#allocation17 + $0x30] sm:$0xff] }
 0xfd2   : > { %7956 = vmatprep.subr.bf16.mxu0 %v7955_v24  ;;  %v7965_v42 = vpack.c.bf16 %v5330_v39, %v5328_v38  ;;  %v5444_v24 = vld [vmem:[#allocation17 + $0x18] sm:$0xff]  ;;  %v5450_v34 = vld [vmem:[#allocation17 + $0x48] sm:$0xff]  ;;  %v5449_v39 = vld [vmem:[#allocation17 + $0x40] sm:$0xff] }
 0xfd3   : > { %v7991_v50 = vpack.c.bf16 %v5444_v24, %v5442_v23  ;;  %v5481_v24 = vld [vmem:[#allocation17 + $0x140] sm:$0xff] }
 0xfd4   : > { %7926 = vmatpush1.bf16.msra.mxu1 %v7925_v40  ;;  %v5335_v40 = vld [vmem:[#allocation16 + $0x158] sm:$0xff] }
 0xfd5   : > { %7958 = vmatpush1.bf16.msra.mxu0 %v7957_v15  ;;  %v7967_v31 = vpack.c.bf16 %v5335_v40, %v5333_v9  ;;  %v5448_v15 = vld [vmem:[#allocation17 + $0x38] sm:$0xff]  ;;  %7992 = vmatprep.subr.bf16.mxu1 %v7991_v50  ;;  %v5451_v9 = vld [vmem:[#allocation17 + $0x50] sm:$0xff]  ;;  %v5454_v40 = vld [vmem:[#allocation17 + $0x68] sm:$0xff] }
 0xfd6   : > { %7960 = vmatprep.subr.bf16.mxu0 %v7959_v28  ;;  %v7993_v28 = vpack.c.bf16 %v5443_v26, %v5441_v25  ;;  %v7995_v29 = vpack.c.bf16 %v5448_v15, %v5446_v27  ;;  %v5483_v25 = vld [vmem:[#allocation17 + $0x150] sm:$0xff]  ;;  %v5486_v50 = vld [vmem:[#allocation17 + $0x168] sm:$0xff]  ;;  %v5488_v26 = vld [vmem:[#allocation17 + $0x178] sm:$0xff] }
 0xfd7   : > { %v8033_v27 = vpack.c.bf16 %v5483_v25, %v5481_v24  ;;  %v8035_v15 = vpack.c.bf16 %v5488_v26, %v5486_v50 }
 0xfd9   : > { %7962 = vmatpush1.bf16.msra.mxu0 %v7961_v35  ;;  %v5452_v35 = vld [vmem:[#allocation17 + $0x58] sm:$0xff] }
 0xfda   : > { %7964 = vmatprep.subr.bf16.mxu0 %v7963_v36  ;;  %v7997_v36 = vpack.c.bf16 %v5447_v48, %v5445_v32  ;;  %v7999_v38 = vpack.c.bf16 %v5452_v35, %v5450_v34  ;;  %v5490_v32 = vld [vmem:[#allocation17 + $0x188] sm:$0xff]  ;;  %v5492_v48 = vld [vmem:[#allocation17 + $0x198] sm:$0xff] }
 0xfdb   : > { %v8039_v35 = vpack.c.bf16 %v5492_v48, %v5490_v32 }
 0xfdd   : > { %7966 = vmatpush1.bf16.msra.mxu0 %v7965_v42  ;;  %v5456_v42 = vld [vmem:[#allocation17 + $0x78] sm:$0xff] }
 0xfde   : > { %7968 = vmatprep.subr.bf16.mxu0 %v7967_v31  ;;  %v8001_v31 = vpack.c.bf16 %v5451_v9, %v5449_v39  ;;  %v8003_v45 = vpack.c.bf16 %v5456_v42, %v5454_v40  ;;  %v5494_v39 = vld [vmem:[#allocation17 + $0x1a8] sm:$0xff]  ;;  %v5496_v9 = vld [vmem:[#allocation17 + $0x1b8] sm:$0xff] }
 0xfdf   : > { %v8043_v42 = vpack.c.bf16 %v5496_v9, %v5494_v39 }
 0xfe1   : > { %7970 = vmatpush1.bf16.msra.mxu0 %v7969_v43  ;;  %v5460_v43 = vld [vmem:[#allocation17 + $0x98] sm:$0xff] }
 0xfe2   : > { %7972 = vmatprep.subr.bf16.mxu0 %v7971_v54  ;;  %v8005_v54 = vpack.c.bf16 %v5455_v47, %v5453_v46  ;;  %v8007_v51 = vpack.c.bf16 %v5460_v43, %v5458_v49  ;;  %v5498_v46 = vld [vmem:[#allocation17 + $0x1c8] sm:$0xff]  ;;  %v5500_v47 = vld [vmem:[#allocation17 + $0x1d8] sm:$0xff] }
 0xfe3   : > { %v8047_v43 = vpack.c.bf16 %v5500_v47, %v5498_v46 }
 0xfe5   : > { %7974 = vmatpush1.bf16.msra.mxu0 %v7973_v55  ;;  %v5464_v55 = vld [vmem:[#allocation17 + $0xb8] sm:$0xff] }
 0xfe6   : > { %7976 = vmatprep.subr.bf16.mxu0 %v7975_v56  ;;  %v8009_v56 = vpack.c.bf16 %v5459_v52, %v5457_v1  ;;  %v8011_v57 = vpack.c.bf16 %v5464_v55, %v5462_v53  ;;  %v5284_v1 = vsub.s32 1, %v9095_v10 }
 0xfe9   : > { %7978 = vmatpush1.bf16.msra.mxu0 %v7977_v11  ;;  %v5468_v11 = vld [vmem:[#allocation17 + $0xd8] sm:$0xff] }
 0xfea   : > { %7980 = vmatprep.subr.bf16.mxu0 %v7979_v21  ;;  %v8013_v21 = vpack.c.bf16 %v5463_v60, %v5461_v58  ;;  %v8015_v30 = vpack.c.bf16 %v5468_v11, %v5466_v6  ;;  %v5497_v11 = vld [vmem:[#allocation17 + $0x1c0] sm:$0xff] }
 0xfed   : > { %7982 = vmatpush1.bf16.msra.mxu0 %v7981_v22  ;;  %v5472_v22 = vld [vmem:[#allocation17 + $0xf8] sm:$0xff] }
 0xfee   : > { %7984 = vmatprep.subr.bf16.mxu0 %v7983_v33  ;;  %v8017_v33 = vpack.c.bf16 %v5467_v12, %v5465_v62  ;;  %v5502_v62 = vld [vmem:[#allocation17 + $0x1e8] sm:$0xff]  ;;  %v5504_v12 = vld [vmem:[#allocation17 + $0x1f8] sm:$0xff] }
 0xff1   : > { %7986 = vmatpush1.bf16.msra.mxu0 %v7985_v14 }
 0xff2   : > { %7988 = vmatprep.subr.bf16.mxu0 %v7987_v20  ;;  %v5479_v20 = vld [vmem:[#allocation17 + $0x130] sm:$0xff] }
0x1086   : > { %v4927_v37 = vpop.f32.mrb[40].mxu1 }
0x1087   : > { %v4931_v41 = vadd.f32 %v4927_v37, %v9651_v61  ;;  %v7090_v44 = vpop.f32.mrb[41].mxu1  ;;  %v5354_v61 = vld [vmem:[#allocation16 + $0x1f0] sm:$0xff]  ;;  %v8019_v37 = vpack.c.bf16 %v5472_v22, %v5470_v17  ;;  %v8051_v17 = vpack.c.bf16 %v5504_v12, %v5502_v62  ;;  %v5501_v22 = vld [vmem:[#allocation17 + $0x1e0] sm:$0xff] }
0x1088   : > { %v7989_v19 = vpack.c.bf16 %v5354_v61, %v5352_v0  ;;  %v5471_v44 = vld [vmem:[#allocation17 + $0xf0] sm:$0xff]  ;;  %v5482_v0 = vld [vmem:[#allocation17 + $0x148] sm:$0xff]  ;;  %v5484_v61 = vld [vmem:[#allocation17 + $0x158] sm:$0xff] }
0x1089   : > { %v8031_v23 = vpack.c.bf16 %v5484_v61, %v5482_v0 }
0x108a   : > { %v5087_v63 = vpop.f32.mrb[94].mxu0  ;;  %7990 = vmatpush1.bf16.msra.mxu0 %v7989_v19  ;;  %v8029_v19 = vpack.c.bf16 %v5479_v20, %v5477_v18  ;;  %v5514_v20 = vrot.slane %v5505_v13, %v5284_v1 }
0x108b   : > { %v5091_v4 = vadd.f32 %v5087_v63, %v4931_v41  ;;  %v7130_v5 = vpop.f32.mrb[95].mxu0  ;;  %v5469_v41 = vld [vmem:[#allocation17 + $0xe0] sm:$0xff]  ;;  %v5474_v63 = vld [vmem:[#allocation17 + $0x108] sm:$0xff] }
0x108d   : > { %v5093_v59 = vadd.f32 %v5092_v3, %v5091_v4  ;;  %v5476_v3 = vld [vmem:[#allocation17 + $0x118] sm:$0xff]  ;;  %v8021_v4 = vpack.c.bf16 %v5471_v44, %v5469_v41  ;;  %v5356_v41 = vld [vmem:[%s9821_s15] sm:$0x3]  ;;  %s8490_s15 = scalar_lea.vmem %s9686_s11, 32 }
0x108e   : > { %v8023_v5 = vpack.c.bf16 %v5476_v3, %v5474_v63  ;;  %v5365_v63 = vrot.slane %v5356_v41, %v5284_v1  ;;  %p8491_p0 = scmp.ne.s32.totalorder %s9686_s11, %s8490_s15  ;;  %p8498_p11 = scmp.lt.s32.totalorder %s8496_s5, %s8490_s15 }
0x108f   : > { %v5094_v7 = vmax.f32 %v5093_v59, 0.0  ;;  %v5473_v59 = vld [vmem:[#allocation17 + $0x100] sm:$0xff] }
0x1090   : > { %p8492_p8 = pnand %p8491_p0, %p9824_p2  ;;  %p8499_p3 = por %p8498_p11, %p8497_p10 }
0x1091   : > { %5270 = vmatmul.mubr.f32.vlgmr.msra.gmra.mrb[42].mxu1 %v5094_v7  ;;  %v5475_v7 = vld [vmem:[#allocation17 + $0x110] sm:$0xff] }
0x1092   : > { %7994 = vmatpush1.bf16.msra.mxu1 %v7993_v28  ;;  %v8025_v14 = vpack.c.bf16 %v5475_v7, %v5473_v59  ;;  %v5485_v28 = vld [vmem:[#allocation17 + $0x160] sm:$0xff]  ;;  %p8493_p6 = pneg %p8492_p8 }
0x1093   : > { %7996 = vmatprep.subr.bf16.mxu1 %v7995_v29  ;;  %v5487_v29 = vld [vmem:[#allocation17 + $0x170] sm:$0xff] }
0x1094   : > { %v8037_v34 = vpack.c.bf16 %v5487_v29, %v5485_v28  ;;  %p8500_p5 = pnand %p8499_p3, %p8493_p6 }
0x1096   : > { %7998 = vmatpush1.bf16.msra.mxu1 %v7997_v36  ;;  %v5489_v36 = vld [vmem:[#allocation17 + $0x180] sm:$0xff] }
0x1097   : > { %8000 = vmatprep.subr.bf16.mxu1 %v7999_v38  ;;  %v5491_v38 = vld [vmem:[#allocation17 + $0x190] sm:$0xff] }
0x1098   : > { %v8041_v40 = vpack.c.bf16 %v5491_v38, %v5489_v36 }
0x109a   : > { %8002 = vmatpush1.bf16.msra.mxu1 %v8001_v31  ;;  %v5493_v31 = vld [vmem:[#allocation17 + $0x1a0] sm:$0xff] }
0x109b   : > { %8004 = vmatprep.subr.bf16.mxu1 %v8003_v45  ;;  %v5495_v45 = vld [vmem:[#allocation17 + $0x1b0] sm:$0xff] }
0x109c   : > { %v8045_v49 = vpack.c.bf16 %v5495_v45, %v5493_v31 }
0x109e   : > { %8006 = vmatpush1.bf16.msra.mxu1 %v8005_v54  ;;  %v5280_v54 = vsub.s32 0, %v9095_v10 }
0x109f   : > { %8008 = vmatprep.subr.bf16.mxu1 %v8007_v51  ;;  %v5276_v51 = vld [vmem:[%s9820_s8] sm:$0x3]  ;;  %s9823_s8 = sld [smem:[#allocation43_spill]] }
0x10a0   : > { %v5281_v52 = vrot.slane %v5276_v51, %v5280_v54  ;;  %v5285_v53 = vrot.slane %v5276_v51, %v5284_v1  ;;  %v5361_v44 = vrot.slane %v5356_v41, %v5280_v54  ;;  %v5510_v18 = vrot.slane %v5505_v13, %v5280_v54 }
0x10a2   : > { %8010 = vmatpush1.bf16.msra.mxu1 %v8009_v56 }
0x10a3   : > { %8012 = vmatprep.subr.bf16.mxu1 %v8011_v57 }
0x10a5   : > { %s9684_s16 = scalar_lea.hbm %s9823_s8, %s5894_s21 }
0x10a6   : > { %8014 = vmatpush1.bf16.msra.mxu1 %v8013_v21  ;;  %v5499_v21 = vld [vmem:[#allocation17 + $0x1d0] sm:$0xff] }
0x10a7   : > { %8016 = vmatprep.subr.bf16.mxu1 %v8015_v30  ;;  %v8049_v30 = vpack.c.bf16 %v5499_v21, %v5497_v11 }
0x10aa   : > { %8018 = vmatpush1.bf16.msra.mxu1 %v8017_v33  ;;  %v5503_v33 = vld [vmem:[#allocation17 + $0x1f0] sm:$0xff] }
0x10ab   : > { %8020 = vmatprep.subr.bf16.mxu1 %v8019_v37  ;;  %v8053_v37 = vpack.c.bf16 %v5503_v33, %v5501_v22 }
0x10ae   : > { %8022 = vmatpush1.bf16.msra.mxu1 %v8021_v4 }
0x10af   : > { %8024 = vmatprep.subr.bf16.mxu1 %v8023_v5 }
0x10b2   : > { %8026 = vmatpush1.bf16.msra.mxu1 %v8025_v14  ;;  %v8595_v14 = vmov 1966171168  }
0x10b3   : > { %8028 = vmatprep.subr.bf16.mxu1 %v8027_v16  ;;  %v5592_v16 = vunpack.c.l.s4 %v8595_v14 }
0x10b5   : > { %v5593_v0 = vunpack.c.0.s8 %v5592_v16 }
0x10b6   : > { %8030 = vmatpush1.bf16.msra.mxu1 %v8029_v19 }
0x10b7   : > { %8032 = vmatprep.subr.bf16.mxu1 %v8031_v23  ;;  %v5596_v25 = vsub.s32 %v5593_v0, %v9095_v10 }
0x10ba   : > { %8034 = vmatpush1.bf16.msra.mxu1 %v8033_v27 }
0x10bb   : > { %8036 = vmatprep.subr.bf16.mxu1 %v8035_v15 }
0x10be   : > { %8038 = vmatpush1.bf16.msra.mxu1 %v8037_v34 }
0x10bf   : > { %8040 = vmatprep.subr.bf16.mxu1 %v8039_v35 }
0x10c2   : > { %8042 = vmatpush1.bf16.msra.mxu1 %v8041_v40 }
0x10c3   : > { %8044 = vmatprep.subr.bf16.mxu1 %v8043_v42 }
0x10c6   : > { %8046 = vmatpush1.bf16.msra.mxu1 %v8045_v49 }
0x10c7   : > { %8048 = vmatprep.subr.bf16.mxu1 %v8047_v43 }
0x10ca   : > { %8050 = vmatpush1.bf16.msra.mxu1 %v8049_v30 }
0x10cb   : > { %8052 = vmatprep.subr.bf16.mxu1 %v8051_v17 }
0x10ce   : > { %8054 = vmatpush1.bf16.msra.mxu1 %v8053_v37 }
0x1164   : > { %v5271_v55 = vpop.f32.mrb[42].mxu1 }
0x1165   : > { %v5288_v56 = vadd.f32 %v5281_v52, %v5271_v55  ;;  %v5273_v57 = vpop.f32.mrb[43].mxu1 }
0x1166   : > { %v5289_v58 = vadd.f32 %v5285_v53, %v5273_v57 }
0x1167   : > { %v5290_v6 = vmax.f32 %v5288_v56, 0.0 }
0x1168   : > { %v5291_v60 = vmax.f32 %v5289_v58, 0.0 }
0x116a   : > { %5432 = vmatprep.mubr.f32.mxu0 %v5291_v60 }
0x116b   : > { %5433 = vmatmul.mubr.f32.vlgmr.msra.gmra.mrb[96].mxu0 %v5290_v6 }
0x123e   : > { %v5434_v3 = vpop.f32.mrb[96].mxu0 }
0x123f   : > { %v5435_v4 = vadd.f32 %v5434_v3, %v5361_v44  ;;  %v5436_v5 = vpop.f32.mrb[97].mxu0 }
0x1240   : > { %v5437_v59 = vadd.f32 %v5436_v5, %v5365_v63 }
0x1241   : > { %v5439_v8 = vmax.f32 %v5435_v4, 0.0 }
0x1242   : > { %v5440_v7 = vmax.f32 %v5437_v59, 0.0 }
0x1244   : > { %5581 = vmatprep.mubr.f32.mxu1 %v5440_v7 }
0x1245   : > { %5582 = vmatmul.mubr.f32.vlgmr.msra.gmra.mrb[44].mxu1 %v5439_v8 }
0x1318   : > { %v5583_v61 = vpop.f32.mrb[44].mxu1 }
0x1319   : > { %v5584_v19 = vadd.f32 %v5583_v61, %v5510_v18  ;;  %v5585_v23 = vpop.f32.mrb[45].mxu1 }
0x131a   : > { %v5586_v24 = vadd.f32 %v5585_v23, %v5514_v20 }
0x131c   : > { %v5590_v50 = vcombine.low %v5584_v19, %v5586_v24 }
0x131e   : > { %v5597_v26 = vrot.slane %v5590_v50, %v5596_v25 }
0x1320   : > { %v5604_v27 = vrot.slane %v5597_v26, %v5596_v25 }
0x1322   : > { %5610 = vst.msk [vmem:[%s816_s30] sm:$0x3] %vm5608_vm9, %v5604_v27 }
0x1323   : > { %8503 = shalt.err (!%p8500_p5)
}
0x1324   : > { %s8504_s10 = scalar_lea.hbm %s9684_s16, 32  ;;  %s8508_s21 = scalar_lea.hbm %s9823_s8, 64 }
0x1325   : > { %p8505_p9 = scmp.ne.s32.totalorder %s9684_s16, %s8504_s10  ;;  %p8509_p12 = scmp.lt.u32.totalorder %s9684_s16, %s9823_s8 }
0x1326   : > { %p8510_p1 = scmp.lt.u32.totalorder %s8508_s21, %s8504_s10  ;;  %p8512_p0 = scmp.lt.u32.totalorder %s8504_s10, %s9684_s16 }
0x1327   : > { %p8506_p7 = pnand %p8505_p9, %p9824_p2 }
0x1328   : > { %p8511_p13 = por %p8510_p1, %p8509_p12 }
0x1329   : > { %p8507_p4 = pneg %p8506_p7 }
0x132a   : > { %p8513_p8 = por %p8512_p0, %p8511_p13 }
0x132c   : > { %p8514_p6 = pnand %p8513_p8, %p8507_p4 }
0x132e   : > { %8517 = shalt.err (!%p8514_p6)
}
0x132f   : > { %8101 = dma.vmem_to_hbm [thread:$0]  (%p9824_p2), %s9686_s11, 32, %s9684_s16, %s5612_s24  }
0x1330 PF: > { %s5638_s6 = sand.u32 1, %s8564_s2   ;;  %p9825_p10 = scmp.ne.s32.totalorder %s9799_s28, 0 }
0x1331   : > { %p9826_p11 = scmp.ge.s32.totalorder %s8576_s27, 2  ;;  %s5639_s15 = scalar_lea.sflag [#allocation4], %s5638_s6 }
0x1333   : > { %p8136_p3 = pnand %p9826_p11, %p9825_p10 }
0x1335   : > { %8559 = dma.done.wait (!%p8136_p3), %s5639_s15, 32  }
0x1336   : > { %8561 = vsyncadd (!%p8136_p3), %s5639_s15, 4294967264  ;;  %p39_p5 = scmp.ge.s32.totalorder %s8978_s4, 4   ;;  %s9827_s2 = smov %s8568_s25 }
0x1337   : > { %s9828_s25 = smov %s8572_s26  ;;  %s9829_s26 = smov %s8990_s13 }
0x1338   : > { %s9830_s27 = smov %s8978_s4  ;;  %41 = sbr.rel (!%p39_p5) target bundleno = 28 (0x1c), region = 206 }
0x133f   :  { %5644 = vsyncpa [#allocation3], 1 }
0x1340   :  { %5646 = vsyncpa [#allocation3 + $0x1], 1 }
0x1341   :  { %5647 = vsyncpa [#allocation6], 1 }
0x1342   :  { %5648 = vsyncpa [#allocation9], 1 }
0x1343   :  { %5649 = vsyncpa [#allocation12], 1 }
0x1344   :  { %5650 = vsyncpa [#allocation15], 1 }
0x1345   :  { %5651 = vsyncpa [#allocation18], 1 }
0x1346   :  { %5652 = vsyncpa [#allocation4], 1 }
0x1347   :  { %5654 = vsyncpa [#allocation4 + $0x1], 1 }

</bundles_post_ra>
